<compile_context>
chip_gen: v7x
topology: tpu7x:2x2x1
jax: 0.10.0
libtpu: 0.0.40
codegen_flags: <defaults>
</compile_context>

<pallas_src>
import numpy as np
import jax
import jax.numpy as jnp
from jax.experimental import pallas as pl
from jax.experimental.pallas import tpu as pltpu

HIDDEN = 32                      # Encoder hidden dim
NUM_LAYERS = 3                   # num_gc_layers
FEAT = 3                         # true input node-feature dim (zero-padded to HIDDEN)
EMB_DIM = HIDDEN * NUM_LAYERS    # 96  (== self.embedding_dim)
K_PAD = 128                      # lane-aligned contraction dim for the projection
OUT_DIM = 768                    # mapping_matrix = (96, 768); 768 = 6 * 128 lanes
BN_EPS = 1e-5                    # BatchNorm1d eval-mode, default running stats
BN_SCALE = float(1.0 / np.sqrt(1.0 + BN_EPS))
GRAPH_TILE = 16                  # graphs / grid step: 16 * 16 nodes = 256 MXU rows


def _infograph_kernel(a_ref, x_ref, w1_ref, b1_ref, w2_ref, b2_ref, map_ref,
                      out_ref, adiag_ref, emb_ref):
    gt, n, _ = a_ref.shape
    m = gt * n

    # --- build the block-diagonal (A + I) aggregation tile in VMEM ----------
    # Re-zeroed every step (only m*m bf16 stores) so correctness does not
    # depend on how the "parallel" grid axis is split across TensorCores.
    adiag_ref[...] = jnp.zeros_like(adiag_ref)
    for g in range(gt):                       # static unroll: gt small masked stores
        adiag_ref[g * n:(g + 1) * n, g * n:(g + 1) * n] = a_ref[g]

    # node features flattened to one (m, 32) operand for the whole layer loop
    xb = x_ref[...].reshape(m, HIDDEN).astype(jnp.bfloat16)

    # K=128-padded pooled-embedding buffer (lanes 96:128 stay zero)
    emb_ref[...] = jnp.zeros_like(emb_ref)

    for l in range(NUM_LAYERS):
        # GIN aggregation: one MXU-native (m, m) @ (m, 32) matmul, f32 acc.
        agg = jnp.dot(adiag_ref[...], xb, preferred_element_type=jnp.float32)
        # 2-layer GIN MLP (bf16 operands, f32 accumulation).
        h = jnp.dot(agg.astype(jnp.bfloat16), w1_ref[l],
                    preferred_element_type=jnp.float32) + b1_ref[l]
        h = jnp.maximum(h, 0.0)                                   # MLP inner ReLU
        z = jnp.dot(h.astype(jnp.bfloat16), w2_ref[l],
                    preferred_element_type=jnp.float32) + b2_ref[l]
        # Encoder.forward: x = relu(conv(x)); x = bn(x)  (eval-mode BN scale).
        x_f32 = jnp.maximum(z, 0.0) * BN_SCALE
        xb = x_f32.astype(jnp.bfloat16)
        # global_add_pool for this layer -> (gt, 32), written straight into the
        # lane offsets of the padded embedding buffer (no concatenate).
        pooled = jnp.sum(x_f32.reshape(gt, n, HIDDEN), axis=1)
        emb_ref[:, l * HIDDEN:(l + 1) * HIDDEN] = pooled.astype(jnp.bfloat16)

    # single lane-aligned projection: (gt, 128) @ (128, 768), bf16 ops, f32 acc
    out_ref[...] = jnp.dot(emb_ref[...], map_ref[...],
                           preferred_element_type=jnp.float32)


@jax.jit
def infograph_embed_map(adj_blocks, x_pad, w1s, b1s, w2s, b2s, mapping_pad):
    num_graphs, n_per, _ = adj_blocks.shape
    assert num_graphs % GRAPH_TILE == 0
    n_steps = num_graphs // GRAPH_TILE
    m = GRAPH_TILE * n_per
    n_total = num_graphs * n_per

    flops = (NUM_LAYERS * n_steps * 2 * m * m * HIDDEN             # block-diag aggregation
             + NUM_LAYERS * 2 * 2 * n_total * HIDDEN * HIDDEN      # 2 MLP linears
             + 2 * num_graphs * K_PAD * OUT_DIM)                   # projection
    bytes_accessed = sum(int(np.prod(a.shape)) * a.dtype.itemsize
                         for a in (adj_blocks, x_pad, w1s, b1s, w2s, b2s, mapping_pad))
    bytes_accessed += num_graphs * OUT_DIM * 4

    return pl.pallas_call(
        _infograph_kernel,
        out_shape=jax.ShapeDtypeStruct((num_graphs, OUT_DIM), jnp.float32),
        grid_spec=pltpu.PrefetchScalarGridSpec(
            num_scalar_prefetch=0,
            grid=(n_steps,),
            in_specs=[
                pl.BlockSpec((GRAPH_TILE, n_per, n_per), lambda t: (t, 0, 0)),   # (A+I) blocks, bf16
                pl.BlockSpec((GRAPH_TILE, n_per, HIDDEN), lambda t: (t, 0, 0)),  # x, f32
                pl.BlockSpec((NUM_LAYERS, HIDDEN, HIDDEN), lambda t: (0, 0, 0)), # w1 stack, bf16
                pl.BlockSpec((NUM_LAYERS, 1, HIDDEN), lambda t: (0, 0, 0)),      # b1 stack, f32
                pl.BlockSpec((NUM_LAYERS, HIDDEN, HIDDEN), lambda t: (0, 0, 0)), # w2 stack, bf16
                pl.BlockSpec((NUM_LAYERS, 1, HIDDEN), lambda t: (0, 0, 0)),      # b2 stack, f32
                pl.BlockSpec((K_PAD, OUT_DIM), lambda t: (0, 0)),                # mapping, bf16
            ],
            out_specs=pl.BlockSpec((GRAPH_TILE, OUT_DIM), lambda t: (t, 0)),
            scratch_shapes=[
                pltpu.VMEM((m, m), jnp.bfloat16),               # block-diagonal (A+I) tile
                pltpu.VMEM((GRAPH_TILE, K_PAD), jnp.bfloat16),  # K-padded pooled embedding
            ],
        ),
        compiler_params=pltpu.CompilerParams(
            dimension_semantics=("parallel",),      # graph tiles are independent
        ),
        cost_estimate=pl.CostEstimate(flops=flops, transcendentals=0,
                                      bytes_accessed=bytes_accessed),
    )(adj_blocks, x_pad, w1s, b1s, w2s, b2s, mapping_pad)


def _xavier_uniform(key, fan_in, fan_out):
    # matches torch.nn.init.xavier_uniform_ on a Linear(fan_in -> fan_out) weight
    bound = float(np.sqrt(6.0 / (fan_in + fan_out)))
    return jax.random.uniform(key, (fan_in, fan_out), jnp.float32, -bound, bound)


def _make_params(key):
    keys = jax.random.split(key, 2 * NUM_LAYERS)
    w1s, w2s = [], []
    in_dim = FEAT
    for l in range(NUM_LAYERS):
        w1 = _xavier_uniform(keys[2 * l], in_dim, HIDDEN)
        # zero-pad the contraction dim (3 -> 32 for layer 0); zero rows contribute nothing
        w1_full = jnp.zeros((HIDDEN, HIDDEN), jnp.float32).at[:in_dim, :].set(w1)
        w2 = _xavier_uniform(keys[2 * l + 1], HIDDEN, HIDDEN)
        w1s.append(w1_full)
        w2s.append(w2)
        in_dim = HIDDEN
    w1s = jnp.stack(w1s)                                   # (3, 32, 32)
    w2s = jnp.stack(w2s)                                   # (3, 32, 32)
    b1s = jnp.zeros((NUM_LAYERS, 1, HIDDEN), jnp.float32)  # init_emb(): bias.fill_(0.0)
    b2s = jnp.zeros((NUM_LAYERS, 1, HIDDEN), jnp.float32)
    return w1s, b1s, w2s, b2s


def _reference(x_flat, adj_full, pool, w1s_bf, b1s, w2s_bf, b2s, mapping):
    # pure-JAX reference with the ORIGINAL structure: dense (N, N) adjacency,
    # explicit self-loop add, explicit eval-BN scale, (B, N) pool matmul,
    # concat-then-project.  The bf16 operand casts mirror the kernel's
    # intentional low-precision choices (adjacency/activations/weights/mapping
    # in bf16, f32 accumulation everywhere).
    hp = jax.lax.Precision.HIGHEST
    adj_bf = adj_full.astype(jnp.bfloat16)
    map_bf = mapping.astype(jnp.bfloat16)
    x = x_flat
    pooled_all = []
    for l in range(NUM_LAYERS):
        xb = x.astype(jnp.bfloat16)
        agg = (jnp.dot(adj_bf, xb, preferred_element_type=jnp.float32)
               + xb.astype(jnp.float32))                            # explicit self-loop
        h = jnp.maximum(jnp.dot(agg.astype(jnp.bfloat16), w1s_bf[l],
                                preferred_element_type=jnp.float32) + b1s[l], 0.0)
        z = jnp.dot(h.astype(jnp.bfloat16), w2s_bf[l],
                    preferred_element_type=jnp.float32) + b2s[l]
        x = jnp.maximum(z, 0.0) * BN_SCALE                          # explicit eval-BN
        pooled_all.append(jnp.dot(pool, x, precision=hp))           # global_add_pool
    emb = jnp.concatenate(pooled_all, axis=-1)                      # (B, 96)
    return jnp.dot(emb.astype(jnp.bfloat16), map_bf,
                   preferred_element_type=jnp.float32)              # (B, 768)


if __name__ == "__main__":
    key = jax.random.PRNGKey(0)
    k_feat, k_map, k_params = jax.random.split(key, 3)

    num_graphs = 64                 # 4 grid steps of GRAPH_TILE=16 graphs (feeds 2 v7x TCs)
    n_per = 16                      # nodes per graph (multiple of 8)
    n_total = num_graphs * n_per

    # node features (G, n, 3) -> zero-padded into the 32-wide hidden layout
    x_feat = jax.random.normal(k_feat, (num_graphs, n_per, FEAT), jnp.float32)
    x_pad = jnp.zeros((num_graphs, n_per, HIDDEN), jnp.float32).at[:, :, :FEAT].set(x_feat)

    # deterministic graph structure: undirected ring per graph + one per-graph chord
    adj_np = np.zeros((num_graphs, n_per, n_per), np.float32)
    for g in range(num_graphs):
        for i in range(n_per):
            j = (i + 1) % n_per
            adj_np[g, i, j] = 1.0
            adj_np[g, j, i] = 1.0
        c = (2 + 3 * g) % n_per
        if c != 0:
            adj_np[g, 0, c] = 1.0
            adj_np[g, c, 0] = 1.0

    # kernel adjacency: per-graph diagonal blocks, self-loop folded, bf16 (exact for 0/1)
    adj_blocks = jnp.asarray(adj_np + np.eye(n_per, dtype=np.float32)[None]).astype(jnp.bfloat16)

    # reference dense adjacency (block-diagonal, no self-loop) + pool membership matrix
    adj_full_np = np.zeros((n_total, n_total), np.float32)
    pool_np = np.zeros((num_graphs, n_total), np.float32)
    for g in range(num_graphs):
        s = g * n_per
        adj_full_np[s:s + n_per, s:s + n_per] = adj_np[g]
        pool_np[g, s:s + n_per] = 1.0
    adj_full = jnp.asarray(adj_full_np)
    pool = jnp.asarray(pool_np)

    # Encoder GIN-MLP weights (xavier_uniform, zero bias per init_emb); bf16 for the MXU
    w1s, b1s, w2s, b2s = _make_params(k_params)
    w1s_bf = w1s.astype(jnp.bfloat16)
    w2s_bf = w2s.astype(jnp.bfloat16)

    # mapping_matrix = np.random.rand(96, 768) -> uniform [0, 1), deterministic here.
    # Kernel copy is zero-padded to K=128 rows (zero rows contribute nothing) and bf16.
    mapping = jax.random.uniform(k_map, (EMB_DIM, OUT_DIM), jnp.float32, 0.0, 1.0)
    mapping_pad_bf = (jnp.zeros((K_PAD, OUT_DIM), jnp.float32)
                      .at[:EMB_DIM].set(mapping)).astype(jnp.bfloat16)

    # TODO(synk): DataLoader / rna_data batching, args.prior / PriorDiscriminator have
    # no kernel equivalent; inputs are synthesized deterministically instead.

    out = infograph_embed_map(adj_blocks, x_pad, w1s_bf, b1s, w2s_bf, b2s, mapping_pad_bf)
    out = jax.block_until_ready(out)

    ref = _reference(x_pad.reshape(n_total, HIDDEN), adj_full, pool,
                     w1s_bf, b1s, w2s_bf, b2s, mapping)
    np.testing.assert_allclose(np.asarray(out), np.asarray(ref), rtol=2e-3, atol=2e-3)

    print("KERNEL_OK")
</pallas_src>

<mosaic_0001>
module attributes {stable_mosaic.version = 11 : i64} {
  func.func @_infograph_kernel(%arg0: i32, %arg1: memref<16x16x16xbf16, #tpu.memory_space<vmem>>, %arg2: memref<16x16x32xf32, #tpu.memory_space<vmem>>, %arg3: memref<3x32x32xbf16, #tpu.memory_space<vmem>>, %arg4: memref<3x1x32xf32, #tpu.memory_space<vmem>>, %arg5: memref<3x32x32xbf16, #tpu.memory_space<vmem>>, %arg6: memref<3x1x32xf32, #tpu.memory_space<vmem>>, %arg7: memref<128x768xbf16, #tpu.memory_space<vmem>>, %arg8: memref<16x768xf32, #tpu.memory_space<vmem>>, %arg9: memref<256x256xbf16, #tpu.memory_space<vmem>>, %arg10: memref<16x128xbf16, #tpu.memory_space<vmem>>) attributes {dimension_semantics = [#tpu.dimension_semantics<parallel>], iteration_bounds = array<i64: 4>, scalar_prefetch = 0 : i64, scratch_operands = 2 : i64, tpu.core_type = #tpu.core_type<tc>, window_params = [{transform_indices = @transform_0, window_bounds = array<i64: 16, 16, 16>}, {transform_indices = @transform_1, window_bounds = array<i64: 16, 16, 32>}, {pipeline_mode = #tpu.pipeline_mode<synchronous>, transform_indices = @transform_2, window_bounds = array<i64: 3, 32, 32>}, {pipeline_mode = #tpu.pipeline_mode<synchronous>, transform_indices = @transform_3, window_bounds = array<i64: 3, 1, 32>}, {pipeline_mode = #tpu.pipeline_mode<synchronous>, transform_indices = @transform_4, window_bounds = array<i64: 3, 32, 32>}, {pipeline_mode = #tpu.pipeline_mode<synchronous>, transform_indices = @transform_5, window_bounds = array<i64: 3, 1, 32>}, {pipeline_mode = #tpu.pipeline_mode<synchronous>, transform_indices = @transform_6, window_bounds = array<i64: 128, 768>}, {transform_indices = @transform_7, window_bounds = array<i64: 16, 768>}]} {
    %cst = arith.constant 0.000000e+00 : bf16
    %0 = vector.broadcast %cst : bf16 to vector<256x256xbf16>
    %c0 = arith.constant 0 : index
    %c0_0 = arith.constant 0 : index
    %1 = vector.load %arg9[%c0, %c0_0] : memref<256x256xbf16, #tpu.memory_space<vmem>>, vector<256x256xbf16>
    tpu.vector_store %arg9[%c0, %c0_0], %0 {strides = array<i32>} : memref<256x256xbf16, #tpu.memory_space<vmem>>, vector<256x256xbf16>,
    %c0_1 = arith.constant 0 : index
    %c0_2 = arith.constant 0 : index
    %c0_3 = arith.constant 0 : index
    %2 = vector.load %arg1[%c0_1, %c0_2, %c0_3] : memref<16x16x16xbf16, #tpu.memory_space<vmem>>, vector<1x16x16xbf16>
    %3 = vector.shape_cast %2 : vector<1x16x16xbf16> to vector<16x16xbf16>
    %c0_4 = arith.constant 0 : index
    %c0_5 = arith.constant 0 : index
    %4 = vector.load %arg9[%c0_4, %c0_5] : memref<256x256xbf16, #tpu.memory_space<vmem>>, vector<16x16xbf16>
    tpu.vector_store %arg9[%c0_4, %c0_5], %3 {strides = array<i32>} : memref<256x256xbf16, #tpu.memory_space<vmem>>, vector<16x16xbf16>,
    %c1 = arith.constant 1 : index
    %c0_6 = arith.constant 0 : index
    %c0_7 = arith.constant 0 : index
    %5 = vector.load %arg1[%c1, %c0_6, %c0_7] : memref<16x16x16xbf16, #tpu.memory_space<vmem>>, vector<1x16x16xbf16>
    %6 = vector.shape_cast %5 : vector<1x16x16xbf16> to vector<16x16xbf16>
    %c16 = arith.constant 16 : index
    %c16_8 = arith.constant 16 : index
    %7 = vector.load %arg9[%c16, %c16_8] : memref<256x256xbf16, #tpu.memory_space<vmem>>, vector<16x16xbf16>
    tpu.vector_store %arg9[%c16, %c16_8], %6 {strides = array<i32>} : memref<256x256xbf16, #tpu.memory_space<vmem>>, vector<16x16xbf16>,
    %c2 = arith.constant 2 : index
    %c0_9 = arith.constant 0 : index
    %c0_10 = arith.constant 0 : index
    %8 = vector.load %arg1[%c2, %c0_9, %c0_10] : memref<16x16x16xbf16, #tpu.memory_space<vmem>>, vector<1x16x16xbf16>
    %9 = vector.shape_cast %8 : vector<1x16x16xbf16> to vector<16x16xbf16>
    %c32 = arith.constant 32 : index
    %c32_11 = arith.constant 32 : index
    %10 = vector.load %arg9[%c32, %c32_11] : memref<256x256xbf16, #tpu.memory_space<vmem>>, vector<16x16xbf16>
    tpu.vector_store %arg9[%c32, %c32_11], %9 {strides = array<i32>} : memref<256x256xbf16, #tpu.memory_space<vmem>>, vector<16x16xbf16>,
    %c3 = arith.constant 3 : index
    %c0_12 = arith.constant 0 : index
    %c0_13 = arith.constant 0 : index
    %11 = vector.load %arg1[%c3, %c0_12, %c0_13] : memref<16x16x16xbf16, #tpu.memory_space<vmem>>, vector<1x16x16xbf16>
    %12 = vector.shape_cast %11 : vector<1x16x16xbf16> to vector<16x16xbf16>
    %c48 = arith.constant 48 : index
    %c48_14 = arith.constant 48 : index
    %13 = vector.load %arg9[%c48, %c48_14] : memref<256x256xbf16, #tpu.memory_space<vmem>>, vector<16x16xbf16>
    tpu.vector_store %arg9[%c48, %c48_14], %12 {strides = array<i32>} : memref<256x256xbf16, #tpu.memory_space<vmem>>, vector<16x16xbf16>,
    %c4 = arith.constant 4 : index
    %c0_15 = arith.constant 0 : index
    %c0_16 = arith.constant 0 : index
    %14 = vector.load %arg1[%c4, %c0_15, %c0_16] : memref<16x16x16xbf16, #tpu.memory_space<vmem>>, vector<1x16x16xbf16>
    %15 = vector.shape_cast %14 : vector<1x16x16xbf16> to vector<16x16xbf16>
    %c64 = arith.constant 64 : index
    %c64_17 = arith.constant 64 : index
    %16 = vector.load %arg9[%c64, %c64_17] : memref<256x256xbf16, #tpu.memory_space<vmem>>, vector<16x16xbf16>
    tpu.vector_store %arg9[%c64, %c64_17], %15 {strides = array<i32>} : memref<256x256xbf16, #tpu.memory_space<vmem>>, vector<16x16xbf16>,
    %c5 = arith.constant 5 : index
    %c0_18 = arith.constant 0 : index
    %c0_19 = arith.constant 0 : index
    %17 = vector.load %arg1[%c5, %c0_18, %c0_19] : memref<16x16x16xbf16, #tpu.memory_space<vmem>>, vector<1x16x16xbf16>
    %18 = vector.shape_cast %17 : vector<1x16x16xbf16> to vector<16x16xbf16>
    %c80 = arith.constant 80 : index
    %c80_20 = arith.constant 80 : index
    %19 = vector.load %arg9[%c80, %c80_20] : memref<256x256xbf16, #tpu.memory_space<vmem>>, vector<16x16xbf16>
    tpu.vector_store %arg9[%c80, %c80_20], %18 {strides = array<i32>} : memref<256x256xbf16, #tpu.memory_space<vmem>>, vector<16x16xbf16>,
    %c6 = arith.constant 6 : index
    %c0_21 = arith.constant 0 : index
    %c0_22 = arith.constant 0 : index
    %20 = vector.load %arg1[%c6, %c0_21, %c0_22] : memref<16x16x16xbf16, #tpu.memory_space<vmem>>, vector<1x16x16xbf16>
    %21 = vector.shape_cast %20 : vector<1x16x16xbf16> to vector<16x16xbf16>
    %c96 = arith.constant 96 : index
    %c96_23 = arith.constant 96 : index
    %22 = vector.load %arg9[%c96, %c96_23] : memref<256x256xbf16, #tpu.memory_space<vmem>>, vector<16x16xbf16>
    tpu.vector_store %arg9[%c96, %c96_23], %21 {strides = array<i32>} : memref<256x256xbf16, #tpu.memory_space<vmem>>, vector<16x16xbf16>,
    %c7 = arith.constant 7 : index
    %c0_24 = arith.constant 0 : index
    %c0_25 = arith.constant 0 : index
    %23 = vector.load %arg1[%c7, %c0_24, %c0_25] : memref<16x16x16xbf16, #tpu.memory_space<vmem>>, vector<1x16x16xbf16>
    %24 = vector.shape_cast %23 : vector<1x16x16xbf16> to vector<16x16xbf16>
    %c112 = arith.constant 112 : index
    %c112_26 = arith.constant 112 : index
    %25 = vector.load %arg9[%c112, %c112_26] : memref<256x256xbf16, #tpu.memory_space<vmem>>, vector<16x16xbf16>
    tpu.vector_store %arg9[%c112, %c112_26], %24 {strides = array<i32>} : memref<256x256xbf16, #tpu.memory_space<vmem>>, vector<16x16xbf16>,
    %c8 = arith.constant 8 : index
    %c0_27 = arith.constant 0 : index
    %c0_28 = arith.constant 0 : index
    %26 = vector.load %arg1[%c8, %c0_27, %c0_28] : memref<16x16x16xbf16, #tpu.memory_space<vmem>>, vector<1x16x16xbf16>
    %27 = vector.shape_cast %26 : vector<1x16x16xbf16> to vector<16x16xbf16>
    %c128 = arith.constant 128 : index
    %c128_29 = arith.constant 128 : index
    %28 = vector.load %arg9[%c128, %c128_29] : memref<256x256xbf16, #tpu.memory_space<vmem>>, vector<16x16xbf16>
    tpu.vector_store %arg9[%c128, %c128_29], %27 {strides = array<i32>} : memref<256x256xbf16, #tpu.memory_space<vmem>>, vector<16x16xbf16>,
    %c9 = arith.constant 9 : index
    %c0_30 = arith.constant 0 : index
    %c0_31 = arith.constant 0 : index
    %29 = vector.load %arg1[%c9, %c0_30, %c0_31] : memref<16x16x16xbf16, #tpu.memory_space<vmem>>, vector<1x16x16xbf16>
    %30 = vector.shape_cast %29 : vector<1x16x16xbf16> to vector<16x16xbf16>
    %c144 = arith.constant 144 : index
    %c144_32 = arith.constant 144 : index
    %31 = vector.load %arg9[%c144, %c144_32] : memref<256x256xbf16, #tpu.memory_space<vmem>>, vector<16x16xbf16>
    tpu.vector_store %arg9[%c144, %c144_32], %30 {strides = array<i32>} : memref<256x256xbf16, #tpu.memory_space<vmem>>, vector<16x16xbf16>,
    %c10 = arith.constant 10 : index
    %c0_33 = arith.constant 0 : index
    %c0_34 = arith.constant 0 : index
    %32 = vector.load %arg1[%c10, %c0_33, %c0_34] : memref<16x16x16xbf16, #tpu.memory_space<vmem>>, vector<1x16x16xbf16>
    %33 = vector.shape_cast %32 : vector<1x16x16xbf16> to vector<16x16xbf16>
    %c160 = arith.constant 160 : index
    %c160_35 = arith.constant 160 : index
    %34 = vector.load %arg9[%c160, %c160_35] : memref<256x256xbf16, #tpu.memory_space<vmem>>, vector<16x16xbf16>
    tpu.vector_store %arg9[%c160, %c160_35], %33 {strides = array<i32>} : memref<256x256xbf16, #tpu.memory_space<vmem>>, vector<16x16xbf16>,
    %c11 = arith.constant 11 : index
    %c0_36 = arith.constant 0 : index
    %c0_37 = arith.constant 0 : index
    %35 = vector.load %arg1[%c11, %c0_36, %c0_37] : memref<16x16x16xbf16, #tpu.memory_space<vmem>>, vector<1x16x16xbf16>
    %36 = vector.shape_cast %35 : vector<1x16x16xbf16> to vector<16x16xbf16>
    %c176 = arith.constant 176 : index
    %c176_38 = arith.constant 176 : index
    %37 = vector.load %arg9[%c176, %c176_38] : memref<256x256xbf16, #tpu.memory_space<vmem>>, vector<16x16xbf16>
    tpu.vector_store %arg9[%c176, %c176_38], %36 {strides = array<i32>} : memref<256x256xbf16, #tpu.memory_space<vmem>>, vector<16x16xbf16>,
    %c12 = arith.constant 12 : index
    %c0_39 = arith.constant 0 : index
    %c0_40 = arith.constant 0 : index
    %38 = vector.load %arg1[%c12, %c0_39, %c0_40] : memref<16x16x16xbf16, #tpu.memory_space<vmem>>, vector<1x16x16xbf16>
    %39 = vector.shape_cast %38 : vector<1x16x16xbf16> to vector<16x16xbf16>
    %c192 = arith.constant 192 : index
    %c192_41 = arith.constant 192 : index
    %40 = vector.load %arg9[%c192, %c192_41] : memref<256x256xbf16, #tpu.memory_space<vmem>>, vector<16x16xbf16>
    tpu.vector_store %arg9[%c192, %c192_41], %39 {strides = array<i32>} : memref<256x256xbf16, #tpu.memory_space<vmem>>, vector<16x16xbf16>,
    %c13 = arith.constant 13 : index
    %c0_42 = arith.constant 0 : index
    %c0_43 = arith.constant 0 : index
    %41 = vector.load %arg1[%c13, %c0_42, %c0_43] : memref<16x16x16xbf16, #tpu.memory_space<vmem>>, vector<1x16x16xbf16>
    %42 = vector.shape_cast %41 : vector<1x16x16xbf16> to vector<16x16xbf16>
    %c208 = arith.constant 208 : index
    %c208_44 = arith.constant 208 : index
    %43 = vector.load %arg9[%c208, %c208_44] : memref<256x256xbf16, #tpu.memory_space<vmem>>, vector<16x16xbf16>
    tpu.vector_store %arg9[%c208, %c208_44], %42 {strides = array<i32>} : memref<256x256xbf16, #tpu.memory_space<vmem>>, vector<16x16xbf16>,
    %c14 = arith.constant 14 : index
    %c0_45 = arith.constant 0 : index
    %c0_46 = arith.constant 0 : index
    %44 = vector.load %arg1[%c14, %c0_45, %c0_46] : memref<16x16x16xbf16, #tpu.memory_space<vmem>>, vector<1x16x16xbf16>
    %45 = vector.shape_cast %44 : vector<1x16x16xbf16> to vector<16x16xbf16>
    %c224 = arith.constant 224 : index
    %c224_47 = arith.constant 224 : index
    %46 = vector.load %arg9[%c224, %c224_47] : memref<256x256xbf16, #tpu.memory_space<vmem>>, vector<16x16xbf16>
    tpu.vector_store %arg9[%c224, %c224_47], %45 {strides = array<i32>} : memref<256x256xbf16, #tpu.memory_space<vmem>>, vector<16x16xbf16>,
    %c15 = arith.constant 15 : index
    %c0_48 = arith.constant 0 : index
    %c0_49 = arith.constant 0 : index
    %47 = vector.load %arg1[%c15, %c0_48, %c0_49] : memref<16x16x16xbf16, #tpu.memory_space<vmem>>, vector<1x16x16xbf16>
    %48 = vector.shape_cast %47 : vector<1x16x16xbf16> to vector<16x16xbf16>
    %c240 = arith.constant 240 : index
    %c240_50 = arith.constant 240 : index
    %49 = vector.load %arg9[%c240, %c240_50] : memref<256x256xbf16, #tpu.memory_space<vmem>>, vector<16x16xbf16>
    tpu.vector_store %arg9[%c240, %c240_50], %48 {strides = array<i32>} : memref<256x256xbf16, #tpu.memory_space<vmem>>, vector<16x16xbf16>,
    %c0_51 = arith.constant 0 : index
    %c0_52 = arith.constant 0 : index
    %c0_53 = arith.constant 0 : index
    %50 = vector.load %arg2[%c0_51, %c0_52, %c0_53] : memref<16x16x32xf32, #tpu.memory_space<vmem>>, vector<16x16x32xf32>
    %51 = vector.shape_cast %50 : vector<16x16x32xf32> to vector<256x32xf32>
    %52 = arith.truncf %51 : vector<256x32xf32> to vector<256x32xbf16>
    %cst_54 = arith.constant 0.000000e+00 : bf16
    %53 = vector.broadcast %cst_54 : bf16 to vector<16x128xbf16>
    %c0_55 = arith.constant 0 : index
    %c0_56 = arith.constant 0 : index
    %54 = vector.load %arg10[%c0_55, %c0_56] : memref<16x128xbf16, #tpu.memory_space<vmem>>, vector<16x128xbf16>
    tpu.vector_store %arg10[%c0_55, %c0_56], %53 {strides = array<i32>} : memref<16x128xbf16, #tpu.memory_space<vmem>>, vector<16x128xbf16>,
    %c0_57 = arith.constant 0 : index
    %c0_58 = arith.constant 0 : index
    %55 = vector.load %arg9[%c0_57, %c0_58] : memref<256x256xbf16, #tpu.memory_space<vmem>>, vector<256x256xbf16>
    %cst_59 = arith.constant dense<0.000000e+00> : vector<256x32xf32>
    %56 = tpu.matmul %55, %52, %cst_59 {dimension_numbers = #tpu.dot_dimension_numbers<[1], [0], [0], [1], [0, 0, 1, 1], [], []>} : vector<256x256xbf16>, vector<256x32xbf16>, vector<256x32xf32> -> vector<256x32xf32>
    %57 = arith.truncf %56 : vector<256x32xf32> to vector<256x32xbf16>
    %c0_60 = arith.constant 0 : index
    %c0_61 = arith.constant 0 : index
    %c0_62 = arith.constant 0 : index
    %58 = vector.load %arg3[%c0_60, %c0_61, %c0_62] : memref<3x32x32xbf16, #tpu.memory_space<vmem>>, vector<1x32x32xbf16>
    %59 = vector.shape_cast %58 : vector<1x32x32xbf16> to vector<32x32xbf16>
    %cst_63 = arith.constant dense<0.000000e+00> : vector<256x32xf32>
    %60 = tpu.matmul %57, %59, %cst_63 {dimension_numbers = #tpu.dot_dimension_numbers<[1], [0], [0], [1], [0, 0, 1, 1], [], []>} : vector<256x32xbf16>, vector<32x32xbf16>, vector<256x32xf32> -> vector<256x32xf32>
    %c0_64 = arith.constant 0 : index
    %c0_65 = arith.constant 0 : index
    %c0_66 = arith.constant 0 : index
    %61 = vector.load %arg4[%c0_64, %c0_65, %c0_66] : memref<3x1x32xf32, #tpu.memory_space<vmem>>, vector<1x1x32xf32>
    %62 = vector.shape_cast %61 : vector<1x1x32xf32> to vector<1x32xf32>
    %63 = vector.broadcast %62 : vector<1x32xf32> to vector<256x32xf32>
    %64 = arith.addf %60, %63 : vector<256x32xf32>
    %cst_67 = arith.constant 0.000000e+00 : f32
    %65 = vector.broadcast %cst_67 : f32 to vector<256x32xf32>
    %66 = arith.maximumf %64, %65 : vector<256x32xf32>
    %67 = arith.truncf %66 : vector<256x32xf32> to vector<256x32xbf16>
    %c0_68 = arith.constant 0 : index
    %c0_69 = arith.constant 0 : index
    %c0_70 = arith.constant 0 : index
    %68 = vector.load %arg5[%c0_68, %c0_69, %c0_70] : memref<3x32x32xbf16, #tpu.memory_space<vmem>>, vector<1x32x32xbf16>
    %69 = vector.shape_cast %68 : vector<1x32x32xbf16> to vector<32x32xbf16>
    %cst_71 = arith.constant dense<0.000000e+00> : vector<256x32xf32>
    %70 = tpu.matmul %67, %69, %cst_71 {dimension_numbers = #tpu.dot_dimension_numbers<[1], [0], [0], [1], [0, 0, 1, 1], [], []>} : vector<256x32xbf16>, vector<32x32xbf16>, vector<256x32xf32> -> vector<256x32xf32>
    %c0_72 = arith.constant 0 : index
    %c0_73 = arith.constant 0 : index
    %c0_74 = arith.constant 0 : index
    %71 = vector.load %arg6[%c0_72, %c0_73, %c0_74] : memref<3x1x32xf32, #tpu.memory_space<vmem>>, vector<1x1x32xf32>
    %72 = vector.shape_cast %71 : vector<1x1x32xf32> to vector<1x32xf32>
    %73 = vector.broadcast %72 : vector<1x32xf32> to vector<256x32xf32>
    %74 = arith.addf %70, %73 : vector<256x32xf32>
    %cst_75 = arith.constant 0.000000e+00 : f32
    %75 = vector.broadcast %cst_75 : f32 to vector<256x32xf32>
    %76 = arith.maximumf %74, %75 : vector<256x32xf32>
    %cst_76 = arith.constant 0.999994993 : f32
    %77 = vector.broadcast %cst_76 : f32 to vector<256x32xf32>
    %78 = arith.mulf %76, %77 : vector<256x32xf32>
    %79 = arith.truncf %78 : vector<256x32xf32> to vector<256x32xbf16>
    %80 = vector.shape_cast %78 : vector<256x32xf32> to vector<16x16x32xf32>
    %cst_77 = arith.constant dense<0.000000e+00> : vector<16x32xf32>
    %81 = vector.multi_reduction <add>, %80, %cst_77 [1] : vector<16x16x32xf32> to vector<16x32xf32>
    %82 = arith.truncf %81 : vector<16x32xf32> to vector<16x32xbf16>
    %c0_78 = arith.constant 0 : index
    %c0_79 = arith.constant 0 : index
    %83 = vector.load %arg10[%c0_78, %c0_79] : memref<16x128xbf16, #tpu.memory_space<vmem>>, vector<16x32xbf16>
    tpu.vector_store %arg10[%c0_78, %c0_79], %82 {strides = array<i32>} : memref<16x128xbf16, #tpu.memory_space<vmem>>, vector<16x32xbf16>,
    %c0_80 = arith.constant 0 : index
    %c0_81 = arith.constant 0 : index
    %84 = vector.load %arg9[%c0_80, %c0_81] : memref<256x256xbf16, #tpu.memory_space<vmem>>, vector<256x256xbf16>
    %cst_82 = arith.constant dense<0.000000e+00> : vector<256x32xf32>
    %85 = tpu.matmul %84, %79, %cst_82 {dimension_numbers = #tpu.dot_dimension_numbers<[1], [0], [0], [1], [0, 0, 1, 1], [], []>} : vector<256x256xbf16>, vector<256x32xbf16>, vector<256x32xf32> -> vector<256x32xf32>
    %86 = arith.truncf %85 : vector<256x32xf32> to vector<256x32xbf16>
    %c1_83 = arith.constant 1 : index
    %c0_84 = arith.constant 0 : index
    %c0_85 = arith.constant 0 : index
    %87 = vector.load %arg3[%c1_83, %c0_84, %c0_85] : memref<3x32x32xbf16, #tpu.memory_space<vmem>>, vector<1x32x32xbf16>
    %88 = vector.shape_cast %87 : vector<1x32x32xbf16> to vector<32x32xbf16>
    %cst_86 = arith.constant dense<0.000000e+00> : vector<256x32xf32>
    %89 = tpu.matmul %86, %88, %cst_86 {dimension_numbers = #tpu.dot_dimension_numbers<[1], [0], [0], [1], [0, 0, 1, 1], [], []>} : vector<256x32xbf16>, vector<32x32xbf16>, vector<256x32xf32> -> vector<256x32xf32>
    %c1_87 = arith.constant 1 : index
    %c0_88 = arith.constant 0 : index
    %c0_89 = arith.constant 0 : index
    %90 = vector.load %arg4[%c1_87, %c0_88, %c0_89] : memref<3x1x32xf32, #tpu.memory_space<vmem>>, vector<1x1x32xf32>
    %91 = vector.shape_cast %90 : vector<1x1x32xf32> to vector<1x32xf32>
    %92 = vector.broadcast %91 : vector<1x32xf32> to vector<256x32xf32>
    %93 = arith.addf %89, %92 : vector<256x32xf32>
    %cst_90 = arith.constant 0.000000e+00 : f32
    %94 = vector.broadcast %cst_90 : f32 to vector<256x32xf32>
    %95 = arith.maximumf %93, %94 : vector<256x32xf32>
    %96 = arith.truncf %95 : vector<256x32xf32> to vector<256x32xbf16>
    %c1_91 = arith.constant 1 : index
    %c0_92 = arith.constant 0 : index
    %c0_93 = arith.constant 0 : index
    %97 = vector.load %arg5[%c1_91, %c0_92, %c0_93] : memref<3x32x32xbf16, #tpu.memory_space<vmem>>, vector<1x32x32xbf16>
    %98 = vector.shape_cast %97 : vector<1x32x32xbf16> to vector<32x32xbf16>
    %cst_94 = arith.constant dense<0.000000e+00> : vector<256x32xf32>
    %99 = tpu.matmul %96, %98, %cst_94 {dimension_numbers = #tpu.dot_dimension_numbers<[1], [0], [0], [1], [0, 0, 1, 1], [], []>} : vector<256x32xbf16>, vector<32x32xbf16>, vector<256x32xf32> -> vector<256x32xf32>
    %c1_95 = arith.constant 1 : index
    %c0_96 = arith.constant 0 : index
    %c0_97 = arith.constant 0 : index
    %100 = vector.load %arg6[%c1_95, %c0_96, %c0_97] : memref<3x1x32xf32, #tpu.memory_space<vmem>>, vector<1x1x32xf32>
    %101 = vector.shape_cast %100 : vector<1x1x32xf32> to vector<1x32xf32>
    %102 = vector.broadcast %101 : vector<1x32xf32> to vector<256x32xf32>
    %103 = arith.addf %99, %102 : vector<256x32xf32>
    %cst_98 = arith.constant 0.000000e+00 : f32
    %104 = vector.broadcast %cst_98 : f32 to vector<256x32xf32>
    %105 = arith.maximumf %103, %104 : vector<256x32xf32>
    %cst_99 = arith.constant 0.999994993 : f32
    %106 = vector.broadcast %cst_99 : f32 to vector<256x32xf32>
    %107 = arith.mulf %105, %106 : vector<256x32xf32>
    %108 = arith.truncf %107 : vector<256x32xf32> to vector<256x32xbf16>
    %109 = vector.shape_cast %107 : vector<256x32xf32> to vector<16x16x32xf32>
    %cst_100 = arith.constant dense<0.000000e+00> : vector<16x32xf32>
    %110 = vector.multi_reduction <add>, %109, %cst_100 [1] : vector<16x16x32xf32> to vector<16x32xf32>
    %111 = arith.truncf %110 : vector<16x32xf32> to vector<16x32xbf16>
    %c0_101 = arith.constant 0 : index
    %c32_102 = arith.constant 32 : index
    %112 = vector.load %arg10[%c0_101, %c32_102] : memref<16x128xbf16, #tpu.memory_space<vmem>>, vector<16x32xbf16>
    tpu.vector_store %arg10[%c0_101, %c32_102], %111 {strides = array<i32>} : memref<16x128xbf16, #tpu.memory_space<vmem>>, vector<16x32xbf16>,
    %c0_103 = arith.constant 0 : index
    %c0_104 = arith.constant 0 : index
    %113 = vector.load %arg9[%c0_103, %c0_104] : memref<256x256xbf16, #tpu.memory_space<vmem>>, vector<256x256xbf16>
    %cst_105 = arith.constant dense<0.000000e+00> : vector<256x32xf32>
    %114 = tpu.matmul %113, %108, %cst_105 {dimension_numbers = #tpu.dot_dimension_numbers<[1], [0], [0], [1], [0, 0, 1, 1], [], []>} : vector<256x256xbf16>, vector<256x32xbf16>, vector<256x32xf32> -> vector<256x32xf32>
    %115 = arith.truncf %114 : vector<256x32xf32> to vector<256x32xbf16>
    %c2_106 = arith.constant 2 : index
    %c0_107 = arith.constant 0 : index
    %c0_108 = arith.constant 0 : index
    %116 = vector.load %arg3[%c2_106, %c0_107, %c0_108] : memref<3x32x32xbf16, #tpu.memory_space<vmem>>, vector<1x32x32xbf16>
    %117 = vector.shape_cast %116 : vector<1x32x32xbf16> to vector<32x32xbf16>
    %cst_109 = arith.constant dense<0.000000e+00> : vector<256x32xf32>
    %118 = tpu.matmul %115, %117, %cst_109 {dimension_numbers = #tpu.dot_dimension_numbers<[1], [0], [0], [1], [0, 0, 1, 1], [], []>} : vector<256x32xbf16>, vector<32x32xbf16>, vector<256x32xf32> -> vector<256x32xf32>
    %c2_110 = arith.constant 2 : index
    %c0_111 = arith.constant 0 : index
    %c0_112 = arith.constant 0 : index
    %119 = vector.load %arg4[%c2_110, %c0_111, %c0_112] : memref<3x1x32xf32, #tpu.memory_space<vmem>>, vector<1x1x32xf32>
    %120 = vector.shape_cast %119 : vector<1x1x32xf32> to vector<1x32xf32>
    %121 = vector.broadcast %120 : vector<1x32xf32> to vector<256x32xf32>
    %122 = arith.addf %118, %121 : vector<256x32xf32>
    %cst_113 = arith.constant 0.000000e+00 : f32
    %123 = vector.broadcast %cst_113 : f32 to vector<256x32xf32>
    %124 = arith.maximumf %122, %123 : vector<256x32xf32>
    %125 = arith.truncf %124 : vector<256x32xf32> to vector<256x32xbf16>
    %c2_114 = arith.constant 2 : index
    %c0_115 = arith.constant 0 : index
    %c0_116 = arith.constant 0 : index
    %126 = vector.load %arg5[%c2_114, %c0_115, %c0_116] : memref<3x32x32xbf16, #tpu.memory_space<vmem>>, vector<1x32x32xbf16>
    %127 = vector.shape_cast %126 : vector<1x32x32xbf16> to vector<32x32xbf16>
    %cst_117 = arith.constant dense<0.000000e+00> : vector<256x32xf32>
    %128 = tpu.matmul %125, %127, %cst_117 {dimension_numbers = #tpu.dot_dimension_numbers<[1], [0], [0], [1], [0, 0, 1, 1], [], []>} : vector<256x32xbf16>, vector<32x32xbf16>, vector<256x32xf32> -> vector<256x32xf32>
    %c2_118 = arith.constant 2 : index
    %c0_119 = arith.constant 0 : index
    %c0_120 = arith.constant 0 : index
    %129 = vector.load %arg6[%c2_118, %c0_119, %c0_120] : memref<3x1x32xf32, #tpu.memory_space<vmem>>, vector<1x1x32xf32>
    %130 = vector.shape_cast %129 : vector<1x1x32xf32> to vector<1x32xf32>
    %131 = vector.broadcast %130 : vector<1x32xf32> to vector<256x32xf32>
    %132 = arith.addf %128, %131 : vector<256x32xf32>
    %cst_121 = arith.constant 0.000000e+00 : f32
    %133 = vector.broadcast %cst_121 : f32 to vector<256x32xf32>
    %134 = arith.maximumf %132, %133 : vector<256x32xf32>
    %cst_122 = arith.constant 0.999994993 : f32
    %135 = vector.broadcast %cst_122 : f32 to vector<256x32xf32>
    %136 = arith.mulf %134, %135 : vector<256x32xf32>
    %137 = vector.shape_cast %136 : vector<256x32xf32> to vector<16x16x32xf32>
    %cst_123 = arith.constant dense<0.000000e+00> : vector<16x32xf32>
    %138 = vector.multi_reduction <add>, %137, %cst_123 [1] : vector<16x16x32xf32> to vector<16x32xf32>
    %139 = arith.truncf %138 : vector<16x32xf32> to vector<16x32xbf16>
    %c0_124 = arith.constant 0 : index
    %c64_125 = arith.constant 64 : index
    %140 = vector.load %arg10[%c0_124, %c64_125] : memref<16x128xbf16, #tpu.memory_space<vmem>>, vector<16x32xbf16>
    tpu.vector_store %arg10[%c0_124, %c64_125], %139 {strides = array<i32>} : memref<16x128xbf16, #tpu.memory_space<vmem>>, vector<16x32xbf16>,
    %c0_126 = arith.constant 0 : index
    %c0_127 = arith.constant 0 : index
    %141 = vector.load %arg10[%c0_126, %c0_127] : memref<16x128xbf16, #tpu.memory_space<vmem>>, vector<16x128xbf16>
    %c0_128 = arith.constant 0 : index
    %c0_129 = arith.constant 0 : index
    %142 = vector.load %arg7[%c0_128, %c0_129] : memref<128x768xbf16, #tpu.memory_space<vmem>>, vector<128x768xbf16>
    %cst_130 = arith.constant dense<0.000000e+00> : vector<16x768xf32>
    %143 = tpu.matmul %141, %142, %cst_130 {dimension_numbers = #tpu.dot_dimension_numbers<[1], [0], [0], [1], [0, 0, 1, 1], [], []>} : vector<16x128xbf16>, vector<128x768xbf16>, vector<16x768xf32> -> vector<16x768xf32>
    %c0_131 = arith.constant 0 : index
    %c0_132 = arith.constant 0 : index
    %144 = vector.load %arg8[%c0_131, %c0_132] : memref<16x768xf32, #tpu.memory_space<vmem>>, vector<16x768xf32>
    tpu.vector_store %arg8[%c0_131, %c0_132], %143 {strides = array<i32>} : memref<16x768xf32, #tpu.memory_space<vmem>>, vector<16x768xf32>,
    return
  }
  func.func @transform_0(%arg0: i32) -> (i32, i32, i32) {
    %c0_i32 = arith.constant 0 : i32
    %c0_i32_0 = arith.constant 0 : i32
    %c0_i32_1 = arith.constant 0 : i32
    return %arg0, %c0_i32, %c0_i32_0 : i32, i32, i32
  }
  func.func @transform_1(%arg0: i32) -> (i32, i32, i32) {
    %c0_i32 = arith.constant 0 : i32
    %c0_i32_0 = arith.constant 0 : i32
    %c0_i32_1 = arith.constant 0 : i32
    return %arg0, %c0_i32, %c0_i32_0 : i32, i32, i32
  }
  func.func @transform_2(%arg0: i32) -> (i32, i32, i32) {
    %c0_i32 = arith.constant 0 : i32
    %c0_i32_0 = arith.constant 0 : i32
    %c0_i32_1 = arith.constant 0 : i32
    %c0_i32_2 = arith.constant 0 : i32
    return %c0_i32, %c0_i32_0, %c0_i32_1 : i32, i32, i32
  }
  func.func @transform_3(%arg0: i32) -> (i32, i32, i32) {
    %c0_i32 = arith.constant 0 : i32
    %c0_i32_0 = arith.constant 0 : i32
    %c0_i32_1 = arith.constant 0 : i32
    %c0_i32_2 = arith.constant 0 : i32
    return %c0_i32, %c0_i32_0, %c0_i32_1 : i32, i32, i32
  }
  func.func @transform_4(%arg0: i32) -> (i32, i32, i32) {
    %c0_i32 = arith.constant 0 : i32
    %c0_i32_0 = arith.constant 0 : i32
    %c0_i32_1 = arith.constant 0 : i32
    %c0_i32_2 = arith.constant 0 : i32
    return %c0_i32, %c0_i32_0, %c0_i32_1 : i32, i32, i32
  }
  func.func @transform_5(%arg0: i32) -> (i32, i32, i32) {
    %c0_i32 = arith.constant 0 : i32
    %c0_i32_0 = arith.constant 0 : i32
    %c0_i32_1 = arith.constant 0 : i32
    %c0_i32_2 = arith.constant 0 : i32
    return %c0_i32, %c0_i32_0, %c0_i32_1 : i32, i32, i32
  }
  func.func @transform_6(%arg0: i32) -> (i32, i32) {
    %c0_i32 = arith.constant 0 : i32
    %c0_i32_0 = arith.constant 0 : i32
    %c0_i32_1 = arith.constant 0 : i32
    return %c0_i32, %c0_i32_0 : i32, i32
  }
  func.func @transform_7(%arg0: i32) -> (i32, i32) {
    %c0_i32 = arith.constant 0 : i32
    %c0_i32_0 = arith.constant 0 : i32
    return %arg0, %c0_i32 : i32, i32
  }
}

</mosaic_0001>

<bundles_post_ra>
// kernel: infograph_embed_map.1
= control target key start
LH: loop header
LB: loop body
LE: loop exit
PB: predicated region body
PF: predicated region fallthrough
CT: control target
= control target key end

     0   :  { %12 = vsyncpa [#allocation5], 0  ;;  %s6409_s0 = inlined_call_operand.vmem [shape: bf16[64,16,16], index: 0, kind: input, shape index: {}]   ;;  %s6410_s1 = inlined_call_operand.vmem [shape: f32[64,16,32], index: 1, kind: input, shape index: {}]   ;;  %s6411_s2 = inlined_call_operand.vmem [shape: bf16[3,32,32], index: 2, kind: input, shape index: {}]   ;;  %s6412_s3 = inlined_call_operand.vmem [shape: f32[3,1,32], index: 3, kind: input, shape index: {}]   ;;  %s6413_s4 = inlined_call_operand.vmem [shape: bf16[3,32,32], index: 4, kind: input, shape index: {}]   ;;  %s6414_s5 = inlined_call_operand.vmem [shape: f32[3,1,32], index: 5, kind: input, shape index: {}]   ;;  %s6415_s6 = inlined_call_operand.vmem [shape: bf16[128,768], index: 6, kind: input, shape index: {}]   ;;  %s6416_s7 = inlined_call_operand.hbm [shape: f32[64,768], index: 7, kind: output, shape index: {}]  }
   0x1   :  { %14 = vsyncpa [#allocation5 + $0x1], 0  ;;  %s5312_s24 = smov 0   ;;  %s5314_s25 = smov 0  }
   0x2   :  { %s5316_s26 = smov 0   ;;  %s5318_s27 = smov 0  }
   0x3 LB: > { %s5333_s28 = sadd.s32 4294967295, %s5260_s27   ;;  %s4140_s29 = sadd.s32 4294967294, %s5260_s27   ;;  %s5260_s27 = sphi %s5318_s27, %s6423_s27   ;;  %s5256_s26 = sphi %s5316_s26, %s6422_s26   ;;  %s5252_s25 = sphi %s5314_s25, %s6421_s25   ;;  %s5248_s24 = sphi %s5312_s24, %s6420_s24  }
   0x4   : > { %s5337_s30 = sadd.s32 1, %s5260_s27   ;;  %s184_s8 = sadd.s32 1, %s5256_s26 }
   0x5   : > { %s181_s9 = ssub.s32 %s5260_s27, %s5337_s30  ;;  %p194_p0 = scmp.ne.s32.totalorder %s5256_s26, %s5252_s25 }
   0x6   : > { %p182_p1 = scmp.eq.s32.totalorder %s181_s9, 0  ;;  %p195_p2 = scmp.eq.s32.totalorder %s5333_s28, 3 }
   0x7   : > { %p200_p3 = scmp.ne.s32.totalorder %s5252_s25, %s5248_s24  ;;  %p201_p4 = scmp.eq.s32.totalorder %s4140_s29, 3 }
   0x8   : > { %s5348_s10 = scalar_select %p182_p1, %s5256_s26, %s184_s8  }
   0x9   : > { %p5350_p5 = por %p195_p2, %p194_p0  ;;  %p5354_p6 = por %p201_p4, %p200_p3 }
   0xa   : > { %p4143_p7 = scmp.ge.s32.totalorder %s5260_s27, 1  ;;  %p254_p8 = scmp.lt.s32.totalorder %s5260_s27, 5 }
   0xc   : > { %p255_p9 = pnand %p4143_p7, %p254_p8 }
   0xd   : > { %s4144_s13 = sshll.u32 (!%p255_p9), %s5333_s28, 4  ;;  %v5262_v0 = vmov (!%p255_p9), 0   ;;  %s5263_s19 = smov (!%p255_p9), 16   ;;  %vm349_vm0 = vcmask (!%p255_p9), 130048   ;;  %vm362_vm1 = vcmask (!%p255_p9), 261248   ;;  %vm388_vm2 = vcmask (!%p255_p9), 523648  }
   0xe   : > { %258 = sbr.rel (%p255_p9) target bundleno = 2914 (0xb62), region = 48  ;;  %p5361_p10 = scmp.lt.s32.totalorder (!%p255_p9), %s4144_s13, 63  ;;  %310 = vst [vmem:[#allocation2 + $0x8] sm:$0xff] (!%p255_p9), %v5262_v0  ;;  %649 = vmatprep.mubr.bf16.mxu0 (!%p255_p9), %v5262_v0  ;;  %309 = vst [vmem:[#allocation2] sm:$0xff] (!%p255_p9), %v5262_v0  ;;  %vm375_vm3 = vcmask (!%p255_p9), 392448   ;;  %vm401_vm4 = vcmask (!%p255_p9), 654848  }
   0xf   : > { %311 = vst [vmem:[#allocation2 + $0x10] sm:$0xff] (!%p255_p9), %v5262_v0  ;;  %313 = vst [vmem:[#allocation2 + $0x20] sm:$0xff] (!%p255_p9), %v5262_v0  ;;  %s5264_s20 = smov (!%p255_p9), 48   ;;  %s5265_s22 = smov (!%p255_p9), 32   ;;  %vm414_vm5 = vcmask (!%p255_p9), 786048   ;;  %vm427_vm6 = vcmask (!%p255_p9), 917248  }
  0x10   : > { %315 = vst [vmem:[#allocation2 + $0x30] sm:$0xff] (!%p255_p9), %v5262_v0  ;;  %317 = vst [vmem:[#allocation2 + $0x40] sm:$0xff] (!%p255_p9), %v5262_v0  ;;  %s5266_s9 = smov (!%p255_p9), 64   ;;  %s5268_s14 = smov (!%p255_p9), 96   ;;  %vm440_vm7 = vcmask (!%p255_p9), 1048448   ;;  %vm817_vm8 = vcmask (!%p255_p9), 261120  }
  0x11   : > { %319 = vst [vmem:[#allocation2 + $0x50] sm:$0xff] (!%p255_p9), %v5262_v0  ;;  %321 = vst [vmem:[#allocation2 + $0x60] sm:$0xff] (!%p255_p9), %v5262_v0  ;;  %vm1579_vm9 = vcmask (!%p255_p9), 1041409   ;;  %vm1581_vm10 = vcmask (!%p255_p9), 1042434   ;;  %vm1583_vm11 = vcmask (!%p255_p9), 1043459   ;;  %vm1585_vm12 = vcmask (!%p255_p9), 1044484  }
  0x12   : > { %323 = vst [vmem:[#allocation2 + $0x70] sm:$0xff] (!%p255_p9), %v5262_v0  ;;  %326 = vst [vmem:[#allocation2 + $0x88] sm:$0xff] (!%p255_p9), %v5262_v0  ;;  %vm1587_vm13 = vcmask (!%p255_p9), 1045509   ;;  %vm1589_vm14 = vcmask (!%p255_p9), 1046534   ;;  %vm1591_vm15 = vcmask (!%p255_p9), 1047559   ;;  %s290_s16 = sand.u32 (!%p255_p9), 1, %s5252_s25  }
  0x13   : > { %328 = vst [vmem:[#allocation2 + $0x98] sm:$0xff] (!%p255_p9), %v5262_v0  ;;  %330 = vst [vmem:[#allocation2 + $0xa8] sm:$0xff] (!%p255_p9), %v5262_v0  ;;  %s5045_s17 = smul.u32 (!%p255_p9), 96, %s290_s16 }
  0x14   : > { %332 = vst [vmem:[#allocation2 + $0xb8] sm:$0xff] (!%p255_p9), %v5262_v0  ;;  %334 = vst [vmem:[#allocation2 + $0xc8] sm:$0xff] (!%p255_p9), %v5262_v0 }
  0x15   : > { %336 = vst [vmem:[#allocation2 + $0xd8] sm:$0xff] %v5262_v0  ;;  %338 = vst [vmem:[#allocation2 + $0xe8] sm:$0xff] %v5262_v0  ;;  %s6425_s13 = smov (!%p5361_p10, %s4144_s13), 63 }
  0x16   : > { %340 = vst [vmem:[#allocation2 + $0xf8] sm:$0xff] %v5262_v0  ;;  %584 = vst [vmem:[#allocation3] sm:$0xff] %v5262_v0  ;;  %s4383_s15 = sshll.u32 %s6425_s13, 3  ;;  %s4384_s21 = sshll.u32 %s6425_s13, 4 }
  0x17   : > { %s5389_s18 = scalar_lea.vmem %s6409_s0, %s4383_s15  ;;  %s5402_s8 = scalar_lea.vmem %s6410_s1, %s4384_s21 }
  0x18   : > { %v5095_v1 = vld [vmem:[%s5389_s18 + $0x8] sm:$0xff]   ;;  %v5096_v2 = vld [vmem:[%s5389_s18 + $0x10] sm:$0xff]   ;;  %v5097_v3 = vld [vmem:[%s5389_s18 + $0x18] sm:$0xff]   ;;  %s5267_s13 = smov 80   ;;  %s5269_s15 = smov 112  }
  0x19   : > { %359 = vrot.lane.b32.xlu0 %v5095_v1, %s5263_s19  ;;  %385 = vrot.lane.b32.xlu1 %v5097_v3, %s5264_s20  ;;  %v5098_v4 = vld [vmem:[%s5389_s18 + $0x20] sm:$0xff]   ;;  %v5099_v5 = vld [vmem:[%s5389_s18 + $0x28] sm:$0xff]  }
  0x1a   : > { %v5100_v6 = vld [vmem:[%s5389_s18 + $0x30] sm:$0xff]   ;;  %v5101_v7 = vld [vmem:[%s5389_s18 + $0x38] sm:$0xff]   ;;  %v5102_v8 = vld [vmem:[%s5389_s18 + $0x48] sm:$0xff]  }
  0x1b   : > { %v552_v9 = vld [vmem:[%s5402_s8 + $0x80] sm:$0xff]  ;;  %v553_v10 = vld [vmem:[%s5402_s8 + $0x88] sm:$0xff]  ;;  %v554_v14 = vld [vmem:[%s5402_s8 + $0x90] sm:$0xff] }
  0x1c   : > { %v536_v11 = vld [vmem:[%s5402_s8] sm:$0xff]  ;;  %v576_v12 = vpack.c.bf16 %v553_v10, %v552_v9  ;;  %v537_v13 = vld [vmem:[%s5402_s8 + $0x8] sm:$0xff]  ;;  %v555_v15 = vld [vmem:[%s5402_s8 + $0x98] sm:$0xff] }
  0x1d   : > { %372 = vrot.lane.b32.xlu0 %v5096_v2, %s5265_s22  ;;  %398 = vrot.lane.b32.xlu1 %v5098_v4, %s5266_s9  ;;  %v568_v16 = vpack.c.bf16 %v537_v13, %v536_v11  ;;  %v577_v17 = vpack.c.bf16 %v555_v15, %v554_v14  ;;  %v538_v18 = vld [vmem:[%s5402_s8 + $0x10] sm:$0xff]  ;;  %v539_v19 = vld [vmem:[%s5402_s8 + $0x18] sm:$0xff] }
  0x1e   : > { %4385 = vmatprep.subr.bf16.mxu0 %v576_v12  ;;  %v556_v20 = vld [vmem:[%s5402_s8 + $0xa0] sm:$0xff]  ;;  %v5103_v21 = vld [vmem:[%s5389_s18 + $0x50] sm:$0xff]   ;;  %v5104_v22 = vld [vmem:[%s5389_s18 + $0x58] sm:$0xff]   ;;  %v569_v23 = vpack.c.bf16 %v539_v19, %v538_v18 }
  0x1f   : > { %4386 = vmatpush3.bf16.msra.mxu0 %v568_v16  ;;  %v557_v24 = vld [vmem:[%s5402_s8 + $0xa8] sm:$0xff]  ;;  %v540_v26 = vld [vmem:[%s5402_s8 + $0x20] sm:$0xff]  ;;  %v558_v28 = vld [vmem:[%s5402_s8 + $0xb0] sm:$0xff] }
  0x20   : > { %4387 = vmatprep.subr.bf16.mxu0 %v577_v17  ;;  %v578_v25 = vpack.c.bf16 %v557_v24, %v556_v20  ;;  %v541_v27 = vld [vmem:[%s5402_s8 + $0x28] sm:$0xff]  ;;  %v559_v29 = vld [vmem:[%s5402_s8 + $0xb8] sm:$0xff]  ;;  %v5105_v30 = vld [vmem:[%s5389_s18 + $0x60] sm:$0xff]  }
  0x21   : > { %411 = vrot.lane.b32.xlu0 %v5099_v5, %s5267_s13  ;;  %424 = vrot.lane.b32.xlu1 %v5100_v6, %s5268_s14  ;;  %v570_v31 = vpack.c.bf16 %v541_v27, %v540_v26  ;;  %v542_v32 = vld [vmem:[%s5402_s8 + $0x30] sm:$0xff]  ;;  %v579_v33 = vpack.c.bf16 %v559_v29, %v558_v28  ;;  %v543_v34 = vld [vmem:[%s5402_s8 + $0x38] sm:$0xff] }
  0x22   : > { %v5106_v35 = vld [vmem:[%s5389_s18 + $0x68] sm:$0xff]   ;;  %v560_v36 = vld [vmem:[%s5402_s8 + $0xc0] sm:$0xff]  ;;  %v571_v38 = vpack.c.bf16 %v543_v34, %v542_v32  ;;  %v5107_v41 = vld [vmem:[%s5389_s18 + $0x70] sm:$0xff]  }
  0x23   : > { %4388 = vmatpush3.bf16.msra.mxu0 %v569_v23  ;;  %v561_v37 = vld [vmem:[%s5402_s8 + $0xc8] sm:$0xff]  ;;  %v544_v39 = vld [vmem:[%s5402_s8 + $0x40] sm:$0xff]  ;;  %v562_v43 = vld [vmem:[%s5402_s8 + $0xd0] sm:$0xff] }
  0x24   : > { %4389 = vmatprep.subr.bf16.mxu0 %v578_v25  ;;  %v545_v40 = vld [vmem:[%s5402_s8 + $0x48] sm:$0xff]  ;;  %v580_v42 = vpack.c.bf16 %v561_v37, %v560_v36  ;;  %v563_v44 = vld [vmem:[%s5402_s8 + $0xd8] sm:$0xff]  ;;  %v546_v46 = vld [vmem:[%s5402_s8 + $0x50] sm:$0xff] }
  0x25   : > { %437 = vrot.lane.b32.xlu0 %v5101_v7, %s5269_s15  ;;  %460 = vrot.lane.b32.xlu1 %v5102_v8, %s5263_s19  ;;  %v5108_v45 = vld [vmem:[%s5389_s18 + $0x78] sm:$0xff]   ;;  %v5109_v48 = vld [vmem:[%s5389_s18] sm:$0xff]   ;;  %v572_v49 = vpack.c.bf16 %v545_v40, %v544_v39  ;;  %v581_v52 = vpack.c.bf16 %v563_v44, %v562_v43 }
  0x26   : > { %v547_v47 = vld [vmem:[%s5402_s8 + $0x58] sm:$0xff]  ;;  %v564_v50 = vld [vmem:[%s5402_s8 + $0xe0] sm:$0xff]  ;;  %v565_v51 = vld [vmem:[%s5402_s8 + $0xe8] sm:$0xff]  ;;  %350 = vst.msk [vmem:[#allocation2] sm:$0xff] %vm349_vm0, %v5109_v48 }
  0x27   : > { %4390 = vmatpush3.bf16.msra.mxu0 %v570_v31  ;;  %v548_v53 = vld [vmem:[%s5402_s8 + $0x60] sm:$0xff]  ;;  %v549_v54 = vld [vmem:[%s5402_s8 + $0x68] sm:$0xff]  ;;  %v573_v55 = vpack.c.bf16 %v547_v47, %v546_v46  ;;  %v566_v56 = vld [vmem:[%s5402_s8 + $0xf0] sm:$0xff]  ;;  %v582_v58 = vpack.c.bf16 %v565_v51, %v564_v50 }
  0x28   : > { %4391 = vmatprep.subr.bf16.mxu0 %v579_v33  ;;  %v567_v57 = vld [vmem:[%s5402_s8 + $0xf8] sm:$0xff]  ;;  %v550_v59 = vld [vmem:[%s5402_s8 + $0x70] sm:$0xff]  ;;  %v574_v60 = vpack.c.bf16 %v549_v54, %v548_v53  ;;  %v5110_v2 = vld [vmem:[%s5389_s18 + $0x40] sm:$0xff]  }
  0x29   : > { %472 = vrot.lane.b32.xlu0 %v5103_v21, %s5265_s22  ;;  %484 = vrot.lane.b32.xlu1 %v5104_v22, %s5264_s20  ;;  %v551_v61 = vld [vmem:[%s5402_s8 + $0x78] sm:$0xff]  ;;  %v583_v62 = vpack.c.bf16 %v567_v57, %v566_v56  ;;  %451 = vst.msk [vmem:[#allocation2 + $0x88] sm:$0xff] %vm349_vm0, %v5110_v2  ;;  %v5111_v29 = vld [vmem:[%s6411_s2] sm:$0xff]   ;;  %vm2618_vm0 = vcmask 523520   ;;  %s5270_s8 = smov [#allocation4]  }
  0x2a   : > { %v575_v63 = vpack.c.bf16 %v551_v61, %v550_v59  ;;  %4829 = vmatprep.subr.bf16.mxu1 %v5111_v29 }
  0x2b   : > { %4392 = vmatpush3.bf16.msra.mxu0 %v571_v38  ;;  %4830 = vmatpush3.bf16.msra.mxu1 %v5111_v29 }
  0x2c   : > { %4393 = vmatprep.subr.bf16.mxu0 %v580_v42 }
  0x2d   : > { %496 = vrot.lane.b32.xlu0 %v5105_v30, %s5266_s9  ;;  %508 = vrot.lane.b32.xlu1 %v5106_v35, %s5267_s13  ;;  %v585_v1 = vld [vmem:[#allocation2] sm:$0xff]  ;;  %v5112_v30 = vld [vmem:[%s6411_s2 + $0x8] sm:$0xff]   ;;  %s5202_s13 = sshll.u32 %s5270_s8, 4  ;;  %s5203_s13 = int_to_ptr.vmem [resolvable:$false] %s5202_s13 }
  0x2e   : > { %4831 = vmatprep.subr.bf16.mxu1 %v5112_v30 }
  0x2f   : > { %4394 = vmatpush3.bf16.msra.mxu0 %v572_v49  ;;  %4832 = vmatpush3.bf16.msra.mxu1 %v5112_v30 }
  0x30   : > { %4395 = vmatprep.subr.bf16.mxu0 %v581_v52  ;;  %v602_v24 = vld [vmem:[#allocation2 + $0x88] sm:$0xff] }
  0x31   : > { %520 = vrot.lane.b32.xlu0 %v5107_v41, %s5268_s14  ;;  %532 = vrot.lane.b32.xlu1 %v5108_v45, %s5269_s15  ;;  %s5204_s14 = scalar_lea.vmem %s5203_s13, 3072 }
  0x33   : > { %4396 = vmatpush3.bf16.msra.mxu0 %v573_v55 }
  0x34   : > { %4397 = vmatprep.subr.bf16.mxu0 %v582_v58 }
  0x37   : > { %4398 = vmatpush3.bf16.msra.mxu0 %v574_v60 }
  0x38   : > { %4399 = vmatprep.subr.bf16.mxu0 %v583_v62 }
  0x3b   : > { %4400 = vmatpush3.bf16.msra.mxu0 %v575_v63 }
  0x3e   : > { %650 = vmatmul.mubr.bf16.vlgmr.msra.gmra.mrb[0].mxu0 %v585_v1 }
  0x3f   : > { %657 = vmatprep.mubr.bf16.mxu0 %v5262_v0 }
  0x8b   : > { %v360_v3 = vpop.permute.xlu0 %359  ;;  %v386_v4 = vpop.permute.xlu1 %385 }
  0x8c   : > { %363 = vst.msk [vmem:[#allocation2 + $0x10] sm:$0xff] %vm362_vm1, %v360_v3 }
  0x8d   : > { %389 = vst.msk [vmem:[#allocation2 + $0x30] sm:$0xff] %vm388_vm2, %v386_v4 }
  0x8f   : > { %v373_v5 = vpop.permute.xlu0 %372  ;;  %v399_v6 = vpop.permute.xlu1 %398 }
  0x90   : > { %376 = vst.msk [vmem:[#allocation2 + $0x20] sm:$0xff] %vm375_vm3, %v373_v5 }
  0x91   : > { %402 = vst.msk [vmem:[#allocation2 + $0x40] sm:$0xff] %vm401_vm4, %v399_v6 }
  0x93   : > { %v587_v7 = vld [vmem:[#allocation2 + $0x10] sm:$0xff]  ;;  %v412_v8 = vpop.permute.xlu0 %411  ;;  %v425_v9 = vpop.permute.xlu1 %424 }
  0x94   : > { %658 = vmatmul.mubr.bf16.gmra.mrb[4].mxu0 %v587_v7  ;;  %415 = vst.msk [vmem:[#allocation2 + $0x50] sm:$0xff] %vm414_vm5, %v412_v8  ;;  %v591_v16 = vld [vmem:[#allocation2 + $0x30] sm:$0xff] }
  0x95   : > { %665 = vmatprep.mubr.bf16.mxu0 %v5262_v0  ;;  %428 = vst.msk [vmem:[#allocation2 + $0x60] sm:$0xff] %vm427_vm6, %v425_v9 }
  0x97   : > { %v438_v10 = vpop.permute.xlu0 %437  ;;  %v589_v11 = vld [vmem:[#allocation2 + $0x20] sm:$0xff]  ;;  %v461_v12 = vpop.permute.xlu1 %460 }
  0x98   : > { %441 = vst.msk [vmem:[#allocation2 + $0x70] sm:$0xff] %vm440_vm7, %v438_v10  ;;  %v593_v20 = vld [vmem:[#allocation2 + $0x40] sm:$0xff] }
  0x99   : > { %463 = vst.msk [vmem:[#allocation2 + $0x98] sm:$0xff] %vm362_vm1, %v461_v12  ;;  %vm3619_vm1 = vcmask 785920  }
  0x9b   : > { %v473_v13 = vpop.permute.xlu0 %472  ;;  %v485_v14 = vpop.permute.xlu1 %484  ;;  %v595_v21 = vld [vmem:[#allocation2 + $0x50] sm:$0xff] }
  0x9c   : > { %666 = vmatmul.mubr.bf16.gmra.mrb[8].mxu0 %v589_v11  ;;  %475 = vst.msk [vmem:[#allocation2 + $0xa8] sm:$0xff] %vm375_vm3, %v473_v13  ;;  %v597_v22 = vld [vmem:[#allocation2 + $0x60] sm:$0xff] }
  0x9d   : > { %673 = vmatprep.mubr.bf16.mxu0 %v5262_v0  ;;  %487 = vst.msk [vmem:[#allocation2 + $0xb8] sm:$0xff] %vm388_vm2, %v485_v14 }
  0x9f   : > { %v497_v15 = vpop.permute.xlu0 %496  ;;  %v509_v17 = vpop.permute.xlu1 %508  ;;  %v599_v23 = vld [vmem:[#allocation2 + $0x70] sm:$0xff] }
  0xa0   : > { %499 = vst.msk [vmem:[#allocation2 + $0xc8] sm:$0xff] %vm401_vm4, %v497_v15  ;;  %v604_v25 = vld [vmem:[#allocation2 + $0x98] sm:$0xff] }
  0xa1   : > { %511 = vst.msk [vmem:[#allocation2 + $0xd8] sm:$0xff] %vm414_vm5, %v509_v17 }
  0xa3   : > { %v521_v18 = vpop.permute.xlu0 %520  ;;  %v533_v19 = vpop.permute.xlu1 %532  ;;  %v606_v26 = vld [vmem:[#allocation2 + $0xa8] sm:$0xff] }
  0xa4   : > { %674 = vmatmul.mubr.bf16.gmra.mrb[12].mxu0 %v591_v16  ;;  %523 = vst.msk [vmem:[#allocation2 + $0xe8] sm:$0xff] %vm427_vm6, %v521_v18  ;;  %v608_v27 = vld [vmem:[#allocation2 + $0xb8] sm:$0xff] }
  0xa5   : > { %681 = vmatprep.mubr.bf16.mxu0 %v5262_v0  ;;  %535 = vst.msk [vmem:[#allocation2 + $0xf8] sm:$0xff] %vm440_vm7, %v533_v19 }
  0xa7   : > { %v610_v28 = vld [vmem:[#allocation2 + $0xc8] sm:$0xff] }
  0xa8   : > { %v612_v31 = vld [vmem:[#allocation2 + $0xd8] sm:$0xff] }
  0xab   : > { %v614_v32 = vld [vmem:[#allocation2 + $0xe8] sm:$0xff] }
  0xac   : > { %682 = vmatmul.mubr.bf16.gmra.mrb[16].mxu0 %v593_v20  ;;  %v616_v33 = vld [vmem:[#allocation2 + $0xf8] sm:$0xff] }
  0xad   : > { %689 = vmatprep.mubr.bf16.mxu0 %v5262_v0 }
  0xb4   : > { %690 = vmatmul.mubr.bf16.gmra.mrb[20].mxu0 %v595_v21 }
  0xb5   : > { %697 = vmatprep.mubr.bf16.mxu0 %v5262_v0 }
  0xbc   : > { %698 = vmatmul.mubr.bf16.gmra.mrb[24].mxu0 %v597_v22 }
  0xbd   : > { %705 = vmatprep.mubr.bf16.mxu0 %v5262_v0 }
  0xc4   : > { %706 = vmatmul.mubr.bf16.gmra.mrb[28].mxu0 %v599_v23 }
  0xc5   : > { %713 = vmatprep.mubr.bf16.mxu0 %v602_v24 }
  0xcc   : > { %714 = vmatmul.mubr.bf16.gmra.mrb[32].mxu0 %v5262_v0 }
  0xcd   : > { %721 = vmatprep.mubr.bf16.mxu0 %v604_v25 }
  0xd4   : > { %722 = vmatmul.mubr.bf16.gmra.mrb[36].mxu0 %v5262_v0 }
  0xd5   : > { %729 = vmatprep.mubr.bf16.mxu0 %v606_v26 }
  0xdc   : > { %730 = vmatmul.mubr.bf16.gmra.mrb[40].mxu0 %v5262_v0 }
  0xdd   : > { %737 = vmatprep.mubr.bf16.mxu0 %v608_v27 }
  0xe4   : > { %738 = vmatmul.mubr.bf16.gmra.mrb[44].mxu0 %v5262_v0 }
  0xe5   : > { %745 = vmatprep.mubr.bf16.mxu0 %v610_v28 }
  0xec   : > { %746 = vmatmul.mubr.bf16.gmra.mrb[48].mxu0 %v5262_v0 }
  0xed   : > { %753 = vmatprep.mubr.bf16.mxu0 %v612_v31 }
  0xf4   : > { %754 = vmatmul.mubr.bf16.gmra.mrb[52].mxu0 %v5262_v0 }
  0xf5   : > { %761 = vmatprep.mubr.bf16.mxu0 %v614_v32 }
  0xfc   : > { %762 = vmatmul.mubr.bf16.gmra.mrb[56].mxu0 %v5262_v0 }
  0xfd   : > { %769 = vmatprep.mubr.bf16.mxu0 %v616_v33 }
 0x104   : > { %770 = vmatmul.mubr.bf16.gmra.mrb[60].mxu0 %v5262_v0 }
 0x111   : > { %v4401_v34 = vpop.f32.mrb[0].mxu0 }
 0x112   : > { %v4402_v35 = vpop.f32.mrb[1].mxu0 }
 0x113   : > { %v4403_v36 = vadd.f32 %v4402_v35, %v4401_v34  ;;  %v4404_v37 = vpop.f32.mrb[2].mxu0 }
 0x114   : > { %v4405_v38 = vpop.f32.mrb[3].mxu0 }
 0x115   : > { %v4406_v39 = vadd.f32 %v4405_v38, %v4404_v37 }
 0x117   : > { %v778_v40 = vpack.c.bf16 %v4406_v39, %v4403_v36 }
 0x119   : > { %4833 = vmatprep.mubr.msk.bf16.mxu1 %vm817_vm8, %v778_v40 }
 0x167   : > { %v4407_v41 = vpop.f32.mrb[4].mxu0 }
 0x168   : > { %v4408_v42 = vpop.f32.mrb[5].mxu0 }
 0x169   : > { %v4409_v43 = vadd.f32 %v4408_v42, %v4407_v41  ;;  %v4410_v44 = vpop.f32.mrb[6].mxu0 }
 0x16a   : > { %v4411_v45 = vpop.f32.mrb[7].mxu0 }
 0x16b   : > { %v4412_v46 = vadd.f32 %v4411_v45, %v4410_v44 }
 0x16d   : > { %v779_v47 = vpack.c.bf16 %v4412_v46, %v4409_v43 }
 0x16f   : > { %v4413_v48 = vpop.f32.mrb[8].mxu0  ;;  %4834 = vmatmul.mubr.msk.bf16.vlgmr.msra.gmra.mrb[0].mxu1 %vm817_vm8, %v779_v47 }
 0x170   : > { %v4414_v0 = vpop.f32.mrb[9].mxu0 }
 0x171   : > { %v4415_v49 = vadd.f32 %v4414_v0, %v4413_v48  ;;  %v4416_v50 = vpop.f32.mrb[10].mxu0 }
 0x172   : > { %v4417_v51 = vpop.f32.mrb[11].mxu0 }
 0x173   : > { %v4418_v52 = vadd.f32 %v4417_v51, %v4416_v50 }
 0x175   : > { %v780_v53 = vpack.c.bf16 %v4418_v52, %v4415_v49 }
 0x177   : > { %v4419_v54 = vpop.f32.mrb[12].mxu0  ;;  %4837 = vmatprep.mubr.msk.bf16.mxu1 %vm817_vm8, %v780_v53 }
 0x178   : > { %v4420_v55 = vpop.f32.mrb[13].mxu0 }
 0x179   : > { %v4421_v56 = vadd.f32 %v4420_v55, %v4419_v54  ;;  %v4422_v57 = vpop.f32.mrb[14].mxu0 }
 0x17a   : > { %v4423_v58 = vpop.f32.mrb[15].mxu0 }
 0x17b   : > { %v4424_v59 = vadd.f32 %v4423_v58, %v4422_v57 }
 0x17d   : > { %v781_v60 = vpack.c.bf16 %v4424_v59, %v4421_v56  ;;  %v5113_v59 = vld [vmem:[%s6413_s4] sm:$0xff]  }
 0x17e   : > { %4865 = vmatprep.subr.bf16.mxu1 %v5113_v59 }
 0x17f   : > { %v4425_v61 = vpop.f32.mrb[16].mxu0  ;;  %4838 = vmatmul.mubr.msk.bf16.gmra.mrb[4].mxu1 %vm817_vm8, %v781_v60 }
 0x180   : > { %v4426_v62 = vpop.f32.mrb[17].mxu0  ;;  %4866 = vmatpush3.bf16.msra.mxu1 %v5113_v59 }
 0x181   : > { %v4427_v63 = vadd.f32 %v4426_v62, %v4425_v61  ;;  %v4428_v1 = vpop.f32.mrb[18].mxu0  ;;  %v5114_v62 = vld [vmem:[%s6413_s4 + $0x8] sm:$0xff]  }
 0x182   : > { %v4429_v2 = vpop.f32.mrb[19].mxu0  ;;  %4867 = vmatprep.subr.bf16.mxu1 %v5114_v62 }
 0x183   : > { %v4430_v3 = vadd.f32 %v4429_v2, %v4428_v1 }
 0x184   : > { %4868 = vmatpush3.bf16.msra.mxu1 %v5114_v62 }
 0x185   : > { %v782_v4 = vpack.c.bf16 %v4430_v3, %v4427_v63 }
 0x187   : > { %v4431_v5 = vpop.f32.mrb[20].mxu0  ;;  %4841 = vmatprep.mubr.msk.bf16.mxu1 %vm817_vm8, %v782_v4 }
 0x188   : > { %v4432_v6 = vpop.f32.mrb[21].mxu0 }
 0x189   : > { %v4433_v7 = vadd.f32 %v4432_v6, %v4431_v5  ;;  %v4434_v8 = vpop.f32.mrb[22].mxu0 }
 0x18a   : > { %v4435_v9 = vpop.f32.mrb[23].mxu0 }
 0x18b   : > { %v4436_v10 = vadd.f32 %v4435_v9, %v4434_v8 }
 0x18d   : > { %v783_v11 = vpack.c.bf16 %v4436_v10, %v4433_v7 }
 0x18f   : > { %v4437_v12 = vpop.f32.mrb[24].mxu0  ;;  %4842 = vmatmul.mubr.msk.bf16.gmra.mrb[8].mxu1 %vm817_vm8, %v783_v11 }
 0x190   : > { %v4438_v13 = vpop.f32.mrb[25].mxu0 }
 0x191   : > { %v4439_v14 = vadd.f32 %v4438_v13, %v4437_v12  ;;  %v4440_v15 = vpop.f32.mrb[26].mxu0 }
 0x192   : > { %v4441_v16 = vpop.f32.mrb[27].mxu0 }
 0x193   : > { %v4442_v17 = vadd.f32 %v4441_v16, %v4440_v15 }
 0x195   : > { %v784_v18 = vpack.c.bf16 %v4442_v17, %v4439_v14 }
 0x197   : > { %v4443_v19 = vpop.f32.mrb[28].mxu0  ;;  %4845 = vmatprep.mubr.msk.bf16.mxu1 %vm817_vm8, %v784_v18 }
 0x198   : > { %v4444_v20 = vpop.f32.mrb[29].mxu0 }
 0x199   : > { %v4445_v21 = vadd.f32 %v4444_v20, %v4443_v19  ;;  %v4446_v22 = vpop.f32.mrb[30].mxu0  ;;  %v5520_v20 = vld [vmem:[%s6412_s3] ss:$0 sm:$0xff] }
 0x19a   : > { %v4447_v23 = vpop.f32.mrb[31].mxu0 }
 0x19b   : > { %v4448_v24 = vadd.f32 %v4447_v23, %v4446_v22 }
 0x19d   : > { %v785_v25 = vpack.c.bf16 %v4448_v24, %v4445_v21 }
 0x19f   : > { %v4449_v26 = vpop.f32.mrb[32].mxu0  ;;  %4846 = vmatmul.mubr.msk.bf16.gmra.mrb[12].mxu1 %vm817_vm8, %v785_v25 }
 0x1a0   : > { %v4450_v27 = vpop.f32.mrb[33].mxu0 }
 0x1a1   : > { %v4451_v28 = vadd.f32 %v4450_v27, %v4449_v26  ;;  %v4452_v29 = vpop.f32.mrb[34].mxu0 }
 0x1a2   : > { %v4453_v30 = vpop.f32.mrb[35].mxu0 }
 0x1a3   : > { %v4454_v31 = vadd.f32 %v4453_v30, %v4452_v29 }
 0x1a5   : > { %v786_v32 = vpack.c.bf16 %v4454_v31, %v4451_v28 }
 0x1a7   : > { %v4455_v33 = vpop.f32.mrb[36].mxu0  ;;  %4849 = vmatprep.mubr.msk.bf16.mxu1 %vm817_vm8, %v786_v32 }
 0x1a8   : > { %v4456_v34 = vpop.f32.mrb[37].mxu0 }
 0x1a9   : > { %v4457_v35 = vadd.f32 %v4456_v34, %v4455_v33  ;;  %v4458_v36 = vpop.f32.mrb[38].mxu0 }
 0x1aa   : > { %v4459_v37 = vpop.f32.mrb[39].mxu0 }
 0x1ab   : > { %v4460_v38 = vadd.f32 %v4459_v37, %v4458_v36 }
 0x1ad   : > { %v787_v39 = vpack.c.bf16 %v4460_v38, %v4457_v35 }
 0x1af   : > { %v4461_v40 = vpop.f32.mrb[40].mxu0  ;;  %4850 = vmatmul.mubr.msk.bf16.gmra.mrb[16].mxu1 %vm817_vm8, %v787_v39 }
 0x1b0   : > { %v4462_v41 = vpop.f32.mrb[41].mxu0 }
 0x1b1   : > { %v4463_v42 = vadd.f32 %v4462_v41, %v4461_v40  ;;  %v4464_v43 = vpop.f32.mrb[42].mxu0 }
 0x1b2   : > { %v4465_v44 = vpop.f32.mrb[43].mxu0 }
 0x1b3   : > { %v4466_v45 = vadd.f32 %v4465_v44, %v4464_v43 }
 0x1b5   : > { %v788_v46 = vpack.c.bf16 %v4466_v45, %v4463_v42 }
 0x1b7   : > { %v4467_v47 = vpop.f32.mrb[44].mxu0  ;;  %4853 = vmatprep.mubr.msk.bf16.mxu1 %vm817_vm8, %v788_v46 }
 0x1b8   : > { %v4468_v48 = vpop.f32.mrb[45].mxu0 }
 0x1b9   : > { %v4469_v0 = vadd.f32 %v4468_v48, %v4467_v47  ;;  %v4470_v49 = vpop.f32.mrb[46].mxu0 }
 0x1ba   : > { %v4471_v50 = vpop.f32.mrb[47].mxu0 }
 0x1bb   : > { %v4472_v51 = vadd.f32 %v4471_v50, %v4470_v49 }
 0x1bd   : > { %v789_v52 = vpack.c.bf16 %v4472_v51, %v4469_v0 }
 0x1bf   : > { %v4473_v53 = vpop.f32.mrb[48].mxu0  ;;  %4854 = vmatmul.mubr.msk.bf16.gmra.mrb[20].mxu1 %vm817_vm8, %v789_v52 }
 0x1c0   : > { %v4474_v54 = vpop.f32.mrb[49].mxu0 }
 0x1c1   : > { %v4475_v55 = vadd.f32 %v4474_v54, %v4473_v53  ;;  %v4476_v56 = vpop.f32.mrb[50].mxu0 }
 0x1c2   : > { %v4477_v57 = vpop.f32.mrb[51].mxu0 }
 0x1c3   : > { %v4478_v58 = vadd.f32 %v4477_v57, %v4476_v56 }
 0x1c5   : > { %v790_v60 = vpack.c.bf16 %v4478_v58, %v4475_v55 }
 0x1c7   : > { %v4479_v61 = vpop.f32.mrb[52].mxu0  ;;  %4857 = vmatprep.mubr.msk.bf16.mxu1 %vm817_vm8, %v790_v60 }
 0x1c8   : > { %v4480_v63 = vpop.f32.mrb[53].mxu0 }
 0x1c9   : > { %v4481_v1 = vadd.f32 %v4480_v63, %v4479_v61  ;;  %v4482_v2 = vpop.f32.mrb[54].mxu0 }
 0x1ca   : > { %v4483_v3 = vpop.f32.mrb[55].mxu0 }
 0x1cb   : > { %v4484_v4 = vadd.f32 %v4483_v3, %v4482_v2 }
 0x1cd   : > { %v791_v5 = vpack.c.bf16 %v4484_v4, %v4481_v1 }
 0x1cf   : > { %v4485_v6 = vpop.f32.mrb[56].mxu0  ;;  %4858 = vmatmul.mubr.msk.bf16.gmra.mrb[24].mxu1 %vm817_vm8, %v791_v5 }
 0x1d0   : > { %v4486_v7 = vpop.f32.mrb[57].mxu0 }
 0x1d1   : > { %v4487_v8 = vadd.f32 %v4486_v7, %v4485_v6  ;;  %v4488_v9 = vpop.f32.mrb[58].mxu0 }
 0x1d2   : > { %v4489_v10 = vpop.f32.mrb[59].mxu0 }
 0x1d3   : > { %v4490_v11 = vadd.f32 %v4489_v10, %v4488_v9 }
 0x1d5   : > { %v792_v12 = vpack.c.bf16 %v4490_v11, %v4487_v8 }
 0x1d7   : > { %v4491_v13 = vpop.f32.mrb[60].mxu0  ;;  %4861 = vmatprep.mubr.msk.bf16.mxu1 %vm817_vm8, %v792_v12 }
 0x1d8   : > { %v4492_v14 = vpop.f32.mrb[61].mxu0 }
 0x1d9   : > { %v4493_v15 = vadd.f32 %v4492_v14, %v4491_v13  ;;  %v4494_v16 = vpop.f32.mrb[62].mxu0 }
 0x1da   : > { %v4495_v17 = vpop.f32.mrb[63].mxu0 }
 0x1db   : > { %v4496_v18 = vadd.f32 %v4495_v17, %v4494_v16 }
 0x1dd   : > { %v793_v19 = vpack.c.bf16 %v4496_v18, %v4493_v15 }
 0x1df   : > { %4862 = vmatmul.mubr.msk.bf16.gmra.mrb[28].mxu1 %vm817_vm8, %v793_v19 }
 0x242   : > { %v4835_v21 = vpop.f32.mrb[0].mxu1 }
 0x243   : > { %v909_v22 = vadd.f32 %v4835_v21, %v5520_v20  ;;  %v900_v23 = vpop.f32.mrb[1].mxu1 }
 0x244   : > { %v901_v24 = vadd.f32 %v5520_v20, %v900_v23  ;;  %v4836_v25 = vpop.f32.mrb[2].mxu1 }
 0x245   : > { %v912_v26 = vadd.f32 %v4836_v25, %v5520_v20  ;;  %v903_v27 = vpop.f32.mrb[3].mxu1  ;;  %v1029_v29 = vmax.f32 %v909_v22, 0.0 }
 0x246   : > { %v904_v28 = vadd.f32 %v5520_v20, %v903_v27  ;;  %v1027_v31 = vmax.f32 %v901_v24, 0.0 }
 0x247   : > { %v1030_v30 = vmax.f32 %v912_v26, 0.0 }
 0x248   : > { %v1028_v32 = vmax.f32 %v904_v28, 0.0 }
 0x249   : > { %v1060_v33 = vpack.c.bf16 %v1030_v30, %v1029_v29 }
 0x24a   : > { %v1059_v34 = vpack.c.bf16 %v1028_v32, %v1027_v31 }
 0x24c   : > { %4869 = vmatprep.mubr.msk.bf16.mxu1 %vm817_vm8, %v1059_v34 }
 0x24d   : > { %4870 = vmatmul.mubr.msk.bf16.vlgmr.msra.gmra.mrb[32].mxu1 %vm817_vm8, %v1060_v33 }
 0x252   : > { %v4839_v35 = vpop.f32.mrb[4].mxu1 }
 0x253   : > { %v925_v36 = vadd.f32 %v4839_v35, %v5520_v20  ;;  %v916_v37 = vpop.f32.mrb[5].mxu1 }
 0x254   : > { %v917_v38 = vadd.f32 %v5520_v20, %v916_v37  ;;  %v4840_v39 = vpop.f32.mrb[6].mxu1 }
 0x255   : > { %v928_v40 = vadd.f32 %v4840_v39, %v5520_v20  ;;  %v919_v41 = vpop.f32.mrb[7].mxu1  ;;  %v1033_v43 = vmax.f32 %v925_v36, 0.0 }
 0x256   : > { %v920_v42 = vadd.f32 %v5520_v20, %v919_v41  ;;  %v1031_v45 = vmax.f32 %v917_v38, 0.0 }
 0x257   : > { %v1034_v44 = vmax.f32 %v928_v40, 0.0 }
 0x258   : > { %v1032_v46 = vmax.f32 %v920_v42, 0.0 }
 0x259   : > { %v1062_v47 = vpack.c.bf16 %v1034_v44, %v1033_v43 }
 0x25a   : > { %v1061_v48 = vpack.c.bf16 %v1032_v46, %v1031_v45 }
 0x25c   : > { %4873 = vmatprep.mubr.msk.bf16.mxu1 %vm817_vm8, %v1061_v48 }
 0x25d   : > { %4874 = vmatmul.mubr.msk.bf16.gmra.mrb[36].mxu1 %vm817_vm8, %v1062_v47 }
 0x262   : > { %v4843_v0 = vpop.f32.mrb[8].mxu1 }
 0x263   : > { %v941_v49 = vadd.f32 %v4843_v0, %v5520_v20  ;;  %v932_v50 = vpop.f32.mrb[9].mxu1 }
 0x264   : > { %v933_v51 = vadd.f32 %v5520_v20, %v932_v50  ;;  %v4844_v52 = vpop.f32.mrb[10].mxu1 }
 0x265   : > { %v944_v53 = vadd.f32 %v4844_v52, %v5520_v20  ;;  %v935_v54 = vpop.f32.mrb[11].mxu1  ;;  %v1037_v56 = vmax.f32 %v941_v49, 0.0 }
 0x266   : > { %v936_v55 = vadd.f32 %v5520_v20, %v935_v54  ;;  %v1035_v58 = vmax.f32 %v933_v51, 0.0 }
 0x267   : > { %v1038_v57 = vmax.f32 %v944_v53, 0.0 }
 0x268   : > { %v1036_v59 = vmax.f32 %v936_v55, 0.0 }
 0x269   : > { %v1064_v60 = vpack.c.bf16 %v1038_v57, %v1037_v56 }
 0x26a   : > { %v1063_v61 = vpack.c.bf16 %v1036_v59, %v1035_v58 }
 0x26c   : > { %4877 = vmatprep.mubr.msk.bf16.mxu1 %vm817_vm8, %v1063_v61 }
 0x26d   : > { %4878 = vmatmul.mubr.msk.bf16.gmra.mrb[40].mxu1 %vm817_vm8, %v1064_v60 }
 0x272   : > { %v4847_v62 = vpop.f32.mrb[12].mxu1 }
 0x273   : > { %v957_v63 = vadd.f32 %v4847_v62, %v5520_v20  ;;  %v948_v1 = vpop.f32.mrb[13].mxu1 }
 0x274   : > { %v949_v2 = vadd.f32 %v5520_v20, %v948_v1  ;;  %v4848_v3 = vpop.f32.mrb[14].mxu1 }
 0x275   : > { %v960_v4 = vadd.f32 %v4848_v3, %v5520_v20  ;;  %v951_v5 = vpop.f32.mrb[15].mxu1  ;;  %v1041_v7 = vmax.f32 %v957_v63, 0.0 }
 0x276   : > { %v952_v6 = vadd.f32 %v5520_v20, %v951_v5  ;;  %v1039_v9 = vmax.f32 %v949_v2, 0.0 }
 0x277   : > { %v1042_v8 = vmax.f32 %v960_v4, 0.0 }
 0x278   : > { %v1040_v10 = vmax.f32 %v952_v6, 0.0  ;;  %v5570_v6 = vld [vmem:[#allocation2 + $0x8] sm:$0xff] }
 0x279   : > { %v1066_v11 = vpack.c.bf16 %v1042_v8, %v1041_v7  ;;  %v5576_v7 = vld [vmem:[%s6414_s5] ss:$0 sm:$0xff] }
 0x27a   : > { %v1065_v12 = vpack.c.bf16 %v1040_v10, %v1039_v9 }
 0x27c   : > { %4881 = vmatprep.mubr.msk.bf16.mxu1 %vm817_vm8, %v1065_v12 }
 0x27d   : > { %4882 = vmatmul.mubr.msk.bf16.gmra.mrb[44].mxu1 %vm817_vm8, %v1066_v11 }
 0x282   : > { %v4851_v13 = vpop.f32.mrb[16].mxu1 }
 0x283   : > { %v973_v14 = vadd.f32 %v4851_v13, %v5520_v20  ;;  %v964_v15 = vpop.f32.mrb[17].mxu1 }
 0x284   : > { %v965_v16 = vadd.f32 %v5520_v20, %v964_v15  ;;  %v4852_v17 = vpop.f32.mrb[18].mxu1 }
 0x285   : > { %v976_v18 = vadd.f32 %v4852_v17, %v5520_v20  ;;  %v967_v19 = vpop.f32.mrb[19].mxu1  ;;  %v1045_v22 = vmax.f32 %v973_v14, 0.0 }
 0x286   : > { %v968_v21 = vadd.f32 %v5520_v20, %v967_v19  ;;  %v1043_v24 = vmax.f32 %v965_v16, 0.0 }
 0x287   : > { %v1046_v23 = vmax.f32 %v976_v18, 0.0 }
 0x288   : > { %v1044_v25 = vmax.f32 %v968_v21, 0.0 }
 0x289   : > { %v1068_v26 = vpack.c.bf16 %v1046_v23, %v1045_v22 }
 0x28a   : > { %v1067_v27 = vpack.c.bf16 %v1044_v25, %v1043_v24 }
 0x28c   : > { %4885 = vmatprep.mubr.msk.bf16.mxu1 %vm817_vm8, %v1067_v27 }
 0x28d   : > { %4886 = vmatmul.mubr.msk.bf16.gmra.mrb[48].mxu1 %vm817_vm8, %v1068_v26 }
 0x292   : > { %v4855_v28 = vpop.f32.mrb[20].mxu1 }
 0x293   : > { %v989_v29 = vadd.f32 %v4855_v28, %v5520_v20  ;;  %v980_v30 = vpop.f32.mrb[21].mxu1 }
 0x294   : > { %v981_v31 = vadd.f32 %v5520_v20, %v980_v30  ;;  %v4856_v32 = vpop.f32.mrb[22].mxu1 }
 0x295   : > { %v992_v33 = vadd.f32 %v4856_v32, %v5520_v20  ;;  %v983_v34 = vpop.f32.mrb[23].mxu1  ;;  %v1049_v36 = vmax.f32 %v989_v29, 0.0 }
 0x296   : > { %v984_v35 = vadd.f32 %v5520_v20, %v983_v34  ;;  %v1047_v38 = vmax.f32 %v981_v31, 0.0 }
 0x297   : > { %v1050_v37 = vmax.f32 %v992_v33, 0.0 }
 0x298   : > { %v1048_v39 = vmax.f32 %v984_v35, 0.0 }
 0x299   : > { %v1070_v40 = vpack.c.bf16 %v1050_v37, %v1049_v36 }
 0x29a   : > { %v1069_v41 = vpack.c.bf16 %v1048_v39, %v1047_v38 }
 0x29c   : > { %4889 = vmatprep.mubr.msk.bf16.mxu1 %vm817_vm8, %v1069_v41 }
 0x29d   : > { %4890 = vmatmul.mubr.msk.bf16.gmra.mrb[52].mxu1 %vm817_vm8, %v1070_v40 }
 0x2a2   : > { %v4859_v42 = vpop.f32.mrb[24].mxu1 }
 0x2a3   : > { %v1005_v43 = vadd.f32 %v4859_v42, %v5520_v20  ;;  %v996_v44 = vpop.f32.mrb[25].mxu1 }
 0x2a4   : > { %v997_v45 = vadd.f32 %v5520_v20, %v996_v44  ;;  %v4860_v46 = vpop.f32.mrb[26].mxu1 }
 0x2a5   : > { %v1008_v47 = vadd.f32 %v4860_v46, %v5520_v20  ;;  %v999_v48 = vpop.f32.mrb[27].mxu1  ;;  %v1053_v49 = vmax.f32 %v1005_v43, 0.0 }
 0x2a6   : > { %v1000_v0 = vadd.f32 %v5520_v20, %v999_v48  ;;  %v1051_v51 = vmax.f32 %v997_v45, 0.0 }
 0x2a7   : > { %v1054_v50 = vmax.f32 %v1008_v47, 0.0 }
 0x2a8   : > { %v1052_v52 = vmax.f32 %v1000_v0, 0.0 }
 0x2a9   : > { %v1072_v53 = vpack.c.bf16 %v1054_v50, %v1053_v49 }
 0x2aa   : > { %v1071_v54 = vpack.c.bf16 %v1052_v52, %v1051_v51 }
 0x2ac   : > { %4893 = vmatprep.mubr.msk.bf16.mxu1 %vm817_vm8, %v1071_v54 }
 0x2ad   : > { %4894 = vmatmul.mubr.msk.bf16.gmra.mrb[56].mxu1 %vm817_vm8, %v1072_v53 }
 0x2b2   : > { %v4863_v55 = vpop.f32.mrb[28].mxu1 }
 0x2b3   : > { %v1021_v56 = vadd.f32 %v4863_v55, %v5520_v20  ;;  %v1012_v57 = vpop.f32.mrb[29].mxu1 }
 0x2b4   : > { %v1013_v58 = vadd.f32 %v5520_v20, %v1012_v57  ;;  %v4864_v59 = vpop.f32.mrb[30].mxu1 }
 0x2b5   : > { %v1024_v60 = vadd.f32 %v4864_v59, %v5520_v20  ;;  %v1015_v61 = vpop.f32.mrb[31].mxu1  ;;  %v1057_v63 = vmax.f32 %v1021_v56, 0.0 }
 0x2b6   : > { %v1016_v62 = vadd.f32 %v5520_v20, %v1015_v61  ;;  %v1055_v2 = vmax.f32 %v1013_v58, 0.0 }
 0x2b7   : > { %v1058_v1 = vmax.f32 %v1024_v60, 0.0 }
 0x2b8   : > { %v1056_v3 = vmax.f32 %v1016_v62, 0.0 }
 0x2b9   : > { %v1074_v4 = vpack.c.bf16 %v1058_v1, %v1057_v63 }
 0x2ba   : > { %v1073_v5 = vpack.c.bf16 %v1056_v3, %v1055_v2 }
 0x2bc   : > { %4897 = vmatprep.mubr.msk.bf16.mxu1 %vm817_vm8, %v1073_v5 }
 0x2bd   : > { %4898 = vmatmul.mubr.msk.bf16.gmra.mrb[60].mxu1 %vm817_vm8, %v1074_v4 }
 0x2be   : > { %1667 = vmatprep.mubr.bf16.mxu1 %v5570_v6 }
 0x320   : > { %v4871_v20 = vpop.f32.mrb[32].mxu1 }
 0x321   : > { %v1189_v8 = vadd.f32 %v4871_v20, %v5576_v7  ;;  %v1180_v9 = vpop.f32.mrb[33].mxu1 }
 0x322   : > { %v1181_v10 = vadd.f32 %v5576_v7, %v1180_v9  ;;  %v4872_v11 = vpop.f32.mrb[34].mxu1 }
 0x323   : > { %v1309_v12 = vmax.f32 %v1189_v8, 0.0  ;;  %v1192_v13 = vadd.f32 %v4872_v11, %v5576_v7  ;;  %v1183_v14 = vpop.f32.mrb[35].mxu1 }
 0x324   : > { %v1307_v15 = vmax.f32 %v1181_v10, 0.0  ;;  %v1184_v16 = vadd.f32 %v5576_v7, %v1183_v14 }
 0x325   : > { %v5582_v17 = vmul.f32 0.999995, %v1309_v12  ;;  %v1310_v18 = vmax.f32 %v1192_v13, 0.0 }
 0x326   : > { %v5584_v19 = vmul.f32 0.999995, %v1307_v15  ;;  %v1308_v21 = vmax.f32 %v1184_v16, 0.0 }
 0x327   : > { %v5586_v22 = vmul.f32 0.999995, %v1310_v18  ;;  %v1396_v24 = vsel %vm817_vm8, %v5582_v17, 0.0 }
 0x328   : > { %v5588_v23 = vmul.f32 0.999995, %v1308_v21  ;;  %v1387_v27 = vsel %vm817_vm8, %v5584_v19, 0.0 }
 0x329   : > { %v1372_v25 = vpack.c.bf16 %v5586_v22, %v5582_v17  ;;  %v1397_v26 = vsel %vm817_vm8, %v5586_v22, 0.0 }
 0x32a   : > { %v1398_v28 = vadd.f32 %v1397_v26, %v1396_v24  ;;  %v1371_v29 = vpack.c.bf16 %v5588_v23, %v5584_v19  ;;  %v1388_v30 = vsel %vm817_vm8, %v5588_v23, 0.0 }
 0x32b   : > { %v1389_v31 = vadd.f32 %v1388_v30, %v1387_v27 }
 0x32c   : > { %v1399_v32 = vrot.slane %v1398_v28, 4 }
 0x32d   : > { %v1390_v33 = vrot.slane %v1389_v31, 4 }
 0x32e   : > { %v1400_v34 = vadd.f32 %v1399_v32, %v1398_v28 }
 0x32f   : > { %v1391_v35 = vadd.f32 %v1390_v33, %v1389_v31 }
 0x330   : > { %v1401_v36 = vrot.slane %v1400_v34, 2  ;;  %v4875_v37 = vpop.f32.mrb[36].mxu1 }
 0x331   : > { %v1392_v38 = vrot.slane %v1391_v35, 2  ;;  %v1205_v39 = vadd.f32 %v4875_v37, %v5576_v7  ;;  %v1196_v40 = vpop.f32.mrb[37].mxu1 }
 0x332   : > { %v1402_v41 = vadd.f32 %v1401_v36, %v1400_v34  ;;  %v1197_v42 = vadd.f32 %v5576_v7, %v1196_v40  ;;  %v4876_v43 = vpop.f32.mrb[38].mxu1 }
 0x333   : > { %v1393_v44 = vadd.f32 %v1392_v38, %v1391_v35  ;;  %v1313_v45 = vmax.f32 %v1205_v39, 0.0  ;;  %v1208_v46 = vadd.f32 %v4876_v43, %v5576_v7  ;;  %v1199_v47 = vpop.f32.mrb[39].mxu1 }
 0x334   : > { %v1403_v48 = vrot.slane %v1402_v41, 1  ;;  %v1311_v0 = vmax.f32 %v1197_v42, 0.0  ;;  %v1200_v49 = vadd.f32 %v5576_v7, %v1199_v47 }
 0x335   : > { %v1394_v50 = vrot.slane %v1393_v44, 1  ;;  %v5606_v51 = vmul.f32 0.999995, %v1313_v45  ;;  %v1314_v52 = vmax.f32 %v1208_v46, 0.0 }
 0x336   : > { %v1404_v53 = vadd.f32 %v1403_v48, %v1402_v41  ;;  %v5608_v54 = vmul.f32 0.999995, %v1311_v0  ;;  %v1312_v55 = vmax.f32 %v1200_v49, 0.0 }
 0x337   : > { %v1395_v56 = vadd.f32 %v1394_v50, %v1393_v44  ;;  %v5610_v57 = vmul.f32 0.999995, %v1314_v52  ;;  %v1414_v59 = vsel %vm817_vm8, %v5606_v51, 0.0 }
 0x338   : > { %v1532_v58 = vpack.c.bf16 %v1404_v53, %v1404_v53  ;;  %v5614_v60 = vmul.f32 0.999995, %v1312_v55  ;;  %v1405_v62 = vsel %vm817_vm8, %v5608_v54, 0.0 }
 0x339   : > { %v1531_v61 = vpack.c.bf16 %v1395_v56, %v1395_v56  ;;  %v1374_v63 = vpack.c.bf16 %v5610_v57, %v5606_v51  ;;  %v1415_v1 = vsel %vm817_vm8, %v5610_v57, 0.0 }
 0x33a   : > { %v1564_v2 = vunpack.c.l.b16 %v1532_v58  ;;  %v1416_v3 = vadd.f32 %v1415_v1, %v1414_v59  ;;  %v1373_v4 = vpack.c.bf16 %v5614_v60, %v5608_v54  ;;  %v1406_v5 = vsel %vm817_vm8, %v5614_v60, 0.0 }
 0x33b   : > { %v1563_v20 = vunpack.c.l.b16 %v1531_v61  ;;  %v1407_v8 = vadd.f32 %v1406_v5, %v1405_v62 }
 0x33c   : > { %v1417_v9 = vrot.slane %v1416_v3, 4 }
 0x33d   : > { %v1580_v10 = vsel %vm1579_vm9, %v1564_v2, %v1563_v20  ;;  %v1408_v11 = vrot.slane %v1407_v8, 4 }
 0x33e   : > { %v1418_v12 = vadd.f32 %v1417_v9, %v1416_v3 }
 0x33f   : > { %v1409_v13 = vadd.f32 %v1408_v11, %v1407_v8 }
 0x340   : > { %v1419_v14 = vrot.slane %v1418_v12, 2  ;;  %v4879_v15 = vpop.f32.mrb[40].mxu1 }
 0x341   : > { %v1410_v16 = vrot.slane %v1409_v13, 2  ;;  %v1221_v18 = vadd.f32 %v4879_v15, %v5576_v7  ;;  %v1212_v21 = vpop.f32.mrb[41].mxu1 }
 0x342   : > { %v1420_v24 = vadd.f32 %v1419_v14, %v1418_v12  ;;  %v1213_v26 = vadd.f32 %v5576_v7, %v1212_v21  ;;  %v4880_v27 = vpop.f32.mrb[42].mxu1 }
 0x343   : > { %v1411_v28 = vadd.f32 %v1410_v16, %v1409_v13  ;;  %v1317_v30 = vmax.f32 %v1221_v18, 0.0  ;;  %v1224_v31 = vadd.f32 %v4880_v27, %v5576_v7  ;;  %v1215_v32 = vpop.f32.mrb[43].mxu1 }
 0x344   : > { %v1421_v33 = vrot.slane %v1420_v24, 1  ;;  %v1315_v34 = vmax.f32 %v1213_v26, 0.0  ;;  %v1216_v35 = vadd.f32 %v5576_v7, %v1215_v32 }
 0x345   : > { %v1412_v36 = vrot.slane %v1411_v28, 1  ;;  %v5631_v37 = vmul.f32 0.999995, %v1317_v30  ;;  %v1318_v38 = vmax.f32 %v1224_v31, 0.0 }
 0x346   : > { %v1422_v39 = vadd.f32 %v1421_v33, %v1420_v24  ;;  %v5633_v40 = vmul.f32 0.999995, %v1315_v34  ;;  %v1316_v41 = vmax.f32 %v1216_v35, 0.0 }
 0x347   : > { %v1413_v42 = vadd.f32 %v1412_v36, %v1411_v28  ;;  %v5635_v43 = vmul.f32 0.999995, %v1318_v38  ;;  %v1432_v47 = vsel %vm817_vm8, %v5631_v37, 0.0 }
 0x348   : > { %v1534_v44 = vpack.c.bf16 %v1422_v39, %v1422_v39  ;;  %v5637_v45 = vmul.f32 0.999995, %v1316_v41  ;;  %v1423_v49 = vsel %vm817_vm8, %v5633_v40, 0.0 }
 0x349   : > { %v1533_v46 = vpack.c.bf16 %v1413_v42, %v1413_v42  ;;  %v1376_v48 = vpack.c.bf16 %v5635_v43, %v5631_v37  ;;  %v1433_v0 = vsel %vm817_vm8, %v5635_v43, 0.0 }
 0x34a   : > { %v1434_v50 = vadd.f32 %v1433_v0, %v1432_v47  ;;  %v1375_v52 = vpack.c.bf16 %v5637_v45, %v5633_v40  ;;  %v1424_v53 = vsel %vm817_vm8, %v5637_v45, 0.0  ;;  %v1566_v58 = vunpack.c.l.b16 %v1534_v44 }
 0x34b   : > { %v1565_v55 = vunpack.c.l.b16 %v1533_v46  ;;  %v1425_v56 = vadd.f32 %v1424_v53, %v1423_v49 }
 0x34c   : > { %v1435_v59 = vrot.slane %v1434_v50, 4 }
 0x34d   : > { %v1582_v61 = vsel %vm1581_vm10, %v1565_v55, %v1580_v10  ;;  %v1426_v62 = vrot.slane %v1425_v56, 4 }
 0x34e   : > { %v1436_v1 = vadd.f32 %v1435_v59, %v1434_v50  ;;  %v1584_v2 = vsel %vm1583_vm11, %v1566_v58, %v1582_v61 }
 0x34f   : > { %v1427_v3 = vadd.f32 %v1426_v62, %v1425_v56 }
 0x350   : > { %v1437_v5 = vrot.slane %v1436_v1, 2  ;;  %v4883_v20 = vpop.f32.mrb[44].mxu1 }
 0x351   : > { %v1428_v8 = vrot.slane %v1427_v3, 2  ;;  %v1237_v9 = vadd.f32 %v4883_v20, %v5576_v7  ;;  %v1228_v11 = vpop.f32.mrb[45].mxu1 }
 0x352   : > { %v1438_v12 = vadd.f32 %v1437_v5, %v1436_v1  ;;  %v1229_v13 = vadd.f32 %v5576_v7, %v1228_v11  ;;  %v4884_v14 = vpop.f32.mrb[46].mxu1 }
 0x353   : > { %v1429_v15 = vadd.f32 %v1428_v8, %v1427_v3  ;;  %v1321_v16 = vmax.f32 %v1237_v9, 0.0  ;;  %v1240_v18 = vadd.f32 %v4884_v14, %v5576_v7  ;;  %v1231_v10 = vpop.f32.mrb[47].mxu1 }
 0x354   : > { %v1439_v21 = vrot.slane %v1438_v12, 1  ;;  %v1319_v24 = vmax.f32 %v1229_v13, 0.0  ;;  %v1232_v26 = vadd.f32 %v5576_v7, %v1231_v10 }
 0x355   : > { %v1430_v27 = vrot.slane %v1429_v15, 1  ;;  %v5657_v28 = vmul.f32 0.999995, %v1321_v16  ;;  %v1322_v30 = vmax.f32 %v1240_v18, 0.0 }
 0x356   : > { %v1440_v31 = vadd.f32 %v1439_v21, %v1438_v12  ;;  %v5659_v32 = vmul.f32 0.999995, %v1319_v24  ;;  %v1320_v33 = vmax.f32 %v1232_v26, 0.0 }
 0x357   : > { %v1431_v34 = vadd.f32 %v1430_v27, %v1429_v15  ;;  %v5661_v35 = vmul.f32 0.999995, %v1322_v30  ;;  %v1450_v41 = vsel %vm817_vm8, %v5657_v28, 0.0 }
 0x358   : > { %v1536_v36 = vpack.c.bf16 %v1440_v31, %v1440_v31  ;;  %v5663_v38 = vmul.f32 0.999995, %v1320_v33  ;;  %v1441_v46 = vsel %vm817_vm8, %v5659_v32, 0.0 }
 0x359   : > { %v1535_v39 = vpack.c.bf16 %v1431_v34, %v1431_v34  ;;  %v1378_v42 = vpack.c.bf16 %v5661_v35, %v5657_v28  ;;  %v1451_v44 = vsel %vm817_vm8, %v5661_v35, 0.0 }
 0x35a   : > { %v1452_v47 = vadd.f32 %v1451_v44, %v1450_v41  ;;  %v1377_v0 = vpack.c.bf16 %v5663_v38, %v5659_v32  ;;  %v1442_v49 = vsel %vm817_vm8, %v5663_v38, 0.0  ;;  %v1568_v55 = vunpack.c.l.b16 %v1536_v36 }
 0x35b   : > { %v1567_v50 = vunpack.c.l.b16 %v1535_v39  ;;  %v1443_v53 = vadd.f32 %v1442_v49, %v1441_v46 }
 0x35c   : > { %v1453_v56 = vrot.slane %v1452_v47, 4 }
 0x35d   : > { %v1586_v58 = vsel %vm1585_vm12, %v1567_v50, %v1584_v2  ;;  %v1444_v59 = vrot.slane %v1443_v53, 4 }
 0x35e   : > { %v1454_v61 = vadd.f32 %v1453_v56, %v1452_v47  ;;  %v1588_v62 = vsel %vm1587_vm13, %v1568_v55, %v1586_v58 }
 0x35f   : > { %v1445_v1 = vadd.f32 %v1444_v59, %v1443_v53 }
 0x360   : > { %v1455_v3 = vrot.slane %v1454_v61, 2  ;;  %v4887_v5 = vpop.f32.mrb[48].mxu1 }
 0x361   : > { %v1446_v20 = vrot.slane %v1445_v1, 2  ;;  %v1253_v8 = vadd.f32 %v4887_v5, %v5576_v7  ;;  %v1244_v9 = vpop.f32.mrb[49].mxu1 }
 0x362   : > { %v1456_v11 = vadd.f32 %v1455_v3, %v1454_v61  ;;  %v1245_v12 = vadd.f32 %v5576_v7, %v1244_v9  ;;  %v4888_v13 = vpop.f32.mrb[50].mxu1 }
 0x363   : > { %v1447_v14 = vadd.f32 %v1446_v20, %v1445_v1  ;;  %v1325_v15 = vmax.f32 %v1253_v8, 0.0  ;;  %v1256_v16 = vadd.f32 %v4888_v13, %v5576_v7  ;;  %v1247_v2 = vpop.f32.mrb[51].mxu1 }
 0x364   : > { %v1457_v18 = vrot.slane %v1456_v11, 1  ;;  %v1323_v10 = vmax.f32 %v1245_v12, 0.0  ;;  %v1248_v21 = vadd.f32 %v5576_v7, %v1247_v2 }
 0x365   : > { %v1448_v24 = vrot.slane %v1447_v14, 1  ;;  %v1357_v26 = vmul.f32 0.999995, %v1325_v15  ;;  %v1326_v27 = vmax.f32 %v1256_v16, 0.0 }
 0x366   : > { %v1458_v30 = vadd.f32 %v1457_v18, %v1456_v11  ;;  %v1355_v31 = vmul.f32 0.999995, %v1323_v10  ;;  %v1324_v33 = vmax.f32 %v1248_v21, 0.0 }
 0x367   : > { %v1449_v34 = vadd.f32 %v1448_v24, %v1447_v14  ;;  %v1358_v36 = vmul.f32 0.999995, %v1326_v27  ;;  %v1468_v46 = vsel %vm817_vm8, %v1357_v26, 0.0 }
 0x368   : > { %v1538_v39 = vpack.c.bf16 %v1458_v30, %v1458_v30  ;;  %v1356_v41 = vmul.f32 0.999995, %v1324_v33  ;;  %v1459_v50 = vsel %vm817_vm8, %v1355_v31, 0.0 }
 0x369   : > { %v1537_v44 = vpack.c.bf16 %v1449_v34, %v1449_v34  ;;  %v1380_v47 = vpack.c.bf16 %v1358_v36, %v1357_v26  ;;  %v1469_v49 = vsel %vm817_vm8, %v1358_v36, 0.0 }
 0x36a   : > { %v1470_v53 = vadd.f32 %v1469_v49, %v1468_v46  ;;  %v1379_v55 = vpack.c.bf16 %v1356_v41, %v1355_v31  ;;  %v1460_v56 = vsel %vm817_vm8, %v1356_v41, 0.0  ;;  %v1570_v61 = vunpack.c.l.b16 %v1538_v39 }
 0x36b   : > { %v1569_v58 = vunpack.c.l.b16 %v1537_v44  ;;  %v1461_v59 = vadd.f32 %v1460_v56, %v1459_v50 }
 0x36c   : > { %v1471_v1 = vrot.slane %v1470_v53, 4  ;;  %4533 = vmatprep.subr.bf16.mxu1 %v1379_v55 }
 0x36d   : > { %v1462_v3 = vrot.slane %v1461_v59, 4  ;;  %4534 = vmatpush3.bf16.msra.mxu1 %v1371_v29  ;;  %v1590_v5 = vsel %vm1589_vm14, %v1569_v58, %v1588_v62 }
 0x36e   : > { %v1472_v20 = vadd.f32 %v1471_v1, %v1470_v53  ;;  %4535 = vmatprep.subr.bf16.mxu1 %v1380_v47  ;;  %v5692_v8 = vsel %vm1591_vm15, %v1570_v61, %v1590_v5 }
 0x36f   : > { %v1463_v9 = vadd.f32 %v1462_v3, %v1461_v59 }
 0x370   : > { %v1473_v11 = vrot.slane %v1472_v20, 2  ;;  %v4891_v12 = vpop.f32.mrb[52].mxu1 }
 0x371   : > { %v1464_v13 = vrot.slane %v1463_v9, 2  ;;  %v1269_v14 = vadd.f32 %v4891_v12, %v5576_v7  ;;  %v1260_v15 = vpop.f32.mrb[53].mxu1  ;;  %4536 = vmatpush3.bf16.msra.mxu1 %v1372_v25 }
 0x372   : > { %v1474_v19 = vadd.f32 %v1473_v11, %v1472_v20  ;;  %v1261_v23 = vadd.f32 %v5576_v7, %v1260_v15  ;;  %v4892_v29 = vpop.f32.mrb[54].mxu1 }
 0x373   : > { %v1465_v62 = vadd.f32 %v1464_v13, %v1463_v9  ;;  %v1329_v16 = vmax.f32 %v1269_v14, 0.0  ;;  %v1272_v2 = vadd.f32 %v4892_v29, %v5576_v7  ;;  %v1263_v18 = vpop.f32.mrb[55].mxu1 }
 0x374   : > { %v1475_v10 = vrot.slane %v1474_v19, 1  ;;  %v1327_v21 = vmax.f32 %v1261_v23, 0.0  ;;  %v1264_v24 = vadd.f32 %v5576_v7, %v1263_v18 }
 0x375   : > { %v1466_v26 = vrot.slane %v1465_v62, 1  ;;  %v1361_v27 = vmul.f32 0.999995, %v1329_v16  ;;  %v1330_v30 = vmax.f32 %v1272_v2, 0.0 }
 0x376   : > { %v1476_v31 = vadd.f32 %v1475_v10, %v1474_v19  ;;  %v1359_v33 = vmul.f32 0.999995, %v1327_v21  ;;  %v1328_v17 = vmax.f32 %v1264_v24, 0.0 }
 0x377   : > { %v1467_v22 = vadd.f32 %v1466_v26, %v1465_v62  ;;  %v1362_v25 = vmul.f32 0.999995, %v1330_v30  ;;  %v1486_v36 = vsel %vm817_vm8, %v1361_v27, 0.0 }
 0x378   : > { %v1540_v34 = vpack.c.bf16 %v1476_v31, %v1476_v31  ;;  %v1360_v39 = vmul.f32 0.999995, %v1328_v17  ;;  %v1477_v44 = vsel %vm817_vm8, %v1359_v33, 0.0 }
 0x379   : > { %v1539_v41 = vpack.c.bf16 %v1467_v22, %v1467_v22  ;;  %v1382_v46 = vpack.c.bf16 %v1362_v25, %v1361_v27  ;;  %v1487_v47 = vsel %vm817_vm8, %v1362_v25, 0.0 }
 0x37a   : > { %v1572_v49 = vunpack.c.l.b16 %v1540_v34  ;;  %v1488_v50 = vadd.f32 %v1487_v47, %v1486_v36  ;;  %v1381_v53 = vpack.c.bf16 %v1360_v39, %v1359_v33  ;;  %v1478_v55 = vsel %vm817_vm8, %v1360_v39, 0.0 }
 0x37b   : > { %v1571_v56 = vunpack.c.l.b16 %v1539_v41  ;;  %v1479_v58 = vadd.f32 %v1478_v55, %v1477_v44 }
 0x37c   : > { %v1489_v59 = vrot.slane %v1488_v50, 4  ;;  %4537 = vmatprep.subr.bf16.mxu1 %v1381_v53 }
 0x37d   : > { %v1593_v61 = vsel %vm1579_vm9, %v1572_v49, %v1571_v56  ;;  %v1480_v1 = vrot.slane %v1479_v58, 4  ;;  %4538 = vmatpush3.bf16.msra.mxu1 %v1373_v4 }
 0x37e   : > { %v1490_v3 = vadd.f32 %v1489_v59, %v1488_v50  ;;  %4539 = vmatprep.subr.bf16.mxu1 %v1382_v46 }
 0x37f   : > { %v1481_v5 = vadd.f32 %v1480_v1, %v1479_v58 }
 0x380   : > { %v1491_v20 = vrot.slane %v1490_v3, 2  ;;  %v4895_v9 = vpop.f32.mrb[56].mxu1 }
 0x381   : > { %v1482_v11 = vrot.slane %v1481_v5, 2  ;;  %v1285_v12 = vadd.f32 %v4895_v9, %v5576_v7  ;;  %v1276_v13 = vpop.f32.mrb[57].mxu1  ;;  %4540 = vmatpush3.bf16.msra.mxu1 %v1374_v63 }
 0x382   : > { %v1492_v14 = vadd.f32 %v1491_v20, %v1490_v3  ;;  %v1277_v15 = vadd.f32 %v5576_v7, %v1276_v13  ;;  %v4896_v19 = vpop.f32.mrb[58].mxu1 }
 0x383   : > { %v1483_v23 = vadd.f32 %v1482_v11, %v1481_v5  ;;  %v1333_v54 = vmax.f32 %v1285_v12, 0.0  ;;  %v1288_v60 = vadd.f32 %v4896_v19, %v5576_v7  ;;  %v1279_v4 = vpop.f32.mrb[59].mxu1 }
 0x384   : > { %v1493_v29 = vrot.slane %v1492_v14, 1  ;;  %v1331_v62 = vmax.f32 %v1277_v15, 0.0  ;;  %v1280_v16 = vadd.f32 %v5576_v7, %v1279_v4 }
 0x385   : > { %v1484_v2 = vrot.slane %v1483_v23, 1  ;;  %v1365_v18 = vmul.f32 0.999995, %v1333_v54  ;;  %v1334_v10 = vmax.f32 %v1288_v60, 0.0 }
 0x386   : > { %v1494_v21 = vadd.f32 %v1493_v29, %v1492_v14  ;;  %v1363_v24 = vmul.f32 0.999995, %v1331_v62  ;;  %v1332_v51 = vmax.f32 %v1280_v16, 0.0 }
 0x387   : > { %v1485_v57 = vadd.f32 %v1484_v2, %v1483_v23  ;;  %v1366_v63 = vmul.f32 0.999995, %v1334_v10  ;;  %v1504_v31 = vsel %vm817_vm8, %v1365_v18, 0.0 }
 0x388   : > { %v1542_v26 = vpack.c.bf16 %v1494_v21, %v1494_v21  ;;  %v1364_v27 = vmul.f32 0.999995, %v1332_v51  ;;  %v1495_v22 = vsel %vm817_vm8, %v1363_v24, 0.0 }
 0x389   : > { %v1541_v30 = vpack.c.bf16 %v1485_v57, %v1485_v57  ;;  %v1384_v33 = vpack.c.bf16 %v1366_v63, %v1365_v18  ;;  %v1505_v17 = vsel %vm817_vm8, %v1366_v63, 0.0 }
 0x38a   : > { %v1506_v25 = vadd.f32 %v1505_v17, %v1504_v31  ;;  %v1383_v34 = vpack.c.bf16 %v1364_v27, %v1363_v24  ;;  %v1496_v36 = vsel %vm817_vm8, %v1364_v27, 0.0  ;;  %v1574_v44 = vunpack.c.l.b16 %v1542_v26 }
 0x38b   : > { %v1573_v39 = vunpack.c.l.b16 %v1541_v30  ;;  %v1497_v41 = vadd.f32 %v1496_v36, %v1495_v22 }
 0x38c   : > { %v1507_v46 = vrot.slane %v1506_v25, 4  ;;  %4541 = vmatprep.subr.bf16.mxu1 %v1383_v34 }
 0x38d   : > { %v1594_v47 = vsel %vm1581_vm10, %v1573_v39, %v1593_v61  ;;  %v1498_v49 = vrot.slane %v1497_v41, 4  ;;  %4542 = vmatpush3.bf16.msra.mxu1 %v1375_v52 }
 0x38e   : > { %v1508_v50 = vadd.f32 %v1507_v46, %v1506_v25  ;;  %v1595_v53 = vsel %vm1583_vm11, %v1574_v44, %v1594_v47  ;;  %4543 = vmatprep.subr.bf16.mxu1 %v1384_v33  ;;  %v1603_v25 = vld [vmem:[#allocation2] sm:$0xff]  ;;  %v1605_v47 = vld [vmem:[#allocation2 + $0x10] sm:$0xff] }
 0x38f   : > { %v1499_v55 = vadd.f32 %v1498_v49, %v1497_v41 }
 0x390   : > { %v1509_v56 = vrot.slane %v1508_v50, 2  ;;  %v4899_v58 = vpop.f32.mrb[60].mxu1 }
 0x391   : > { %v1500_v59 = vrot.slane %v1499_v55, 2  ;;  %v1301_v1 = vadd.f32 %v4899_v58, %v5576_v7  ;;  %v1292_v3 = vpop.f32.mrb[61].mxu1  ;;  %4544 = vmatpush3.bf16.msra.mxu1 %v1376_v48  ;;  %v1615_v58 = vld [vmem:[#allocation2 + $0x60] sm:$0xff] }
 0x392   : > { %v1510_v61 = vadd.f32 %v1509_v56, %v1508_v50  ;;  %v1293_v5 = vadd.f32 %v5576_v7, %v1292_v3  ;;  %v4900_v40 = vpop.f32.mrb[62].mxu1  ;;  %v1607_v50 = vld [vmem:[#allocation2 + $0x20] sm:$0xff]  ;;  %v1613_v56 = vld [vmem:[#allocation2 + $0x50] sm:$0xff]  ;;  %v1624_v3 = vld [vmem:[#allocation2 + $0xa8] sm:$0xff] }
 0x393   : > { %v1501_v45 = vadd.f32 %v1500_v59, %v1499_v55  ;;  %v1337_v52 = vmax.f32 %v1301_v1, 0.0  ;;  %v1304_v20 = vadd.f32 %v4900_v40, %v5576_v7  ;;  %v1295_v9 = vpop.f32.mrb[63].mxu1  ;;  %v1611_v55 = vld [vmem:[#allocation2 + $0x40] sm:$0xff]  ;;  %v1617_v59 = vld [vmem:[#allocation2 + $0x70] sm:$0xff]  ;;  %v1622_v1 = vld [vmem:[#allocation2 + $0x98] sm:$0xff] }
 0x394   : > { %v1511_v11 = vrot.slane %v1510_v61, 1  ;;  %v1335_v12 = vmax.f32 %v1293_v5, 0.0  ;;  %v1296_v13 = vadd.f32 %v5576_v7, %v1295_v9  ;;  %v1628_v5 = vld [vmem:[#allocation2 + $0xc8] sm:$0xff]  ;;  %v5115_v40 = vld [vmem:[%s6411_s2 + $0x10] sm:$0xff]   ;;  %v1634_v9 = vld [vmem:[#allocation2 + $0xf8] sm:$0xff] }
 0x395   : > { %v1502_v14 = vrot.slane %v1501_v45, 1  ;;  %v1369_v15 = vmul.f32 0.999995, %v1337_v52  ;;  %v1338_v19 = vmax.f32 %v1304_v20, 0.0  ;;  %4901 = vmatprep.subr.bf16.mxu0 %v5115_v40  ;;  %v1630_v52 = vld [vmem:[#allocation2 + $0xd8] sm:$0xff]  ;;  %v1632_v20 = vld [vmem:[#allocation2 + $0xe8] sm:$0xff] }
 0x396   : > { %v1512_v23 = vadd.f32 %v1511_v11, %v1510_v61  ;;  %v1367_v54 = vmul.f32 0.999995, %v1335_v12  ;;  %v1336_v37 = vmax.f32 %v1296_v13, 0.0  ;;  %v1626_v61 = vld [vmem:[#allocation2 + $0xb8] sm:$0xff]  ;;  %4902 = vmatpush3.bf16.msra.mxu0 %v5115_v40 }
 0x397   : > { %v1503_v43 = vadd.f32 %v1502_v14, %v1501_v45  ;;  %v1370_v48 = vmul.f32 0.999995, %v1338_v19  ;;  %v1522_v62 = vsel %vm817_vm8, %v1369_v15, 0.0  ;;  %v5116_v45 = vld [vmem:[%s6411_s2 + $0x18] sm:$0xff]  }
 0x398   : > { %v1544_v60 = vpack.c.bf16 %v1512_v23, %v1512_v23  ;;  %v1368_v4 = vmul.f32 0.999995, %v1336_v37  ;;  %v1513_v18 = vsel %vm817_vm8, %v1367_v54, 0.0  ;;  %4903 = vmatprep.subr.bf16.mxu0 %v5116_v45 }
 0x399   : > { %v1543_v29 = vpack.c.bf16 %v1503_v43, %v1503_v43  ;;  %v1386_v16 = vpack.c.bf16 %v1370_v48, %v1369_v15  ;;  %v1523_v2 = vsel %vm817_vm8, %v1370_v48, 0.0 }
 0x39a   : > { %v1524_v10 = vadd.f32 %v1523_v2, %v1522_v62  ;;  %v1385_v7 = vpack.c.bf16 %v1368_v4, %v1367_v54  ;;  %v1514_v21 = vsel %vm817_vm8, %v1368_v4, 0.0  ;;  %v1576_v57 = vunpack.c.l.b16 %v1544_v60  ;;  %4904 = vmatpush3.bf16.msra.mxu0 %v5116_v45 }
 0x39b   : > { %v1575_v24 = vunpack.c.l.b16 %v1543_v29  ;;  %v1515_v51 = vadd.f32 %v1514_v21, %v1513_v18 }
 0x39c   : > { %v1525_v63 = vrot.slane %v1524_v10, 4  ;;  %4545 = vmatprep.subr.bf16.mxu1 %v1385_v7 }
 0x39d   : > { %v1596_v26 = vsel %vm1585_vm12, %v1575_v24, %v1595_v53  ;;  %v1516_v27 = vrot.slane %v1515_v51, 4  ;;  %4546 = vmatpush3.bf16.msra.mxu1 %v1377_v0  ;;  %v1609_v53 = vld [vmem:[#allocation2 + $0x30] sm:$0xff] }
 0x39e   : > { %v1526_v30 = vadd.f32 %v1525_v63, %v1524_v10  ;;  %4547 = vmatprep.subr.bf16.mxu1 %v1386_v16  ;;  %v1597_v31 = vsel %vm1587_vm13, %v1576_v57, %v1596_v26 }
 0x39f   : > { %v1517_v33 = vadd.f32 %v1516_v27, %v1515_v51 }
 0x3a0   : > { %v1527_v17 = vrot.slane %v1526_v30, 2 }
 0x3a1   : > { %v1518_v22 = vrot.slane %v1517_v33, 2  ;;  %4548 = vmatpush3.bf16.msra.mxu1 %v1378_v42 }
 0x3a2   : > { %v1528_v34 = vadd.f32 %v1527_v17, %v1526_v30 }
 0x3a3   : > { %v1519_v36 = vadd.f32 %v1518_v22, %v1517_v33 }
 0x3a4   : > { %v1529_v39 = vrot.slane %v1528_v34, 1  ;;  %1668 = vmatmul.mubr.bf16.vlgmr.msra.gmra.mrb[64].mxu1 %v1603_v25 }
 0x3a5   : > { %v1520_v41 = vrot.slane %v1519_v36, 1  ;;  %1675 = vmatprep.mubr.bf16.mxu1 %v5570_v6 }
 0x3a6   : > { %v1530_v32 = vadd.f32 %v1529_v39, %v1528_v34 }
 0x3a7   : > { %v1521_v38 = vadd.f32 %v1520_v41, %v1519_v36 }
 0x3a8   : > { %v1546_v0 = vpack.c.bf16 %v1530_v32, %v1530_v32 }
 0x3a9   : > { %v1545_v44 = vpack.c.bf16 %v1521_v38, %v1521_v38 }
 0x3aa   : > { %v1578_v49 = vunpack.c.l.b16 %v1546_v0 }
 0x3ab   : > { %v1577_v46 = vunpack.c.l.b16 %v1545_v44 }
 0x3ac   : > { %1676 = vmatmul.mubr.bf16.gmra.mrb[68].mxu1 %v1605_v47 }
 0x3ad   : > { %1683 = vmatprep.mubr.bf16.mxu1 %v5570_v6  ;;  %v1598_v28 = vsel %vm1589_vm14, %v1577_v46, %v1597_v31 }
 0x3ae   : > { %v1599_v35 = vsel %vm1591_vm15, %v1578_v49, %v1598_v28 }
 0x3af   : > { %v1600_v42 = vpack.c.b16 %v1599_v35, %v5692_v8  ;;  %v1620_v8 = vld [vmem:[#allocation2 + $0x88] sm:$0xff] }
 0x3b1   : > { %1602 = vst.msk [vmem:[#allocation3] sm:$0xff] %vm817_vm8, %v1600_v42 }
 0x3b4   : > { %1684 = vmatmul.mubr.bf16.gmra.mrb[72].mxu1 %v1607_v50 }
 0x3b5   : > { %1691 = vmatprep.mubr.bf16.mxu1 %v5570_v6 }
 0x3bc   : > { %1692 = vmatmul.mubr.bf16.gmra.mrb[76].mxu1 %v1609_v53 }
 0x3bd   : > { %1699 = vmatprep.mubr.bf16.mxu1 %v5570_v6 }
 0x3c4   : > { %1700 = vmatmul.mubr.bf16.gmra.mrb[80].mxu1 %v1611_v55 }
 0x3c5   : > { %1707 = vmatprep.mubr.bf16.mxu1 %v5570_v6 }
 0x3cc   : > { %1708 = vmatmul.mubr.bf16.gmra.mrb[84].mxu1 %v1613_v56 }
 0x3cd   : > { %1715 = vmatprep.mubr.bf16.mxu1 %v5570_v6 }
 0x3d4   : > { %1716 = vmatmul.mubr.bf16.gmra.mrb[88].mxu1 %v1615_v58 }
 0x3d5   : > { %1723 = vmatprep.mubr.bf16.mxu1 %v5570_v6 }
 0x3dc   : > { %1724 = vmatmul.mubr.bf16.gmra.mrb[92].mxu1 %v1617_v59 }
 0x3dd   : > { %1731 = vmatprep.mubr.bf16.mxu1 %v1620_v8 }
 0x3e4   : > { %1732 = vmatmul.mubr.bf16.gmra.mrb[96].mxu1 %v5570_v6 }
 0x3e5   : > { %1739 = vmatprep.mubr.bf16.mxu1 %v1622_v1 }
 0x3ec   : > { %1740 = vmatmul.mubr.bf16.gmra.mrb[100].mxu1 %v5570_v6 }
 0x3ed   : > { %1747 = vmatprep.mubr.bf16.mxu1 %v1624_v3 }
 0x3f4   : > { %1748 = vmatmul.mubr.bf16.gmra.mrb[104].mxu1 %v5570_v6 }
 0x3f5   : > { %1755 = vmatprep.mubr.bf16.mxu1 %v1626_v61 }
 0x3fc   : > { %1756 = vmatmul.mubr.bf16.gmra.mrb[108].mxu1 %v5570_v6 }
 0x3fd   : > { %1763 = vmatprep.mubr.bf16.mxu1 %v1628_v5 }
 0x404   : > { %1764 = vmatmul.mubr.bf16.gmra.mrb[112].mxu1 %v5570_v6 }
 0x405   : > { %1771 = vmatprep.mubr.bf16.mxu1 %v1630_v52 }
 0x40c   : > { %1772 = vmatmul.mubr.bf16.gmra.mrb[116].mxu1 %v5570_v6 }
 0x40d   : > { %1779 = vmatprep.mubr.bf16.mxu1 %v1632_v20 }
 0x414   : > { %1780 = vmatmul.mubr.bf16.gmra.mrb[120].mxu1 %v5570_v6 }
 0x415   : > { %1787 = vmatprep.mubr.bf16.mxu1 %v1634_v9 }
 0x41c   : > { %1788 = vmatmul.mubr.bf16.gmra.mrb[124].mxu1 %v5570_v6 }
 0x41d   : > { %2684 = vmatprep.mubr.bf16.mxu1 %v5570_v6 }
 0x477   : > { %v4549_v11 = vpop.f32.mrb[64].mxu1 }
 0x478   : > { %v4550_v12 = vpop.f32.mrb[65].mxu1 }
 0x479   : > { %v4551_v13 = vadd.f32 %v4550_v12, %v4549_v11  ;;  %v4552_v14 = vpop.f32.mrb[66].mxu1 }
 0x47a   : > { %v4553_v15 = vpop.f32.mrb[67].mxu1 }
 0x47b   : > { %v4554_v19 = vadd.f32 %v4553_v15, %v4552_v14 }
 0x47d   : > { %v1796_v23 = vpack.c.bf16 %v4554_v19, %v4551_v13 }
 0x47f   : > { %v4555_v54 = vpop.f32.mrb[68].mxu1  ;;  %4905 = vmatprep.mubr.msk.bf16.mxu0 %vm817_vm8, %v1796_v23 }
 0x480   : > { %v4556_v37 = vpop.f32.mrb[69].mxu1 }
 0x481   : > { %v4557_v43 = vadd.f32 %v4556_v37, %v4555_v54  ;;  %v4558_v48 = vpop.f32.mrb[70].mxu1 }
 0x482   : > { %v4559_v60 = vpop.f32.mrb[71].mxu1 }
 0x483   : > { %v4560_v4 = vadd.f32 %v4559_v60, %v4558_v48 }
 0x485   : > { %v1797_v29 = vpack.c.bf16 %v4560_v4, %v4557_v43 }
 0x487   : > { %v4561_v62 = vpop.f32.mrb[72].mxu1  ;;  %4906 = vmatmul.mubr.msk.bf16.vlgmr.msra.gmra.mrb[64].mxu0 %vm817_vm8, %v1797_v29 }
 0x488   : > { %v4562_v6 = vpop.f32.mrb[73].mxu1 }
 0x489   : > { %v4563_v16 = vadd.f32 %v4562_v6, %v4561_v62  ;;  %v4564_v2 = vpop.f32.mrb[74].mxu1 }
 0x48a   : > { %v4565_v18 = vpop.f32.mrb[75].mxu1 }
 0x48b   : > { %v4566_v10 = vadd.f32 %v4565_v18, %v4564_v2 }
 0x48d   : > { %v1798_v7 = vpack.c.bf16 %v4566_v10, %v4563_v16 }
 0x48f   : > { %v4567_v21 = vpop.f32.mrb[76].mxu1  ;;  %4909 = vmatprep.mubr.msk.bf16.mxu0 %vm817_vm8, %v1798_v7 }
 0x490   : > { %v4568_v24 = vpop.f32.mrb[77].mxu1 }
 0x491   : > { %v4569_v51 = vadd.f32 %v4568_v24, %v4567_v21  ;;  %v4570_v57 = vpop.f32.mrb[78].mxu1 }
 0x492   : > { %v4571_v63 = vpop.f32.mrb[79].mxu1 }
 0x493   : > { %v4572_v26 = vadd.f32 %v4571_v63, %v4570_v57 }
 0x495   : > { %v1799_v27 = vpack.c.bf16 %v4572_v26, %v4569_v51  ;;  %v5117_v26 = vld [vmem:[%s6413_s4 + $0x10] sm:$0xff]  }
 0x496   : > { %4937 = vmatprep.subr.bf16.mxu0 %v5117_v26 }
 0x497   : > { %v4573_v30 = vpop.f32.mrb[80].mxu1  ;;  %4910 = vmatmul.mubr.msk.bf16.gmra.mrb[68].mxu0 %vm817_vm8, %v1799_v27 }
 0x498   : > { %v4574_v31 = vpop.f32.mrb[81].mxu1  ;;  %4938 = vmatpush3.bf16.msra.mxu0 %v5117_v26 }
 0x499   : > { %v4575_v33 = vadd.f32 %v4574_v31, %v4573_v30  ;;  %v4576_v17 = vpop.f32.mrb[82].mxu1  ;;  %v5118_v31 = vld [vmem:[%s6413_s4 + $0x18] sm:$0xff]  }
 0x49a   : > { %v4577_v22 = vpop.f32.mrb[83].mxu1  ;;  %4939 = vmatprep.subr.bf16.mxu0 %v5118_v31 }
 0x49b   : > { %v4578_v25 = vadd.f32 %v4577_v22, %v4576_v17 }
 0x49c   : > { %4940 = vmatpush3.bf16.msra.mxu0 %v5118_v31 }
 0x49d   : > { %v1800_v34 = vpack.c.bf16 %v4578_v25, %v4575_v33 }
 0x49f   : > { %v4579_v36 = vpop.f32.mrb[84].mxu1  ;;  %4913 = vmatprep.mubr.msk.bf16.mxu0 %vm817_vm8, %v1800_v34 }
 0x4a0   : > { %v4580_v39 = vpop.f32.mrb[85].mxu1 }
 0x4a1   : > { %v4581_v41 = vadd.f32 %v4580_v39, %v4579_v36  ;;  %v4582_v32 = vpop.f32.mrb[86].mxu1 }
 0x4a2   : > { %v4583_v38 = vpop.f32.mrb[87].mxu1 }
 0x4a3   : > { %v4584_v0 = vadd.f32 %v4583_v38, %v4582_v32 }
 0x4a5   : > { %v1801_v44 = vpack.c.bf16 %v4584_v0, %v4581_v41 }
 0x4a7   : > { %v4585_v46 = vpop.f32.mrb[88].mxu1  ;;  %4914 = vmatmul.mubr.msk.bf16.gmra.mrb[72].mxu0 %vm817_vm8, %v1801_v44 }
 0x4a8   : > { %v4586_v47 = vpop.f32.mrb[89].mxu1 }
 0x4a9   : > { %v4587_v49 = vadd.f32 %v4586_v47, %v4585_v46  ;;  %v4588_v28 = vpop.f32.mrb[90].mxu1 }
 0x4aa   : > { %v4589_v35 = vpop.f32.mrb[91].mxu1 }
 0x4ab   : > { %v4590_v42 = vadd.f32 %v4589_v35, %v4588_v28 }
 0x4ad   : > { %v1802_v50 = vpack.c.bf16 %v4590_v42, %v4587_v49 }
 0x4af   : > { %v4591_v53 = vpop.f32.mrb[92].mxu1  ;;  %4917 = vmatprep.mubr.msk.bf16.mxu0 %vm817_vm8, %v1802_v50 }
 0x4b0   : > { %v4592_v55 = vpop.f32.mrb[93].mxu1 }
 0x4b1   : > { %v4593_v56 = vadd.f32 %v4592_v55, %v4591_v53  ;;  %v4594_v58 = vpop.f32.mrb[94].mxu1  ;;  %v5795_v55 = vld [vmem:[%s6412_s3 + $0x1] ss:$0 sm:$0xff] }
 0x4b2   : > { %v4595_v8 = vpop.f32.mrb[95].mxu1 }
 0x4b3   : > { %v4596_v59 = vadd.f32 %v4595_v8, %v4594_v58 }
 0x4b5   : > { %v1803_v1 = vpack.c.bf16 %v4596_v59, %v4593_v56 }
 0x4b7   : > { %v4597_v3 = vpop.f32.mrb[96].mxu1  ;;  %4918 = vmatmul.mubr.msk.bf16.gmra.mrb[76].mxu0 %vm817_vm8, %v1803_v1 }
 0x4b8   : > { %v4598_v61 = vpop.f32.mrb[97].mxu1 }
 0x4b9   : > { %v4599_v5 = vadd.f32 %v4598_v61, %v4597_v3  ;;  %v4600_v40 = vpop.f32.mrb[98].mxu1 }
 0x4ba   : > { %v4601_v45 = vpop.f32.mrb[99].mxu1 }
 0x4bb   : > { %v4602_v52 = vadd.f32 %v4601_v45, %v4600_v40 }
 0x4bd   : > { %v1804_v20 = vpack.c.bf16 %v4602_v52, %v4599_v5 }
 0x4bf   : > { %v4603_v9 = vpop.f32.mrb[100].mxu1  ;;  %4921 = vmatprep.mubr.msk.bf16.mxu0 %vm817_vm8, %v1804_v20 }
 0x4c0   : > { %v4604_v11 = vpop.f32.mrb[101].mxu1 }
 0x4c1   : > { %v4605_v12 = vadd.f32 %v4604_v11, %v4603_v9  ;;  %v4606_v13 = vpop.f32.mrb[102].mxu1 }
 0x4c2   : > { %v4607_v14 = vpop.f32.mrb[103].mxu1 }
 0x4c3   : > { %v4608_v15 = vadd.f32 %v4607_v14, %v4606_v13 }
 0x4c5   : > { %v1805_v19 = vpack.c.bf16 %v4608_v15, %v4605_v12 }
 0x4c7   : > { %4922 = vmatmul.mubr.msk.bf16.gmra.mrb[80].mxu0 %vm817_vm8, %v1805_v19  ;;  %v4609_v23 = vpop.f32.mrb[104].mxu1 }
 0x4c8   : > { %v4610_v54 = vpop.f32.mrb[105].mxu1 }
 0x4c9   : > { %v4611_v37 = vadd.f32 %v4610_v54, %v4609_v23  ;;  %v4612_v43 = vpop.f32.mrb[106].mxu1 }
 0x4ca   : > { %v4613_v48 = vpop.f32.mrb[107].mxu1 }
 0x4cb   : > { %v4614_v60 = vadd.f32 %v4613_v48, %v4612_v43 }
 0x4cd   : > { %v1806_v4 = vpack.c.bf16 %v4614_v60, %v4611_v37 }
 0x4cf   : > { %v4615_v29 = vpop.f32.mrb[108].mxu1  ;;  %4925 = vmatprep.mubr.msk.bf16.mxu0 %vm817_vm8, %v1806_v4 }
 0x4d0   : > { %v4616_v62 = vpop.f32.mrb[109].mxu1 }
 0x4d1   : > { %v4617_v6 = vadd.f32 %v4616_v62, %v4615_v29  ;;  %v4618_v16 = vpop.f32.mrb[110].mxu1 }
 0x4d2   : > { %v4619_v2 = vpop.f32.mrb[111].mxu1 }
 0x4d3   : > { %v4620_v18 = vadd.f32 %v4619_v2, %v4618_v16 }
 0x4d5   : > { %v1807_v10 = vpack.c.bf16 %v4620_v18, %v4617_v6 }
 0x4d7   : > { %4926 = vmatmul.mubr.msk.bf16.gmra.mrb[84].mxu0 %vm817_vm8, %v1807_v10  ;;  %v4621_v7 = vpop.f32.mrb[112].mxu1 }
 0x4d8   : > { %v4622_v21 = vpop.f32.mrb[113].mxu1 }
 0x4d9   : > { %v4623_v24 = vadd.f32 %v4622_v21, %v4621_v7  ;;  %v4624_v51 = vpop.f32.mrb[114].mxu1 }
 0x4da   : > { %v4625_v57 = vpop.f32.mrb[115].mxu1 }
 0x4db   : > { %v4626_v63 = vadd.f32 %v4625_v57, %v4624_v51 }
 0x4dd   : > { %v1808_v27 = vpack.c.bf16 %v4626_v63, %v4623_v24 }
 0x4df   : > { %v4627_v30 = vpop.f32.mrb[116].mxu1  ;;  %4929 = vmatprep.mubr.msk.bf16.mxu0 %vm817_vm8, %v1808_v27 }
 0x4e0   : > { %v4628_v33 = vpop.f32.mrb[117].mxu1 }
 0x4e1   : > { %v4629_v17 = vadd.f32 %v4628_v33, %v4627_v30  ;;  %v4630_v22 = vpop.f32.mrb[118].mxu1 }
 0x4e2   : > { %v4631_v25 = vpop.f32.mrb[119].mxu1 }
 0x4e3   : > { %v4632_v34 = vadd.f32 %v4631_v25, %v4630_v22 }
 0x4e5   : > { %v1809_v36 = vpack.c.bf16 %v4632_v34, %v4629_v17 }
 0x4e7   : > { %4930 = vmatmul.mubr.msk.bf16.gmra.mrb[88].mxu0 %vm817_vm8, %v1809_v36  ;;  %v4633_v39 = vpop.f32.mrb[120].mxu1 }
 0x4e8   : > { %v4634_v41 = vpop.f32.mrb[121].mxu1 }
 0x4e9   : > { %v4635_v32 = vadd.f32 %v4634_v41, %v4633_v39  ;;  %v4636_v38 = vpop.f32.mrb[122].mxu1 }
 0x4ea   : > { %v4637_v0 = vpop.f32.mrb[123].mxu1 }
 0x4eb   : > { %v4638_v44 = vadd.f32 %v4637_v0, %v4636_v38 }
 0x4ed   : > { %v1810_v46 = vpack.c.bf16 %v4638_v44, %v4635_v32 }
 0x4ef   : > { %v4639_v47 = vpop.f32.mrb[124].mxu1  ;;  %4933 = vmatprep.mubr.msk.bf16.mxu0 %vm817_vm8, %v1810_v46 }
 0x4f0   : > { %v4640_v49 = vpop.f32.mrb[125].mxu1 }
 0x4f1   : > { %v4641_v28 = vadd.f32 %v4640_v49, %v4639_v47  ;;  %v4642_v35 = vpop.f32.mrb[126].mxu1 }
 0x4f2   : > { %v4643_v42 = vpop.f32.mrb[127].mxu1 }
 0x4f3   : > { %v4644_v50 = vadd.f32 %v4643_v42, %v4642_v35 }
 0x4f5   : > { %v1811_v53 = vpack.c.bf16 %v4644_v50, %v4641_v28 }
 0x4f7   : > { %4934 = vmatmul.mubr.msk.bf16.gmra.mrb[92].mxu0 %vm817_vm8, %v1811_v53 }
 0x55a   : > { %v4907_v56 = vpop.f32.mrb[64].mxu0 }
 0x55b   : > { %v1928_v58 = vadd.f32 %v4907_v56, %v5795_v55  ;;  %v1919_v8 = vpop.f32.mrb[65].mxu0 }
 0x55c   : > { %v1920_v59 = vadd.f32 %v5795_v55, %v1919_v8  ;;  %v4908_v1 = vpop.f32.mrb[66].mxu0 }
 0x55d   : > { %v1931_v3 = vadd.f32 %v4908_v1, %v5795_v55  ;;  %v1922_v61 = vpop.f32.mrb[67].mxu0  ;;  %v2048_v40 = vmax.f32 %v1928_v58, 0.0 }
 0x55e   : > { %v1923_v5 = vadd.f32 %v5795_v55, %v1922_v61  ;;  %v2046_v52 = vmax.f32 %v1920_v59, 0.0 }
 0x55f   : > { %v2049_v45 = vmax.f32 %v1931_v3, 0.0 }
 0x560   : > { %v2047_v20 = vmax.f32 %v1923_v5, 0.0 }
 0x561   : > { %v2079_v9 = vpack.c.bf16 %v2049_v45, %v2048_v40 }
 0x562   : > { %v2078_v11 = vpack.c.bf16 %v2047_v20, %v2046_v52 }
 0x564   : > { %4941 = vmatprep.mubr.msk.bf16.mxu0 %vm817_vm8, %v2078_v11 }
 0x565   : > { %4942 = vmatmul.mubr.msk.bf16.vlgmr.msra.gmra.mrb[96].mxu0 %vm817_vm8, %v2079_v9 }
 0x56a   : > { %v4911_v12 = vpop.f32.mrb[68].mxu0 }
 0x56b   : > { %v1944_v13 = vadd.f32 %v4911_v12, %v5795_v55  ;;  %v1935_v14 = vpop.f32.mrb[69].mxu0 }
 0x56c   : > { %v1936_v15 = vadd.f32 %v5795_v55, %v1935_v14  ;;  %v4912_v19 = vpop.f32.mrb[70].mxu0 }
 0x56d   : > { %v1947_v23 = vadd.f32 %v4912_v19, %v5795_v55  ;;  %v1938_v54 = vpop.f32.mrb[71].mxu0  ;;  %v2052_v43 = vmax.f32 %v1944_v13, 0.0 }
 0x56e   : > { %v1939_v37 = vadd.f32 %v5795_v55, %v1938_v54  ;;  %v2050_v60 = vmax.f32 %v1936_v15, 0.0 }
 0x56f   : > { %v2053_v48 = vmax.f32 %v1947_v23, 0.0 }
 0x570   : > { %v2051_v4 = vmax.f32 %v1939_v37, 0.0 }
 0x571   : > { %v2081_v29 = vpack.c.bf16 %v2053_v48, %v2052_v43 }
 0x572   : > { %v2080_v62 = vpack.c.bf16 %v2051_v4, %v2050_v60 }
 0x574   : > { %4945 = vmatprep.mubr.msk.bf16.mxu0 %vm817_vm8, %v2080_v62 }
 0x575   : > { %4946 = vmatmul.mubr.msk.bf16.gmra.mrb[100].mxu0 %vm817_vm8, %v2081_v29 }
 0x57a   : > { %v4915_v6 = vpop.f32.mrb[72].mxu0 }
 0x57b   : > { %v1960_v16 = vadd.f32 %v4915_v6, %v5795_v55  ;;  %v1951_v2 = vpop.f32.mrb[73].mxu0 }
 0x57c   : > { %v1952_v18 = vadd.f32 %v5795_v55, %v1951_v2  ;;  %v4916_v10 = vpop.f32.mrb[74].mxu0 }
 0x57d   : > { %v1963_v7 = vadd.f32 %v4916_v10, %v5795_v55  ;;  %v1954_v21 = vpop.f32.mrb[75].mxu0  ;;  %v2056_v51 = vmax.f32 %v1960_v16, 0.0 }
 0x57e   : > { %v1955_v24 = vadd.f32 %v5795_v55, %v1954_v21  ;;  %v2054_v63 = vmax.f32 %v1952_v18, 0.0 }
 0x57f   : > { %v2057_v57 = vmax.f32 %v1963_v7, 0.0 }
 0x580   : > { %v2055_v26 = vmax.f32 %v1955_v24, 0.0 }
 0x581   : > { %v2083_v27 = vpack.c.bf16 %v2057_v57, %v2056_v51 }
 0x582   : > { %v2082_v30 = vpack.c.bf16 %v2055_v26, %v2054_v63 }
 0x584   : > { %4949 = vmatprep.mubr.msk.bf16.mxu0 %vm817_vm8, %v2082_v30 }
 0x585   : > { %4950 = vmatmul.mubr.msk.bf16.gmra.mrb[104].mxu0 %vm817_vm8, %v2083_v27 }
 0x58a   : > { %v4919_v31 = vpop.f32.mrb[76].mxu0 }
 0x58b   : > { %v1976_v33 = vadd.f32 %v4919_v31, %v5795_v55  ;;  %v1967_v17 = vpop.f32.mrb[77].mxu0 }
 0x58c   : > { %v1968_v22 = vadd.f32 %v5795_v55, %v1967_v17  ;;  %v4920_v25 = vpop.f32.mrb[78].mxu0 }
 0x58d   : > { %v1979_v34 = vadd.f32 %v4920_v25, %v5795_v55  ;;  %v1970_v36 = vpop.f32.mrb[79].mxu0  ;;  %v2060_v41 = vmax.f32 %v1976_v33, 0.0 }
 0x58e   : > { %v1971_v39 = vadd.f32 %v5795_v55, %v1970_v36  ;;  %v2058_v38 = vmax.f32 %v1968_v22, 0.0 }
 0x58f   : > { %v2061_v32 = vmax.f32 %v1979_v34, 0.0 }
 0x590   : > { %v2059_v0 = vmax.f32 %v1971_v39, 0.0  ;;  %v5848_v39 = vld [vmem:[%s6414_s5 + $0x1] ss:$0 sm:$0xff] }
 0x591   : > { %v2085_v44 = vpack.c.bf16 %v2061_v32, %v2060_v41 }
 0x592   : > { %v2084_v46 = vpack.c.bf16 %v2059_v0, %v2058_v38 }
 0x594   : > { %4953 = vmatprep.mubr.msk.bf16.mxu0 %vm817_vm8, %v2084_v46 }
 0x595   : > { %4954 = vmatmul.mubr.msk.bf16.gmra.mrb[108].mxu0 %vm817_vm8, %v2085_v44 }
 0x59a   : > { %v4923_v47 = vpop.f32.mrb[80].mxu0 }
 0x59b   : > { %v1992_v49 = vadd.f32 %v4923_v47, %v5795_v55  ;;  %v1983_v28 = vpop.f32.mrb[81].mxu0 }
 0x59c   : > { %v1984_v35 = vadd.f32 %v5795_v55, %v1983_v28  ;;  %v4924_v42 = vpop.f32.mrb[82].mxu0 }
 0x59d   : > { %v1995_v50 = vadd.f32 %v4924_v42, %v5795_v55  ;;  %v1986_v53 = vpop.f32.mrb[83].mxu0  ;;  %v2064_v58 = vmax.f32 %v1992_v49, 0.0 }
 0x59e   : > { %v1987_v56 = vadd.f32 %v5795_v55, %v1986_v53  ;;  %v2062_v59 = vmax.f32 %v1984_v35, 0.0 }
 0x59f   : > { %v2065_v8 = vmax.f32 %v1995_v50, 0.0 }
 0x5a0   : > { %v2063_v1 = vmax.f32 %v1987_v56, 0.0 }
 0x5a1   : > { %v2087_v3 = vpack.c.bf16 %v2065_v8, %v2064_v58 }
 0x5a2   : > { %v2086_v61 = vpack.c.bf16 %v2063_v1, %v2062_v59 }
 0x5a4   : > { %4957 = vmatprep.mubr.msk.bf16.mxu0 %vm817_vm8, %v2086_v61 }
 0x5a5   : > { %4958 = vmatmul.mubr.msk.bf16.gmra.mrb[112].mxu0 %vm817_vm8, %v2087_v3 }
 0x5aa   : > { %v4927_v5 = vpop.f32.mrb[84].mxu0 }
 0x5ab   : > { %v2008_v40 = vadd.f32 %v4927_v5, %v5795_v55  ;;  %v1999_v45 = vpop.f32.mrb[85].mxu0 }
 0x5ac   : > { %v2000_v52 = vadd.f32 %v5795_v55, %v1999_v45  ;;  %v4928_v20 = vpop.f32.mrb[86].mxu0 }
 0x5ad   : > { %v2011_v9 = vadd.f32 %v4928_v20, %v5795_v55  ;;  %v2002_v11 = vpop.f32.mrb[87].mxu0  ;;  %v2068_v13 = vmax.f32 %v2008_v40, 0.0 }
 0x5ae   : > { %v2003_v12 = vadd.f32 %v5795_v55, %v2002_v11  ;;  %v2066_v15 = vmax.f32 %v2000_v52, 0.0 }
 0x5af   : > { %v2069_v14 = vmax.f32 %v2011_v9, 0.0 }
 0x5b0   : > { %v2067_v19 = vmax.f32 %v2003_v12, 0.0 }
 0x5b1   : > { %v2089_v23 = vpack.c.bf16 %v2069_v14, %v2068_v13 }
 0x5b2   : > { %v2088_v54 = vpack.c.bf16 %v2067_v19, %v2066_v15 }
 0x5b4   : > { %4961 = vmatprep.mubr.msk.bf16.mxu0 %vm817_vm8, %v2088_v54 }
 0x5b5   : > { %4962 = vmatmul.mubr.msk.bf16.gmra.mrb[116].mxu0 %vm817_vm8, %v2089_v23 }
 0x5ba   : > { %v4931_v37 = vpop.f32.mrb[88].mxu0 }
 0x5bb   : > { %v2024_v43 = vadd.f32 %v4931_v37, %v5795_v55  ;;  %v2015_v48 = vpop.f32.mrb[89].mxu0 }
 0x5bc   : > { %v2016_v60 = vadd.f32 %v5795_v55, %v2015_v48  ;;  %v4932_v4 = vpop.f32.mrb[90].mxu0 }
 0x5bd   : > { %v2027_v29 = vadd.f32 %v4932_v4, %v5795_v55  ;;  %v2018_v62 = vpop.f32.mrb[91].mxu0  ;;  %v2072_v16 = vmax.f32 %v2024_v43, 0.0 }
 0x5be   : > { %v2019_v6 = vadd.f32 %v5795_v55, %v2018_v62  ;;  %v2070_v18 = vmax.f32 %v2016_v60, 0.0 }
 0x5bf   : > { %v2073_v2 = vmax.f32 %v2027_v29, 0.0 }
 0x5c0   : > { %v2071_v10 = vmax.f32 %v2019_v6, 0.0 }
 0x5c1   : > { %v2091_v7 = vpack.c.bf16 %v2073_v2, %v2072_v16 }
 0x5c2   : > { %v2090_v21 = vpack.c.bf16 %v2071_v10, %v2070_v18 }
 0x5c4   : > { %4965 = vmatprep.mubr.msk.bf16.mxu0 %vm817_vm8, %v2090_v21 }
 0x5c5   : > { %4966 = vmatmul.mubr.msk.bf16.gmra.mrb[120].mxu0 %vm817_vm8, %v2091_v7 }
 0x5ca   : > { %v4935_v24 = vpop.f32.mrb[92].mxu0 }
 0x5cb   : > { %v2040_v51 = vadd.f32 %v4935_v24, %v5795_v55  ;;  %v2031_v57 = vpop.f32.mrb[93].mxu0 }
 0x5cc   : > { %v2032_v63 = vadd.f32 %v5795_v55, %v2031_v57  ;;  %v4936_v26 = vpop.f32.mrb[94].mxu0 }
 0x5cd   : > { %v2043_v27 = vadd.f32 %v4936_v26, %v5795_v55  ;;  %v2034_v30 = vpop.f32.mrb[95].mxu0  ;;  %v2076_v33 = vmax.f32 %v2040_v51, 0.0 }
 0x5ce   : > { %v2035_v31 = vadd.f32 %v5795_v55, %v2034_v30  ;;  %v2074_v22 = vmax.f32 %v2032_v63, 0.0 }
 0x5cf   : > { %v2077_v17 = vmax.f32 %v2043_v27, 0.0 }
 0x5d0   : > { %v2075_v25 = vmax.f32 %v2035_v31, 0.0 }
 0x5d1   : > { %v2093_v34 = vpack.c.bf16 %v2077_v17, %v2076_v33 }
 0x5d2   : > { %v2092_v36 = vpack.c.bf16 %v2075_v25, %v2074_v22 }
 0x5d4   : > { %4969 = vmatprep.mubr.msk.bf16.mxu0 %vm817_vm8, %v2092_v36 }
 0x5d5   : > { %4970 = vmatmul.mubr.msk.bf16.gmra.mrb[124].mxu0 %vm817_vm8, %v2093_v34 }
 0x638   : > { %v4943_v41 = vpop.f32.mrb[96].mxu0 }
 0x639   : > { %v2210_v32 = vadd.f32 %v4943_v41, %v5848_v39  ;;  %v2201_v38 = vpop.f32.mrb[97].mxu0 }
 0x63a   : > { %v2202_v55 = vadd.f32 %v5848_v39, %v2201_v38  ;;  %v4944_v0 = vpop.f32.mrb[98].mxu0 }
 0x63b   : > { %v2330_v44 = vmax.f32 %v2210_v32, 0.0  ;;  %v2213_v46 = vadd.f32 %v4944_v0, %v5848_v39  ;;  %v2204_v47 = vpop.f32.mrb[99].mxu0 }
 0x63c   : > { %v2328_v49 = vmax.f32 %v2202_v55, 0.0  ;;  %v2205_v28 = vadd.f32 %v5848_v39, %v2204_v47 }
 0x63d   : > { %v5854_v35 = vmul.f32 0.999995, %v2330_v44  ;;  %v2331_v42 = vmax.f32 %v2213_v46, 0.0 }
 0x63e   : > { %v5856_v50 = vmul.f32 0.999995, %v2328_v49  ;;  %v2329_v53 = vmax.f32 %v2205_v28, 0.0 }
 0x63f   : > { %v5858_v56 = vmul.f32 0.999995, %v2331_v42  ;;  %v2417_v8 = vsel %vm817_vm8, %v5854_v35, 0.0 }
 0x640   : > { %v5860_v58 = vmul.f32 0.999995, %v2329_v53  ;;  %v2408_v3 = vsel %vm817_vm8, %v5856_v50, 0.0 }
 0x641   : > { %v2393_v59 = vpack.c.bf16 %v5858_v56, %v5854_v35  ;;  %v2418_v1 = vsel %vm817_vm8, %v5858_v56, 0.0 }
 0x642   : > { %v2419_v61 = vadd.f32 %v2418_v1, %v2417_v8  ;;  %v2392_v5 = vpack.c.bf16 %v5860_v58, %v5856_v50  ;;  %v2409_v40 = vsel %vm817_vm8, %v5860_v58, 0.0 }
 0x643   : > { %v2410_v45 = vadd.f32 %v2409_v40, %v2408_v3 }
 0x644   : > { %v2420_v52 = vrot.slane %v2419_v61, 4 }
 0x645   : > { %v2411_v20 = vrot.slane %v2410_v45, 4 }
 0x646   : > { %v2421_v9 = vadd.f32 %v2420_v52, %v2419_v61 }
 0x647   : > { %v2412_v11 = vadd.f32 %v2411_v20, %v2410_v45 }
 0x648   : > { %v2422_v12 = vrot.slane %v2421_v9, 2  ;;  %v4947_v13 = vpop.f32.mrb[100].mxu0 }
 0x649   : > { %v2413_v14 = vrot.slane %v2412_v11, 2  ;;  %v2226_v15 = vadd.f32 %v4947_v13, %v5848_v39  ;;  %v2217_v19 = vpop.f32.mrb[101].mxu0 }
 0x64a   : > { %v2423_v23 = vadd.f32 %v2422_v12, %v2421_v9  ;;  %v2218_v54 = vadd.f32 %v5848_v39, %v2217_v19  ;;  %v4948_v37 = vpop.f32.mrb[102].mxu0 }
 0x64b   : > { %v2414_v43 = vadd.f32 %v2413_v14, %v2412_v11  ;;  %v2334_v48 = vmax.f32 %v2226_v15, 0.0  ;;  %v2229_v60 = vadd.f32 %v4948_v37, %v5848_v39  ;;  %v2220_v4 = vpop.f32.mrb[103].mxu0 }
 0x64c   : > { %v2424_v29 = vrot.slane %v2423_v23, 1  ;;  %v2332_v62 = vmax.f32 %v2218_v54, 0.0  ;;  %v2221_v6 = vadd.f32 %v5848_v39, %v2220_v4 }
 0x64d   : > { %v2415_v16 = vrot.slane %v2414_v43, 1  ;;  %v5878_v2 = vmul.f32 0.999995, %v2334_v48  ;;  %v2335_v18 = vmax.f32 %v2229_v60, 0.0 }
 0x64e   : > { %v2425_v10 = vadd.f32 %v2424_v29, %v2423_v23  ;;  %v5880_v7 = vmul.f32 0.999995, %v2332_v62  ;;  %v2333_v21 = vmax.f32 %v2221_v6, 0.0 }
 0x64f   : > { %v2416_v24 = vadd.f32 %v2415_v16, %v2414_v43  ;;  %v5882_v51 = vmul.f32 0.999995, %v2335_v18  ;;  %v2435_v63 = vsel %vm817_vm8, %v5878_v2, 0.0 }
 0x650   : > { %v2553_v57 = vpack.c.bf16 %v2425_v10, %v2425_v10  ;;  %v5886_v26 = vmul.f32 0.999995, %v2333_v21  ;;  %v2426_v30 = vsel %vm817_vm8, %v5880_v7, 0.0 }
 0x651   : > { %v2552_v27 = vpack.c.bf16 %v2416_v24, %v2416_v24  ;;  %v2395_v31 = vpack.c.bf16 %v5882_v51, %v5878_v2  ;;  %v2436_v33 = vsel %vm817_vm8, %v5882_v51, 0.0 }
 0x652   : > { %v2585_v17 = vunpack.c.l.b16 %v2553_v57  ;;  %v2437_v22 = vadd.f32 %v2436_v33, %v2435_v63  ;;  %v2394_v25 = vpack.c.bf16 %v5886_v26, %v5880_v7  ;;  %v2427_v34 = vsel %vm817_vm8, %v5886_v26, 0.0 }
 0x653   : > { %v2584_v36 = vunpack.c.l.b16 %v2552_v27  ;;  %v2428_v41 = vadd.f32 %v2427_v34, %v2426_v30 }
 0x654   : > { %v2438_v32 = vrot.slane %v2437_v22, 4 }
 0x655   : > { %v2600_v38 = vsel %vm1579_vm9, %v2585_v17, %v2584_v36  ;;  %v2429_v55 = vrot.slane %v2428_v41, 4 }
 0x656   : > { %v2439_v0 = vadd.f32 %v2438_v32, %v2437_v22 }
 0x657   : > { %v2430_v44 = vadd.f32 %v2429_v55, %v2428_v41 }
 0x658   : > { %v2440_v46 = vrot.slane %v2439_v0, 2  ;;  %v4951_v47 = vpop.f32.mrb[104].mxu0 }
 0x659   : > { %v2431_v49 = vrot.slane %v2430_v44, 2  ;;  %v2242_v28 = vadd.f32 %v4951_v47, %v5848_v39  ;;  %v2233_v42 = vpop.f32.mrb[105].mxu0 }
 0x65a   : > { %v2441_v53 = vadd.f32 %v2440_v46, %v2439_v0  ;;  %v2234_v8 = vadd.f32 %v5848_v39, %v2233_v42  ;;  %v4952_v1 = vpop.f32.mrb[106].mxu0 }
 0x65b   : > { %v2432_v3 = vadd.f32 %v2431_v49, %v2430_v44  ;;  %v2338_v61 = vmax.f32 %v2242_v28, 0.0  ;;  %v2245_v40 = vadd.f32 %v4952_v1, %v5848_v39  ;;  %v2236_v45 = vpop.f32.mrb[107].mxu0 }
 0x65c   : > { %v2442_v52 = vrot.slane %v2441_v53, 1  ;;  %v2336_v20 = vmax.f32 %v2234_v8, 0.0  ;;  %v2237_v9 = vadd.f32 %v5848_v39, %v2236_v45 }
 0x65d   : > { %v2433_v11 = vrot.slane %v2432_v3, 1  ;;  %v5903_v12 = vmul.f32 0.999995, %v2338_v61  ;;  %v2339_v13 = vmax.f32 %v2245_v40, 0.0 }
 0x65e   : > { %v2443_v14 = vadd.f32 %v2442_v52, %v2441_v53  ;;  %v5905_v15 = vmul.f32 0.999995, %v2336_v20  ;;  %v2337_v19 = vmax.f32 %v2237_v9, 0.0 }
 0x65f   : > { %v2434_v23 = vadd.f32 %v2433_v11, %v2432_v3  ;;  %v5907_v54 = vmul.f32 0.999995, %v2339_v13  ;;  %v2453_v60 = vsel %vm817_vm8, %v5903_v12, 0.0 }
 0x660   : > { %v2555_v37 = vpack.c.bf16 %v2443_v14, %v2443_v14  ;;  %v5909_v43 = vmul.f32 0.999995, %v2337_v19  ;;  %v2444_v62 = vsel %vm817_vm8, %v5905_v15, 0.0 }
 0x661   : > { %v2554_v48 = vpack.c.bf16 %v2434_v23, %v2434_v23  ;;  %v2397_v4 = vpack.c.bf16 %v5907_v54, %v5903_v12  ;;  %v2454_v29 = vsel %vm817_vm8, %v5907_v54, 0.0 }
 0x662   : > { %v2455_v6 = vadd.f32 %v2454_v29, %v2453_v60  ;;  %v2396_v16 = vpack.c.bf16 %v5909_v43, %v5905_v15  ;;  %v2445_v18 = vsel %vm817_vm8, %v5909_v43, 0.0  ;;  %v2587_v24 = vunpack.c.l.b16 %v2555_v37 }
 0x663   : > { %v2586_v10 = vunpack.c.l.b16 %v2554_v48  ;;  %v2446_v21 = vadd.f32 %v2445_v18, %v2444_v62 }
 0x664   : > { %v2456_v57 = vrot.slane %v2455_v6, 4 }
 0x665   : > { %v2601_v63 = vsel %vm1581_vm10, %v2586_v10, %v2600_v38  ;;  %v2447_v27 = vrot.slane %v2446_v21, 4 }
 0x666   : > { %v2457_v30 = vadd.f32 %v2456_v57, %v2455_v6  ;;  %v2602_v33 = vsel %vm1583_vm11, %v2587_v24, %v2601_v63 }
 0x667   : > { %v2448_v17 = vadd.f32 %v2447_v27, %v2446_v21 }
 0x668   : > { %v2458_v22 = vrot.slane %v2457_v30, 2  ;;  %v4955_v34 = vpop.f32.mrb[108].mxu0 }
 0x669   : > { %v2449_v36 = vrot.slane %v2448_v17, 2  ;;  %v2258_v41 = vadd.f32 %v4955_v34, %v5848_v39  ;;  %v2249_v32 = vpop.f32.mrb[109].mxu0 }
 0x66a   : > { %v2459_v55 = vadd.f32 %v2458_v22, %v2457_v30  ;;  %v2250_v0 = vadd.f32 %v5848_v39, %v2249_v32  ;;  %v4956_v44 = vpop.f32.mrb[110].mxu0 }
 0x66b   : > { %v2450_v46 = vadd.f32 %v2449_v36, %v2448_v17  ;;  %v2342_v47 = vmax.f32 %v2258_v41, 0.0  ;;  %v2261_v49 = vadd.f32 %v4956_v44, %v5848_v39  ;;  %v2252_v38 = vpop.f32.mrb[111].mxu0 }
 0x66c   : > { %v2460_v28 = vrot.slane %v2459_v55, 1  ;;  %v2340_v42 = vmax.f32 %v2250_v0, 0.0  ;;  %v2253_v53 = vadd.f32 %v5848_v39, %v2252_v38 }
 0x66d   : > { %v2451_v8 = vrot.slane %v2450_v46, 1  ;;  %v5929_v1 = vmul.f32 0.999995, %v2342_v47  ;;  %v2343_v3 = vmax.f32 %v2261_v49, 0.0 }
 0x66e   : > { %v2461_v61 = vadd.f32 %v2460_v28, %v2459_v55  ;;  %v5931_v40 = vmul.f32 0.999995, %v2340_v42  ;;  %v2341_v45 = vmax.f32 %v2253_v53, 0.0 }
 0x66f   : > { %v2452_v52 = vadd.f32 %v2451_v8, %v2450_v46  ;;  %v5933_v20 = vmul.f32 0.999995, %v2343_v3  ;;  %v2471_v14 = vsel %vm817_vm8, %v5929_v1, 0.0 }
 0x670   : > { %v2557_v9 = vpack.c.bf16 %v2461_v61, %v2461_v61  ;;  %v5935_v11 = vmul.f32 0.999995, %v2341_v45  ;;  %v2462_v37 = vsel %vm817_vm8, %v5931_v40, 0.0 }
 0x671   : > { %v2556_v13 = vpack.c.bf16 %v2452_v52, %v2452_v52  ;;  %v2399_v19 = vpack.c.bf16 %v5933_v20, %v5929_v1  ;;  %v2472_v23 = vsel %vm817_vm8, %v5933_v20, 0.0 }
 0x672   : > { %v2473_v48 = vadd.f32 %v2472_v23, %v2471_v14  ;;  %v2398_v60 = vpack.c.bf16 %v5935_v11, %v5931_v40  ;;  %v2463_v29 = vsel %vm817_vm8, %v5935_v11, 0.0  ;;  %v2589_v18 = vunpack.c.l.b16 %v2557_v9  ;;  %v6016_v11 = vld [vmem:[#allocation2 + $0x8] sm:$0xff] }
 0x673   : > { %v2588_v62 = vunpack.c.l.b16 %v2556_v13  ;;  %v2464_v6 = vadd.f32 %v2463_v29, %v2462_v37 }
 0x674   : > { %v2474_v10 = vrot.slane %v2473_v48, 4 }
 0x675   : > { %v2465_v21 = vrot.slane %v2464_v6, 4  ;;  %v2603_v24 = vsel %vm1585_vm12, %v2588_v62, %v2602_v33 }
 0x676   : > { %v2475_v57 = vadd.f32 %v2474_v10, %v2473_v48  ;;  %v2604_v63 = vsel %vm1587_vm13, %v2589_v18, %v2603_v24 }
 0x677   : > { %v2466_v27 = vadd.f32 %v2465_v21, %v2464_v6 }
 0x678   : > { %v2476_v30 = vrot.slane %v2475_v57, 2  ;;  %v4959_v17 = vpop.f32.mrb[112].mxu0 }
 0x679   : > { %v2467_v22 = vrot.slane %v2466_v27, 2  ;;  %v2274_v34 = vadd.f32 %v4959_v17, %v5848_v39  ;;  %v2265_v36 = vpop.f32.mrb[113].mxu0 }
 0x67a   : > { %v2477_v41 = vadd.f32 %v2476_v30, %v2475_v57  ;;  %v2266_v32 = vadd.f32 %v5848_v39, %v2265_v36  ;;  %v4960_v55 = vpop.f32.mrb[114].mxu0 }
 0x67b   : > { %v2468_v0 = vadd.f32 %v2467_v22, %v2466_v27  ;;  %v2346_v44 = vmax.f32 %v2274_v34, 0.0  ;;  %v2277_v46 = vadd.f32 %v4960_v55, %v5848_v39  ;;  %v2268_v47 = vpop.f32.mrb[115].mxu0 }
 0x67c   : > { %v2478_v33 = vrot.slane %v2477_v41, 1  ;;  %v2344_v49 = vmax.f32 %v2266_v32, 0.0  ;;  %v2269_v38 = vadd.f32 %v5848_v39, %v2268_v47 }
 0x67d   : > { %v2469_v28 = vrot.slane %v2468_v0, 1  ;;  %v2378_v42 = vmul.f32 0.999995, %v2346_v44  ;;  %v2347_v53 = vmax.f32 %v2277_v46, 0.0 }
 0x67e   : > { %v2376_v8 = vmul.f32 0.999995, %v2344_v49  ;;  %v2345_v3 = vmax.f32 %v2269_v38, 0.0  ;;  %v2479_v61 = vadd.f32 %v2478_v33, %v2477_v41 }
 0x67f   : > { %v2470_v45 = vadd.f32 %v2469_v28, %v2468_v0  ;;  %v2379_v52 = vmul.f32 0.999995, %v2347_v53  ;;  %v2489_v23 = vsel %vm817_vm8, %v2378_v42, 0.0 }
 0x680   : > { %v2377_v9 = vmul.f32 0.999995, %v2345_v3  ;;  %v2559_v13 = vpack.c.bf16 %v2479_v61, %v2479_v61  ;;  %v2480_v29 = vsel %vm817_vm8, %v2376_v8, 0.0 }
 0x681   : > { %v2558_v14 = vpack.c.bf16 %v2470_v45, %v2470_v45  ;;  %v2401_v37 = vpack.c.bf16 %v2379_v52, %v2378_v42  ;;  %v2490_v48 = vsel %vm817_vm8, %v2379_v52, 0.0 }
 0x682   : > { %v2491_v62 = vadd.f32 %v2490_v48, %v2489_v23  ;;  %v2400_v6 = vpack.c.bf16 %v2377_v9, %v2376_v8  ;;  %v2481_v18 = vsel %vm817_vm8, %v2377_v9, 0.0  ;;  %v2591_v57 = vunpack.c.l.b16 %v2559_v13 }
 0x683   : > { %v2590_v10 = vunpack.c.l.b16 %v2558_v14  ;;  %v2482_v21 = vadd.f32 %v2481_v18, %v2480_v29 }
 0x684   : > { %v2492_v24 = vrot.slane %v2491_v62, 4  ;;  %4681 = vmatprep.subr.bf16.mxu1 %v2400_v6 }
 0x685   : > { %v2483_v27 = vrot.slane %v2482_v21, 4  ;;  %4682 = vmatpush3.bf16.msra.mxu1 %v2392_v5  ;;  %v2605_v30 = vsel %vm1589_vm14, %v2590_v10, %v2604_v63 }
 0x686   : > { %v2493_v17 = vadd.f32 %v2492_v24, %v2491_v62  ;;  %4683 = vmatprep.subr.bf16.mxu1 %v2401_v37  ;;  %v5964_v22 = vsel %vm1591_vm15, %v2591_v57, %v2605_v30 }
 0x687   : > { %v2484_v34 = vadd.f32 %v2483_v27, %v2482_v21 }
 0x688   : > { %v2494_v36 = vrot.slane %v2493_v17, 2  ;;  %v4963_v41 = vpop.f32.mrb[116].mxu0 }
 0x689   : > { %v2485_v32 = vrot.slane %v2484_v34, 2  ;;  %v2290_v55 = vadd.f32 %v4963_v41, %v5848_v39  ;;  %v2281_v0 = vpop.f32.mrb[117].mxu0  ;;  %4684 = vmatpush3.bf16.msra.mxu1 %v2393_v59 }
 0x68a   : > { %v2495_v50 = vadd.f32 %v2494_v36, %v2493_v17  ;;  %v2282_v58 = vadd.f32 %v5848_v39, %v2281_v0  ;;  %v4964_v5 = vpop.f32.mrb[118].mxu0 }
 0x68b   : > { %v2486_v63 = vadd.f32 %v2485_v32, %v2484_v34  ;;  %v2350_v44 = vmax.f32 %v2290_v55, 0.0  ;;  %v2293_v46 = vadd.f32 %v4964_v5, %v5848_v39  ;;  %v2284_v47 = vpop.f32.mrb[119].mxu0 }
 0x68c   : > { %v2496_v33 = vrot.slane %v2495_v50, 1  ;;  %v2348_v49 = vmax.f32 %v2282_v58, 0.0  ;;  %v2285_v38 = vadd.f32 %v5848_v39, %v2284_v47 }
 0x68d   : > { %v2487_v28 = vrot.slane %v2486_v63, 1  ;;  %v2382_v42 = vmul.f32 0.999995, %v2350_v44  ;;  %v2351_v53 = vmax.f32 %v2293_v46, 0.0 }
 0x68e   : > { %v2497_v8 = vadd.f32 %v2496_v33, %v2495_v50  ;;  %v2380_v3 = vmul.f32 0.999995, %v2348_v49  ;;  %v2349_v35 = vmax.f32 %v2285_v38, 0.0 }
 0x68f   : > { %v2488_v56 = vadd.f32 %v2487_v28, %v2486_v63  ;;  %v2383_v59 = vmul.f32 0.999995, %v2351_v53  ;;  %v2507_v45 = vsel %vm817_vm8, %v2382_v42, 0.0 }
 0x690   : > { %v2561_v61 = vpack.c.bf16 %v2497_v8, %v2497_v8  ;;  %v2381_v52 = vmul.f32 0.999995, %v2349_v35  ;;  %v2498_v13 = vsel %vm817_vm8, %v2380_v3, 0.0 }
 0x691   : > { %v2560_v9 = vpack.c.bf16 %v2488_v56, %v2488_v56  ;;  %v2403_v14 = vpack.c.bf16 %v2383_v59, %v2382_v42  ;;  %v2508_v23 = vsel %vm817_vm8, %v2383_v59, 0.0 }
 0x692   : > { %v2593_v37 = vunpack.c.l.b16 %v2561_v61  ;;  %v2509_v48 = vadd.f32 %v2508_v23, %v2507_v45  ;;  %v2402_v29 = vpack.c.bf16 %v2381_v52, %v2380_v3  ;;  %v2499_v62 = vsel %vm817_vm8, %v2381_v52, 0.0 }
 0x693   : > { %v2592_v6 = vunpack.c.l.b16 %v2560_v9  ;;  %v2500_v18 = vadd.f32 %v2499_v62, %v2498_v13 }
 0x694   : > { %v2510_v10 = vrot.slane %v2509_v48, 4  ;;  %4685 = vmatprep.subr.bf16.mxu1 %v2402_v29 }
 0x695   : > { %v2607_v21 = vsel %vm1579_vm9, %v2593_v37, %v2592_v6  ;;  %v2501_v24 = vrot.slane %v2500_v18, 4  ;;  %4686 = vmatpush3.bf16.msra.mxu1 %v2394_v25 }
 0x696   : > { %v2511_v57 = vadd.f32 %v2510_v10, %v2509_v48  ;;  %4687 = vmatprep.subr.bf16.mxu1 %v2403_v14 }
 0x697   : > { %v2502_v27 = vadd.f32 %v2501_v24, %v2500_v18 }
 0x698   : > { %v2512_v30 = vrot.slane %v2511_v57, 2  ;;  %v4967_v17 = vpop.f32.mrb[120].mxu0 }
 0x699   : > { %v2503_v34 = vrot.slane %v2502_v27, 2  ;;  %v2306_v36 = vadd.f32 %v4967_v17, %v5848_v39  ;;  %v2297_v41 = vpop.f32.mrb[121].mxu0  ;;  %4688 = vmatpush3.bf16.msra.mxu1 %v2395_v31 }
 0x69a   : > { %v2513_v32 = vadd.f32 %v2512_v30, %v2511_v57  ;;  %v2298_v55 = vadd.f32 %v5848_v39, %v2297_v41  ;;  %v4968_v0 = vpop.f32.mrb[122].mxu0 }
 0x69b   : > { %v2504_v50 = vadd.f32 %v2503_v34, %v2502_v27  ;;  %v2354_v7 = vmax.f32 %v2306_v36, 0.0  ;;  %v2309_v26 = vadd.f32 %v4968_v0, %v5848_v39  ;;  %v2300_v25 = vpop.f32.mrb[123].mxu0 }
 0x69c   : > { %v2514_v58 = vrot.slane %v2513_v32, 1  ;;  %v2352_v5 = vmax.f32 %v2298_v55, 0.0  ;;  %v2301_v63 = vadd.f32 %v5848_v39, %v2300_v25 }
 0x69d   : > { %v2505_v44 = vrot.slane %v2504_v50, 1  ;;  %v2386_v46 = vmul.f32 0.999995, %v2354_v7  ;;  %v2355_v47 = vmax.f32 %v2309_v26, 0.0 }
 0x69e   : > { %v2515_v33 = vadd.f32 %v2514_v58, %v2513_v32  ;;  %v2384_v49 = vmul.f32 0.999995, %v2352_v5  ;;  %v2353_v2 = vmax.f32 %v2301_v63, 0.0 }
 0x69f   : > { %v2506_v51 = vadd.f32 %v2505_v44, %v2504_v50  ;;  %v2387_v31 = vmul.f32 0.999995, %v2355_v47  ;;  %v2525_v53 = vsel %vm817_vm8, %v2386_v46, 0.0 }
 0x6a0   : > { %v2563_v38 = vpack.c.bf16 %v2515_v33, %v2515_v33  ;;  %v2385_v28 = vmul.f32 0.999995, %v2353_v2  ;;  %v2516_v35 = vsel %vm817_vm8, %v2384_v49, 0.0 }
 0x6a1   : > { %v2562_v42 = vpack.c.bf16 %v2506_v51, %v2506_v51  ;;  %v2405_v8 = vpack.c.bf16 %v2387_v31, %v2386_v46  ;;  %v2526_v3 = vsel %vm817_vm8, %v2387_v31, 0.0 }
 0x6a2   : > { %v2527_v56 = vadd.f32 %v2526_v3, %v2525_v53  ;;  %v2404_v59 = vpack.c.bf16 %v2385_v28, %v2384_v49  ;;  %v2517_v61 = vsel %vm817_vm8, %v2385_v28, 0.0  ;;  %v2595_v9 = vunpack.c.l.b16 %v2563_v38 }
 0x6a3   : > { %v2594_v45 = vunpack.c.l.b16 %v2562_v42  ;;  %v2518_v52 = vadd.f32 %v2517_v61, %v2516_v35  ;;  %v2620_v35 = vld [vmem:[#allocation2] sm:$0xff] }
 0x6a4   : > { %v2528_v13 = vrot.slane %v2527_v56, 4  ;;  %4689 = vmatprep.subr.bf16.mxu1 %v2404_v59 }
 0x6a5   : > { %v2608_v14 = vsel %vm1581_vm10, %v2594_v45, %v2607_v21  ;;  %v2519_v23 = vrot.slane %v2518_v52, 4  ;;  %4690 = vmatpush3.bf16.msra.mxu1 %v2396_v16 }
 0x6a6   : > { %v2529_v37 = vadd.f32 %v2528_v13, %v2527_v56  ;;  %4691 = vmatprep.subr.bf16.mxu1 %v2405_v8  ;;  %v2609_v48 = vsel %vm1583_vm11, %v2595_v9, %v2608_v14  ;;  %v2622_v14 = vld [vmem:[#allocation2 + $0x10] sm:$0xff] }
 0x6a7   : > { %v2520_v29 = vadd.f32 %v2519_v23, %v2518_v52 }
 0x6a8   : > { %v2530_v62 = vrot.slane %v2529_v37, 2  ;;  %v4971_v6 = vpop.f32.mrb[124].mxu0 }
 0x6a9   : > { %v2521_v18 = vrot.slane %v2520_v29, 2  ;;  %v2322_v10 = vadd.f32 %v4971_v6, %v5848_v39  ;;  %v2313_v24 = vpop.f32.mrb[125].mxu0  ;;  %4692 = vmatpush3.bf16.msra.mxu1 %v2397_v4  ;;  %v2632_v6 = vld [vmem:[#allocation2 + $0x60] sm:$0xff] }
 0x6aa   : > { %v2531_v21 = vadd.f32 %v2530_v62, %v2529_v37  ;;  %v2314_v57 = vadd.f32 %v5848_v39, %v2313_v24  ;;  %v4972_v15 = vpop.f32.mrb[126].mxu0  ;;  %v2624_v37 = vld [vmem:[#allocation2 + $0x20] sm:$0xff]  ;;  %v2630_v62 = vld [vmem:[#allocation2 + $0x50] sm:$0xff]  ;;  %v2641_v24 = vld [vmem:[#allocation2 + $0xa8] sm:$0xff] }
 0x6ab   : > { %v2522_v43 = vadd.f32 %v2521_v18, %v2520_v29  ;;  %v2358_v16 = vmax.f32 %v2322_v10, 0.0  ;;  %v2325_v27 = vadd.f32 %v4972_v15, %v5848_v39  ;;  %v2316_v30 = vpop.f32.mrb[127].mxu0  ;;  %v2628_v29 = vld [vmem:[#allocation2 + $0x40] sm:$0xff]  ;;  %v2634_v18 = vld [vmem:[#allocation2 + $0x70] sm:$0xff]  ;;  %v2639_v10 = vld [vmem:[#allocation2 + $0x98] sm:$0xff] }
 0x6ac   : > { %v2532_v17 = vrot.slane %v2531_v21, 1  ;;  %v2356_v34 = vmax.f32 %v2314_v57, 0.0  ;;  %v2317_v36 = vadd.f32 %v5848_v39, %v2316_v30  ;;  %v2645_v57 = vld [vmem:[#allocation2 + $0xc8] sm:$0xff]  ;;  %v5119_v15 = vld [vmem:[%s6411_s2 + $0x20] sm:$0xff]   ;;  %v2651_v30 = vld [vmem:[#allocation2 + $0xf8] sm:$0xff] }
 0x6ad   : > { %v2523_v41 = vrot.slane %v2522_v43, 1  ;;  %v2390_v32 = vmul.f32 0.999995, %v2358_v16  ;;  %v2359_v55 = vmax.f32 %v2325_v27, 0.0  ;;  %4973 = vmatprep.subr.bf16.mxu0 %v5119_v15  ;;  %v2647_v16 = vld [vmem:[#allocation2 + $0xd8] sm:$0xff]  ;;  %v2649_v27 = vld [vmem:[#allocation2 + $0xe8] sm:$0xff] }
 0x6ae   : > { %v2533_v0 = vadd.f32 %v2532_v17, %v2531_v21  ;;  %v2388_v50 = vmul.f32 0.999995, %v2356_v34  ;;  %v2357_v12 = vmax.f32 %v2317_v36, 0.0  ;;  %v2643_v21 = vld [vmem:[#allocation2 + $0xb8] sm:$0xff]  ;;  %4974 = vmatpush3.bf16.msra.mxu0 %v5119_v15 }
 0x6af   : > { %v2524_v54 = vadd.f32 %v2523_v41, %v2522_v43  ;;  %v2391_v4 = vmul.f32 0.999995, %v2359_v55  ;;  %v2543_v58 = vsel %vm817_vm8, %v2390_v32, 0.0  ;;  %v5120_v43 = vld [vmem:[%s6411_s2 + $0x28] sm:$0xff]  }
 0x6b0   : > { %v2565_v7 = vpack.c.bf16 %v2533_v0, %v2533_v0  ;;  %v2389_v26 = vmul.f32 0.999995, %v2357_v12  ;;  %v2534_v44 = vsel %vm817_vm8, %v2388_v50, 0.0  ;;  %4975 = vmatprep.subr.bf16.mxu0 %v5120_v43 }
 0x6b1   : > { %v2564_v25 = vpack.c.bf16 %v2524_v54, %v2524_v54  ;;  %v2407_v5 = vpack.c.bf16 %v2391_v4, %v2390_v32  ;;  %v2544_v63 = vsel %vm817_vm8, %v2391_v4, 0.0 }
 0x6b2   : > { %v2545_v46 = vadd.f32 %v2544_v63, %v2543_v58  ;;  %v2406_v39 = vpack.c.bf16 %v2389_v26, %v2388_v50  ;;  %v2535_v47 = vsel %vm817_vm8, %v2389_v26, 0.0  ;;  %v2597_v2 = vunpack.c.l.b16 %v2565_v7  ;;  %4976 = vmatpush3.bf16.msra.mxu0 %v5120_v43 }
 0x6b3   : > { %v2596_v33 = vunpack.c.l.b16 %v2564_v25  ;;  %v2536_v49 = vadd.f32 %v2535_v47, %v2534_v44 }
 0x6b4   : > { %v2546_v51 = vrot.slane %v2545_v46, 4  ;;  %4693 = vmatprep.subr.bf16.mxu1 %v2406_v39 }
 0x6b5   : > { %v2537_v31 = vrot.slane %v2536_v49, 4  ;;  %4694 = vmatpush3.bf16.msra.mxu1 %v2398_v60  ;;  %v2610_v38 = vsel %vm1585_vm12, %v2596_v33, %v2609_v48  ;;  %v2626_v48 = vld [vmem:[#allocation2 + $0x30] sm:$0xff] }
 0x6b6   : > { %v2547_v28 = vadd.f32 %v2546_v51, %v2545_v46  ;;  %4695 = vmatprep.subr.bf16.mxu1 %v2407_v5  ;;  %v2611_v42 = vsel %vm1587_vm13, %v2597_v2, %v2610_v38 }
 0x6b7   : > { %v2538_v53 = vadd.f32 %v2537_v31, %v2536_v49 }
 0x6b8   : > { %v2548_v8 = vrot.slane %v2547_v28, 2 }
 0x6b9   : > { %v2539_v3 = vrot.slane %v2538_v53, 2  ;;  %4696 = vmatpush3.bf16.msra.mxu1 %v2399_v19 }
 0x6ba   : > { %v2549_v56 = vadd.f32 %v2548_v8, %v2547_v28 }
 0x6bb   : > { %v2540_v59 = vadd.f32 %v2539_v3, %v2538_v53 }
 0x6bc   : > { %v2550_v61 = vrot.slane %v2549_v56, 1  ;;  %2685 = vmatmul.mubr.bf16.vlgmr.msra.gmra.mrb[128].mxu1 %v2620_v35 }
 0x6bd   : > { %v2541_v40 = vrot.slane %v2540_v59, 1  ;;  %2692 = vmatprep.mubr.bf16.mxu1 %v6016_v11 }
 0x6be   : > { %v2551_v60 = vadd.f32 %v2550_v61, %v2549_v56 }
 0x6bf   : > { %v2542_v45 = vadd.f32 %v2541_v40, %v2540_v59 }
 0x6c0   : > { %v2567_v52 = vpack.c.bf16 %v2551_v60, %v2551_v60 }
 0x6c1   : > { %v2566_v9 = vpack.c.bf16 %v2542_v45, %v2542_v45 }
 0x6c2   : > { %v2599_v23 = vunpack.c.l.b16 %v2567_v52 }
 0x6c3   : > { %v2598_v13 = vunpack.c.l.b16 %v2566_v9 }
 0x6c4   : > { %2693 = vmatmul.mubr.bf16.gmra.mrb[132].mxu1 %v2622_v14 }
 0x6c5   : > { %v2612_v1 = vsel %vm1589_vm14, %v2598_v13, %v2611_v42  ;;  %2700 = vmatprep.mubr.bf16.mxu1 %v6016_v11 }
 0x6c6   : > { %v2613_v20 = vsel %vm1591_vm15, %v2599_v23, %v2612_v1 }
 0x6c7   : > { %v2614_v19 = vpack.c.b16 %v2613_v20, %v5964_v22  ;;  %v2637_v22 = vld [vmem:[#allocation2 + $0x88] sm:$0xff] }
 0x6c9   : > { %2615 = vrot.lane.b32.xlu0 %v2614_v19, %s5265_s22  ;;  %s5046_s22 = smul.u32 1536, %s5333_s28  ;;  %s6367_s28 = scalar_lea.sflag [#allocation5], %s290_s16 }
 0x6cb   : > { %s6361_s23 = scalar_lea.hbm %s6416_s7, %s5046_s22 }
 0x6cc   : > { %2701 = vmatmul.mubr.bf16.gmra.mrb[136].mxu1 %v2624_v37 }
 0x6cd   : > { %2708 = vmatprep.mubr.bf16.mxu1 %v6016_v11 }
 0x6d4   : > { %2709 = vmatmul.mubr.bf16.gmra.mrb[140].mxu1 %v2626_v48 }
 0x6d5   : > { %2716 = vmatprep.mubr.bf16.mxu1 %v6016_v11 }
 0x6dc   : > { %2717 = vmatmul.mubr.bf16.gmra.mrb[144].mxu1 %v2628_v29 }
 0x6dd   : > { %2724 = vmatprep.mubr.bf16.mxu1 %v6016_v11 }
 0x6e4   : > { %2725 = vmatmul.mubr.bf16.gmra.mrb[148].mxu1 %v2630_v62 }
 0x6e5   : > { %2732 = vmatprep.mubr.bf16.mxu1 %v6016_v11 }
 0x6ec   : > { %2733 = vmatmul.mubr.bf16.gmra.mrb[152].mxu1 %v2632_v6 }
 0x6ed   : > { %2740 = vmatprep.mubr.bf16.mxu1 %v6016_v11 }
 0x6f4   : > { %2741 = vmatmul.mubr.bf16.gmra.mrb[156].mxu1 %v2634_v18 }
 0x6f5   : > { %2748 = vmatprep.mubr.bf16.mxu1 %v2637_v22 }
 0x6fc   : > { %2749 = vmatmul.mubr.bf16.gmra.mrb[160].mxu1 %v6016_v11 }
 0x6fd   : > { %2756 = vmatprep.mubr.bf16.mxu1 %v2639_v10 }
 0x704   : > { %2757 = vmatmul.mubr.bf16.gmra.mrb[164].mxu1 %v6016_v11 }
 0x705   : > { %2764 = vmatprep.mubr.bf16.mxu1 %v2641_v24 }
 0x70c   : > { %2765 = vmatmul.mubr.bf16.gmra.mrb[168].mxu1 %v6016_v11 }
 0x70d   : > { %2772 = vmatprep.mubr.bf16.mxu1 %v2643_v21 }
 0x714   : > { %2773 = vmatmul.mubr.bf16.gmra.mrb[172].mxu1 %v6016_v11 }
 0x715   : > { %2780 = vmatprep.mubr.bf16.mxu1 %v2645_v57 }
 0x71c   : > { %2781 = vmatmul.mubr.bf16.gmra.mrb[176].mxu1 %v6016_v11 }
 0x71d   : > { %2788 = vmatprep.mubr.bf16.mxu1 %v2647_v16 }
 0x724   : > { %2789 = vmatmul.mubr.bf16.gmra.mrb[180].mxu1 %v6016_v11 }
 0x725   : > { %2796 = vmatprep.mubr.bf16.mxu1 %v2649_v27 }
 0x72c   : > { %2797 = vmatmul.mubr.bf16.gmra.mrb[184].mxu1 %v6016_v11 }
 0x72d   : > { %2804 = vmatprep.mubr.bf16.mxu1 %v2651_v30 }
 0x734   : > { %2805 = vmatmul.mubr.bf16.gmra.mrb[188].mxu1 %v6016_v11 }
 0x735   : > { %3942 = vmatprep.mubr.bf16.mxu1 %v6016_v11 }
 0x73b   : > { %v2616_v17 = vpop.permute.xlu0 %2615 }
 0x73c   : > { %2619 = vst.msk [vmem:[#allocation3] sm:$0xff] %vm2618_vm0, %v2616_v17 }
 0x78f   : > { %v4697_v34 = vpop.f32.mrb[128].mxu1 }
 0x790   : > { %v4698_v36 = vpop.f32.mrb[129].mxu1 }
 0x791   : > { %v4699_v41 = vadd.f32 %v4698_v36, %v4697_v34  ;;  %v4700_v32 = vpop.f32.mrb[130].mxu1 }
 0x792   : > { %v4701_v55 = vpop.f32.mrb[131].mxu1 }
 0x793   : > { %v4702_v0 = vadd.f32 %v4701_v55, %v4700_v32 }
 0x795   : > { %v2813_v50 = vpack.c.bf16 %v4702_v0, %v4699_v41 }
 0x797   : > { %v4703_v12 = vpop.f32.mrb[132].mxu1  ;;  %4977 = vmatprep.mubr.msk.bf16.mxu0 %vm817_vm8, %v2813_v50 }
 0x798   : > { %v4704_v54 = vpop.f32.mrb[133].mxu1 }
 0x799   : > { %v4705_v4 = vadd.f32 %v4704_v54, %v4703_v12  ;;  %v4706_v7 = vpop.f32.mrb[134].mxu1 }
 0x79a   : > { %v4707_v26 = vpop.f32.mrb[135].mxu1 }
 0x79b   : > { %v4708_v25 = vadd.f32 %v4707_v26, %v4706_v7 }
 0x79d   : > { %v2814_v58 = vpack.c.bf16 %v4708_v25, %v4705_v4 }
 0x79f   : > { %v4709_v5 = vpop.f32.mrb[136].mxu1  ;;  %4978 = vmatmul.mubr.msk.bf16.vlgmr.msra.gmra.mrb[128].mxu0 %vm817_vm8, %v2814_v58 }
 0x7a0   : > { %v4710_v63 = vpop.f32.mrb[137].mxu1 }
 0x7a1   : > { %v4711_v44 = vadd.f32 %v4710_v63, %v4709_v5  ;;  %v4712_v46 = vpop.f32.mrb[138].mxu1 }
 0x7a2   : > { %v4713_v39 = vpop.f32.mrb[139].mxu1 }
 0x7a3   : > { %v4714_v47 = vadd.f32 %v4713_v39, %v4712_v46 }
 0x7a5   : > { %v2815_v33 = vpack.c.bf16 %v4714_v47, %v4711_v44 }
 0x7a7   : > { %v4715_v49 = vpop.f32.mrb[140].mxu1  ;;  %4981 = vmatprep.mubr.msk.bf16.mxu0 %vm817_vm8, %v2815_v33 }
 0x7a8   : > { %v4716_v2 = vpop.f32.mrb[141].mxu1 }
 0x7a9   : > { %v4717_v51 = vadd.f32 %v4716_v2, %v4715_v49  ;;  %v4718_v31 = vpop.f32.mrb[142].mxu1 }
 0x7aa   : > { %v4719_v38 = vpop.f32.mrb[143].mxu1 }
 0x7ab   : > { %v4720_v28 = vadd.f32 %v4719_v38, %v4718_v31 }
 0x7ad   : > { %v2816_v42 = vpack.c.bf16 %v4720_v28, %v4717_v51 }
 0x7af   : > { %v4721_v53 = vpop.f32.mrb[144].mxu1  ;;  %4982 = vmatmul.mubr.msk.bf16.gmra.mrb[132].mxu0 %vm817_vm8, %v2816_v42  ;;  %v5121_v42 = vld [vmem:[%s6413_s4 + $0x20] sm:$0xff]  }
 0x7b0   : > { %v4722_v8 = vpop.f32.mrb[145].mxu1  ;;  %5009 = vmatprep.subr.bf16.mxu0 %v5121_v42 }
 0x7b1   : > { %v4723_v3 = vadd.f32 %v4722_v8, %v4721_v53  ;;  %v4724_v35 = vpop.f32.mrb[146].mxu1  ;;  %5010 = vmatpush3.bf16.msra.mxu0 %v5121_v42 }
 0x7b2   : > { %v4725_v56 = vpop.f32.mrb[147].mxu1 }
 0x7b3   : > { %v4726_v59 = vadd.f32 %v4725_v56, %v4724_v35 }
 0x7b5   : > { %v2817_v61 = vpack.c.bf16 %v4726_v59, %v4723_v3  ;;  %v5122_v3 = vld [vmem:[%s6413_s4 + $0x28] sm:$0xff]  }
 0x7b6   : > { %5011 = vmatprep.subr.bf16.mxu0 %v5122_v3 }
 0x7b7   : > { %v4727_v40 = vpop.f32.mrb[148].mxu1  ;;  %4985 = vmatprep.mubr.msk.bf16.mxu0 %vm817_vm8, %v2817_v61  ;;  %5012 = vmatpush3.bf16.msra.mxu0 %v5122_v3 }
 0x7b8   : > { %v4728_v60 = vpop.f32.mrb[149].mxu1 }
 0x7b9   : > { %v4729_v45 = vadd.f32 %v4728_v60, %v4727_v40  ;;  %v4730_v52 = vpop.f32.mrb[150].mxu1 }
 0x7ba   : > { %v4731_v9 = vpop.f32.mrb[151].mxu1 }
 0x7bb   : > { %v4732_v13 = vadd.f32 %v4731_v9, %v4730_v52 }
 0x7bd   : > { %v2818_v14 = vpack.c.bf16 %v4732_v13, %v4729_v45 }
 0x7bf   : > { %v4733_v23 = vpop.f32.mrb[152].mxu1  ;;  %4986 = vmatmul.mubr.msk.bf16.gmra.mrb[136].mxu0 %vm817_vm8, %v2818_v14 }
 0x7c0   : > { %v4734_v1 = vpop.f32.mrb[153].mxu1 }
 0x7c1   : > { %v4735_v20 = vadd.f32 %v4734_v1, %v4733_v23  ;;  %v4736_v19 = vpop.f32.mrb[154].mxu1 }
 0x7c2   : > { %v4737_v37 = vpop.f32.mrb[155].mxu1 }
 0x7c3   : > { %v4738_v48 = vadd.f32 %v4737_v37, %v4736_v19 }
 0x7c5   : > { %v2819_v29 = vpack.c.bf16 %v4738_v48, %v4735_v20 }
 0x7c7   : > { %v4739_v62 = vpop.f32.mrb[156].mxu1  ;;  %4989 = vmatprep.mubr.msk.bf16.mxu0 %vm817_vm8, %v2819_v29 }
 0x7c8   : > { %v4740_v6 = vpop.f32.mrb[157].mxu1 }
 0x7c9   : > { %v4741_v22 = vadd.f32 %v4740_v6, %v4739_v62  ;;  %v4742_v18 = vpop.f32.mrb[158].mxu1 }
 0x7ca   : > { %v4743_v10 = vpop.f32.mrb[159].mxu1 }
 0x7cb   : > { %v4744_v24 = vadd.f32 %v4743_v10, %v4742_v18 }
 0x7cd   : > { %v2820_v21 = vpack.c.bf16 %v4744_v24, %v4741_v22  ;;  %v6069_v22 = vld [vmem:[%s6412_s3 + $0x2] ss:$0 sm:$0xff] }
 0x7cf   : > { %4990 = vmatmul.mubr.msk.bf16.gmra.mrb[140].mxu0 %vm817_vm8, %v2820_v21  ;;  %v4745_v57 = vpop.f32.mrb[160].mxu1 }
 0x7d0   : > { %v4746_v15 = vpop.f32.mrb[161].mxu1 }
 0x7d1   : > { %v4747_v43 = vadd.f32 %v4746_v15, %v4745_v57  ;;  %v4748_v16 = vpop.f32.mrb[162].mxu1 }
 0x7d2   : > { %v4749_v27 = vpop.f32.mrb[163].mxu1 }
 0x7d3   : > { %v4750_v30 = vadd.f32 %v4749_v27, %v4748_v16 }
 0x7d5   : > { %v2821_v17 = vpack.c.bf16 %v4750_v30, %v4747_v43 }
 0x7d7   : > { %v4751_v34 = vpop.f32.mrb[164].mxu1  ;;  %4993 = vmatprep.mubr.msk.bf16.mxu0 %vm817_vm8, %v2821_v17 }
 0x7d8   : > { %v4752_v36 = vpop.f32.mrb[165].mxu1 }
 0x7d9   : > { %v4753_v41 = vadd.f32 %v4752_v36, %v4751_v34  ;;  %v4754_v32 = vpop.f32.mrb[166].mxu1 }
 0x7da   : > { %v4755_v55 = vpop.f32.mrb[167].mxu1 }
 0x7db   : > { %v4756_v0 = vadd.f32 %v4755_v55, %v4754_v32 }
 0x7dd   : > { %v2822_v50 = vpack.c.bf16 %v4756_v0, %v4753_v41 }
 0x7df   : > { %v4757_v12 = vpop.f32.mrb[168].mxu1  ;;  %4994 = vmatmul.mubr.msk.bf16.gmra.mrb[144].mxu0 %vm817_vm8, %v2822_v50 }
 0x7e0   : > { %v4758_v54 = vpop.f32.mrb[169].mxu1 }
 0x7e1   : > { %v4759_v4 = vadd.f32 %v4758_v54, %v4757_v12  ;;  %v4760_v7 = vpop.f32.mrb[170].mxu1 }
 0x7e2   : > { %v4761_v26 = vpop.f32.mrb[171].mxu1 }
 0x7e3   : > { %v4762_v25 = vadd.f32 %v4761_v26, %v4760_v7 }
 0x7e5   : > { %v2823_v58 = vpack.c.bf16 %v4762_v25, %v4759_v4 }
 0x7e7   : > { %v4763_v5 = vpop.f32.mrb[172].mxu1  ;;  %4997 = vmatprep.mubr.msk.bf16.mxu0 %vm817_vm8, %v2823_v58 }
 0x7e8   : > { %v4764_v63 = vpop.f32.mrb[173].mxu1 }
 0x7e9   : > { %v4765_v44 = vadd.f32 %v4764_v63, %v4763_v5  ;;  %v4766_v46 = vpop.f32.mrb[174].mxu1 }
 0x7ea   : > { %v4767_v39 = vpop.f32.mrb[175].mxu1 }
 0x7eb   : > { %v4768_v47 = vadd.f32 %v4767_v39, %v4766_v46 }
 0x7ed   : > { %v2824_v33 = vpack.c.bf16 %v4768_v47, %v4765_v44 }
 0x7ef   : > { %v4769_v49 = vpop.f32.mrb[176].mxu1  ;;  %4998 = vmatmul.mubr.msk.bf16.gmra.mrb[148].mxu0 %vm817_vm8, %v2824_v33 }
 0x7f0   : > { %v4770_v2 = vpop.f32.mrb[177].mxu1 }
 0x7f1   : > { %v4771_v51 = vadd.f32 %v4770_v2, %v4769_v49  ;;  %v4772_v31 = vpop.f32.mrb[178].mxu1 }
 0x7f2   : > { %v4773_v38 = vpop.f32.mrb[179].mxu1 }
 0x7f3   : > { %v4774_v28 = vadd.f32 %v4773_v38, %v4772_v31 }
 0x7f5   : > { %v2825_v53 = vpack.c.bf16 %v4774_v28, %v4771_v51 }
 0x7f7   : > { %v4775_v8 = vpop.f32.mrb[180].mxu1  ;;  %5001 = vmatprep.mubr.msk.bf16.mxu0 %vm817_vm8, %v2825_v53 }
 0x7f8   : > { %v4776_v35 = vpop.f32.mrb[181].mxu1 }
 0x7f9   : > { %v4777_v56 = vadd.f32 %v4776_v35, %v4775_v8  ;;  %v4778_v59 = vpop.f32.mrb[182].mxu1 }
 0x7fa   : > { %v4779_v61 = vpop.f32.mrb[183].mxu1 }
 0x7fb   : > { %v4780_v40 = vadd.f32 %v4779_v61, %v4778_v59 }
 0x7fd   : > { %v2826_v60 = vpack.c.bf16 %v4780_v40, %v4777_v56 }
 0x7ff   : > { %v4781_v45 = vpop.f32.mrb[184].mxu1  ;;  %5002 = vmatmul.mubr.msk.bf16.gmra.mrb[152].mxu0 %vm817_vm8, %v2826_v60 }
 0x800   : > { %v4782_v52 = vpop.f32.mrb[185].mxu1 }
 0x801   : > { %v4783_v9 = vadd.f32 %v4782_v52, %v4781_v45  ;;  %v4784_v13 = vpop.f32.mrb[186].mxu1 }
 0x802   : > { %v4785_v14 = vpop.f32.mrb[187].mxu1 }
 0x803   : > { %v4786_v23 = vadd.f32 %v4785_v14, %v4784_v13 }
 0x805   : > { %v2827_v1 = vpack.c.bf16 %v4786_v23, %v4783_v9 }
 0x807   : > { %v4787_v20 = vpop.f32.mrb[188].mxu1  ;;  %5005 = vmatprep.mubr.msk.bf16.mxu0 %vm817_vm8, %v2827_v1 }
 0x808   : > { %v4788_v19 = vpop.f32.mrb[189].mxu1 }
 0x809   : > { %v4789_v37 = vadd.f32 %v4788_v19, %v4787_v20  ;;  %v4790_v48 = vpop.f32.mrb[190].mxu1 }
 0x80a   : > { %v4791_v29 = vpop.f32.mrb[191].mxu1 }
 0x80b   : > { %v4792_v62 = vadd.f32 %v4791_v29, %v4790_v48 }
 0x80d   : > { %v2828_v6 = vpack.c.bf16 %v4792_v62, %v4789_v37 }
 0x80f   : > { %5006 = vmatmul.mubr.msk.bf16.gmra.mrb[156].mxu0 %vm817_vm8, %v2828_v6 }
 0x872   : > { %v4979_v18 = vpop.f32.mrb[128].mxu0 }
 0x873   : > { %v2945_v10 = vadd.f32 %v4979_v18, %v6069_v22  ;;  %v2936_v24 = vpop.f32.mrb[129].mxu0 }
 0x874   : > { %v2937_v21 = vadd.f32 %v6069_v22, %v2936_v24  ;;  %v4980_v57 = vpop.f32.mrb[130].mxu0 }
 0x875   : > { %v2948_v15 = vadd.f32 %v4980_v57, %v6069_v22  ;;  %v2939_v43 = vpop.f32.mrb[131].mxu0  ;;  %v3065_v27 = vmax.f32 %v2945_v10, 0.0 }
 0x876   : > { %v2940_v16 = vadd.f32 %v6069_v22, %v2939_v43  ;;  %v3063_v17 = vmax.f32 %v2937_v21, 0.0 }
 0x877   : > { %v3066_v30 = vmax.f32 %v2948_v15, 0.0 }
 0x878   : > { %v3064_v34 = vmax.f32 %v2940_v16, 0.0 }
 0x879   : > { %v3096_v36 = vpack.c.bf16 %v3066_v30, %v3065_v27 }
 0x87a   : > { %v3095_v41 = vpack.c.bf16 %v3064_v34, %v3063_v17 }
 0x87c   : > { %5013 = vmatprep.mubr.msk.bf16.mxu0 %vm817_vm8, %v3095_v41 }
 0x87d   : > { %5014 = vmatmul.mubr.msk.bf16.vlgmr.msra.gmra.mrb[160].mxu0 %vm817_vm8, %v3096_v36 }
 0x882   : > { %v4983_v32 = vpop.f32.mrb[132].mxu0 }
 0x883   : > { %v2961_v55 = vadd.f32 %v4983_v32, %v6069_v22  ;;  %v2952_v0 = vpop.f32.mrb[133].mxu0 }
 0x884   : > { %v2953_v50 = vadd.f32 %v6069_v22, %v2952_v0  ;;  %v4984_v12 = vpop.f32.mrb[134].mxu0 }
 0x885   : > { %v2964_v54 = vadd.f32 %v4984_v12, %v6069_v22  ;;  %v2955_v4 = vpop.f32.mrb[135].mxu0  ;;  %v3069_v26 = vmax.f32 %v2961_v55, 0.0 }
 0x886   : > { %v2956_v7 = vadd.f32 %v6069_v22, %v2955_v4  ;;  %v3067_v58 = vmax.f32 %v2953_v50, 0.0 }
 0x887   : > { %v3070_v25 = vmax.f32 %v2964_v54, 0.0 }
 0x888   : > { %v3068_v5 = vmax.f32 %v2956_v7, 0.0 }
 0x889   : > { %v3098_v63 = vpack.c.bf16 %v3070_v25, %v3069_v26 }
 0x88a   : > { %v3097_v44 = vpack.c.bf16 %v3068_v5, %v3067_v58 }
 0x88c   : > { %5017 = vmatprep.mubr.msk.bf16.mxu0 %vm817_vm8, %v3097_v44 }
 0x88d   : > { %5018 = vmatmul.mubr.msk.bf16.gmra.mrb[164].mxu0 %vm817_vm8, %v3098_v63 }
 0x892   : > { %v4987_v46 = vpop.f32.mrb[136].mxu0 }
 0x893   : > { %v2977_v39 = vadd.f32 %v4987_v46, %v6069_v22  ;;  %v2968_v47 = vpop.f32.mrb[137].mxu0 }
 0x894   : > { %v2969_v33 = vadd.f32 %v6069_v22, %v2968_v47  ;;  %v4988_v49 = vpop.f32.mrb[138].mxu0 }
 0x895   : > { %v2980_v2 = vadd.f32 %v4988_v49, %v6069_v22  ;;  %v2971_v51 = vpop.f32.mrb[139].mxu0  ;;  %v3073_v38 = vmax.f32 %v2977_v39, 0.0 }
 0x896   : > { %v2972_v31 = vadd.f32 %v6069_v22, %v2971_v51  ;;  %v3071_v42 = vmax.f32 %v2969_v33, 0.0 }
 0x897   : > { %v3074_v28 = vmax.f32 %v2980_v2, 0.0 }
 0x898   : > { %v3072_v53 = vmax.f32 %v2972_v31, 0.0 }
 0x899   : > { %v3100_v8 = vpack.c.bf16 %v3074_v28, %v3073_v38 }
 0x89a   : > { %v3099_v3 = vpack.c.bf16 %v3072_v53, %v3071_v42 }
 0x89c   : > { %5021 = vmatprep.mubr.msk.bf16.mxu0 %vm817_vm8, %v3099_v3 }
 0x89d   : > { %5022 = vmatmul.mubr.msk.bf16.gmra.mrb[168].mxu0 %vm817_vm8, %v3100_v8 }
 0x8a2   : > { %v4991_v35 = vpop.f32.mrb[140].mxu0 }
 0x8a3   : > { %v2993_v56 = vadd.f32 %v4991_v35, %v6069_v22  ;;  %v2984_v59 = vpop.f32.mrb[141].mxu0 }
 0x8a4   : > { %v2985_v61 = vadd.f32 %v6069_v22, %v2984_v59  ;;  %v4992_v40 = vpop.f32.mrb[142].mxu0 }
 0x8a5   : > { %v2996_v60 = vadd.f32 %v4992_v40, %v6069_v22  ;;  %v2987_v45 = vpop.f32.mrb[143].mxu0  ;;  %v3077_v9 = vmax.f32 %v2993_v56, 0.0 }
 0x8a6   : > { %v2988_v52 = vadd.f32 %v6069_v22, %v2987_v45  ;;  %v3075_v14 = vmax.f32 %v2985_v61, 0.0 }
 0x8a7   : > { %v3078_v13 = vmax.f32 %v2996_v60, 0.0 }
 0x8a8   : > { %v3076_v23 = vmax.f32 %v2988_v52, 0.0 }
 0x8a9   : > { %v3102_v1 = vpack.c.bf16 %v3078_v13, %v3077_v9  ;;  %v6123_v9 = vld [vmem:[%s6414_s5 + $0x2] ss:$0 sm:$0xff] }
 0x8aa   : > { %v3101_v20 = vpack.c.bf16 %v3076_v23, %v3075_v14 }
 0x8ac   : > { %5025 = vmatprep.mubr.msk.bf16.mxu0 %vm817_vm8, %v3101_v20 }
 0x8ad   : > { %5026 = vmatmul.mubr.msk.bf16.gmra.mrb[172].mxu0 %vm817_vm8, %v3102_v1 }
 0x8b2   : > { %v4995_v19 = vpop.f32.mrb[144].mxu0 }
 0x8b3   : > { %v3009_v37 = vadd.f32 %v4995_v19, %v6069_v22  ;;  %v3000_v48 = vpop.f32.mrb[145].mxu0 }
 0x8b4   : > { %v3001_v29 = vadd.f32 %v6069_v22, %v3000_v48  ;;  %v4996_v62 = vpop.f32.mrb[146].mxu0 }
 0x8b5   : > { %v3012_v6 = vadd.f32 %v4996_v62, %v6069_v22  ;;  %v3003_v18 = vpop.f32.mrb[147].mxu0  ;;  %v3081_v24 = vmax.f32 %v3009_v37, 0.0 }
 0x8b6   : > { %v3004_v10 = vadd.f32 %v6069_v22, %v3003_v18  ;;  %v3079_v57 = vmax.f32 %v3001_v29, 0.0 }
 0x8b7   : > { %v3082_v21 = vmax.f32 %v3012_v6, 0.0 }
 0x8b8   : > { %v3080_v15 = vmax.f32 %v3004_v10, 0.0 }
 0x8b9   : > { %v3104_v43 = vpack.c.bf16 %v3082_v21, %v3081_v24 }
 0x8ba   : > { %v3103_v16 = vpack.c.bf16 %v3080_v15, %v3079_v57 }
 0x8bc   : > { %5029 = vmatprep.mubr.msk.bf16.mxu0 %vm817_vm8, %v3103_v16 }
 0x8bd   : > { %5030 = vmatmul.mubr.msk.bf16.gmra.mrb[176].mxu0 %vm817_vm8, %v3104_v43 }
 0x8c2   : > { %v4999_v27 = vpop.f32.mrb[148].mxu0 }
 0x8c3   : > { %v3025_v30 = vadd.f32 %v4999_v27, %v6069_v22  ;;  %v3016_v17 = vpop.f32.mrb[149].mxu0 }
 0x8c4   : > { %v3017_v34 = vadd.f32 %v6069_v22, %v3016_v17  ;;  %v5000_v36 = vpop.f32.mrb[150].mxu0 }
 0x8c5   : > { %v3028_v41 = vadd.f32 %v5000_v36, %v6069_v22  ;;  %v3019_v32 = vpop.f32.mrb[151].mxu0  ;;  %v3085_v0 = vmax.f32 %v3025_v30, 0.0 }
 0x8c6   : > { %v3020_v55 = vadd.f32 %v6069_v22, %v3019_v32  ;;  %v3083_v12 = vmax.f32 %v3017_v34, 0.0 }
 0x8c7   : > { %v3086_v50 = vmax.f32 %v3028_v41, 0.0 }
 0x8c8   : > { %v3084_v54 = vmax.f32 %v3020_v55, 0.0 }
 0x8c9   : > { %v3106_v4 = vpack.c.bf16 %v3086_v50, %v3085_v0 }
 0x8ca   : > { %v3105_v7 = vpack.c.bf16 %v3084_v54, %v3083_v12  ;;  %v5123_v12 = vld [vmem:[%s6415_s6] ss:$24 sps:$4 sm:$0xff]   ;;  %v5125_v54 = vld [vmem:[%s6415_s6 + $0x4] ss:$24 sps:$4 sm:$0xff]  }
 0x8cb   : > { %3910 = vmatprep.subr.bf16.mxu1 %v5125_v54 }
 0x8cc   : > { %5033 = vmatprep.mubr.msk.bf16.mxu0 %vm817_vm8, %v3105_v7  ;;  %3911 = vmatpush1.bf16.msra.mxu1 %v5123_v12 }
 0x8cd   : > { %5034 = vmatmul.mubr.msk.bf16.gmra.mrb[180].mxu0 %vm817_vm8, %v3106_v4 }
 0x8d2   : > { %v5003_v26 = vpop.f32.mrb[152].mxu0 }
 0x8d3   : > { %v3041_v25 = vadd.f32 %v5003_v26, %v6069_v22  ;;  %v3032_v58 = vpop.f32.mrb[153].mxu0 }
 0x8d4   : > { %v3033_v5 = vadd.f32 %v6069_v22, %v3032_v58  ;;  %v5004_v63 = vpop.f32.mrb[154].mxu0 }
 0x8d5   : > { %v3044_v44 = vadd.f32 %v5004_v63, %v6069_v22  ;;  %v3035_v46 = vpop.f32.mrb[155].mxu0  ;;  %v3089_v47 = vmax.f32 %v3041_v25, 0.0  ;;  %v5128_v25 = vld [vmem:[%s6415_s6 + $0x34] ss:$24 sps:$4 sm:$0xff]  }
 0x8d6   : > { %v3036_v39 = vadd.f32 %v6069_v22, %v3035_v46  ;;  %v3087_v49 = vmax.f32 %v3033_v5, 0.0  ;;  %v5129_v46 = vld [vmem:[%s6415_s6 + $0x8] ss:$24 sps:$4 sm:$0xff]   ;;  %3912 = vmatprep.subr.bf16.mxu1 %v5128_v25 }
 0x8d7   : > { %v3090_v33 = vmax.f32 %v3044_v44, 0.0 }
 0x8d8   : > { %v3088_v2 = vmax.f32 %v3036_v39, 0.0  ;;  %v5131_v39 = vld [vmem:[%s6415_s6 + $0xc] ss:$24 sps:$4 sm:$0xff]  }
 0x8d9   : > { %v3108_v51 = vpack.c.bf16 %v3090_v33, %v3089_v47  ;;  %3953 = vmatprep.subr.bf16.mxu0 %v5131_v39 }
 0x8da   : > { %v3107_v31 = vpack.c.bf16 %v3088_v2, %v3087_v49  ;;  %v5126_v2 = vld [vmem:[%s6415_s6 + $0x30] ss:$24 sps:$4 sm:$0xff]   ;;  %3954 = vmatpush1.bf16.msra.mxu0 %v5129_v46 }
 0x8db   : > { %3913 = vmatpush1.bf16.msra.mxu1 %v5126_v2 }
 0x8dc   : > { %5037 = vmatprep.mubr.msk.bf16.mxu0 %vm817_vm8, %v3107_v31 }
 0x8dd   : > { %5038 = vmatmul.mubr.msk.bf16.gmra.mrb[184].mxu0 %vm817_vm8, %v3108_v51  ;;  %v5134_v51 = vld [vmem:[%s6415_s6 + $0x3c] ss:$24 sps:$4 sm:$0xff]  }
 0x8de   : > { %3955 = vmatprep.subr.bf16.mxu0 %v5134_v51  ;;  %v5156_v51 = vld [vmem:[%s6415_s6 + $0xf8] ss:$24 sps:$4 sm:$0xff]  }
 0x8e2   : > { %v5007_v38 = vpop.f32.mrb[156].mxu0 }
 0x8e3   : > { %v3057_v28 = vadd.f32 %v5007_v38, %v6069_v22  ;;  %v3048_v42 = vpop.f32.mrb[157].mxu0 }
 0x8e4   : > { %v3049_v53 = vadd.f32 %v6069_v22, %v3048_v42  ;;  %v5008_v8 = vpop.f32.mrb[158].mxu0  ;;  %v5132_v42 = vld [vmem:[%s6415_s6 + $0x38] ss:$24 sps:$4 sm:$0xff]  }
 0x8e5   : > { %v3060_v3 = vadd.f32 %v5008_v8, %v6069_v22  ;;  %v3051_v35 = vpop.f32.mrb[159].mxu0  ;;  %v3093_v59 = vmax.f32 %v3057_v28, 0.0  ;;  %3956 = vmatpush1.bf16.msra.mxu0 %v5132_v42 }
 0x8e6   : > { %v3052_v56 = vadd.f32 %v6069_v22, %v3051_v35  ;;  %v3091_v40 = vmax.f32 %v3049_v53, 0.0  ;;  %v5137_v35 = vld [vmem:[%s6415_s6 + $0x64] ss:$24 sps:$4 sm:$0xff]  }
 0x8e7   : > { %v3094_v61 = vmax.f32 %v3060_v3, 0.0  ;;  %3914 = vmatprep.subr.bf16.mxu1 %v5137_v35 }
 0x8e8   : > { %v3092_v60 = vmax.f32 %v3052_v56, 0.0 }
 0x8e9   : > { %v3110_v45 = vpack.c.bf16 %v3094_v61, %v3093_v59 }
 0x8ea   : > { %v3109_v52 = vpack.c.bf16 %v3092_v60, %v3091_v40  ;;  %v5135_v60 = vld [vmem:[%s6415_s6 + $0x60] ss:$24 sps:$4 sm:$0xff]  }
 0x8eb   : > { %3915 = vmatpush1.bf16.msra.mxu1 %v5135_v60 }
 0x8ec   : > { %5041 = vmatprep.mubr.msk.bf16.mxu0 %vm817_vm8, %v3109_v52 }
 0x8ed   : > { %5042 = vmatmul.mubr.msk.bf16.gmra.mrb[188].mxu0 %vm817_vm8, %v3110_v45  ;;  %v5140_v45 = vld [vmem:[%s6415_s6 + $0x6c] ss:$24 sps:$4 sm:$0xff]  }
 0x8ee   : > { %3985 = vmatprep.mubr.bf16.mxu0 %v6016_v11  ;;  %3957 = vmatprep.subr.bf16.mxu0 %v5140_v45 }
 0x950   : > { %v5015_v13 = vpop.f32.mrb[160].mxu0 }
 0x951   : > { %v3227_v22 = vadd.f32 %v5015_v13, %v6123_v9  ;;  %v3218_v14 = vpop.f32.mrb[161].mxu0 }
 0x952   : > { %v3219_v23 = vadd.f32 %v6123_v9, %v3218_v14  ;;  %v5016_v1 = vpop.f32.mrb[162].mxu0  ;;  %v5143_v14 = vld [vmem:[%s6415_s6 + $0x94] ss:$24 sps:$4 sm:$0xff]  }
 0x953   : > { %v3347_v20 = vmax.f32 %v3227_v22, 0.0  ;;  %v3230_v19 = vadd.f32 %v5016_v1, %v6123_v9  ;;  %v3221_v37 = vpop.f32.mrb[163].mxu0  ;;  %3916 = vmatprep.subr.bf16.mxu1 %v5143_v14 }
 0x954   : > { %v3345_v48 = vmax.f32 %v3219_v23, 0.0  ;;  %v3222_v29 = vadd.f32 %v6123_v9, %v3221_v37  ;;  %v5138_v37 = vld [vmem:[%s6415_s6 + $0x68] ss:$24 sps:$4 sm:$0xff]  }
 0x955   : > { %v3379_v11 = vmul.f32 0.999995, %v3347_v20  ;;  %v3348_v62 = vmax.f32 %v3230_v19, 0.0  ;;  %3958 = vmatpush1.bf16.msra.mxu0 %v5138_v37 }
 0x956   : > { %v3377_v6 = vmul.f32 0.999995, %v3345_v48  ;;  %v3346_v18 = vmax.f32 %v3222_v29, 0.0 }
 0x957   : > { %v3380_v10 = vmul.f32 0.999995, %v3348_v62  ;;  %v3418_v21 = vsel %vm817_vm8, %v3379_v11, 0.0  ;;  %v5146_v11 = vld [vmem:[%s6415_s6 + $0x9c] ss:$24 sps:$4 sm:$0xff]  }
 0x958   : > { %v3378_v24 = vmul.f32 0.999995, %v3346_v18  ;;  %v3409_v15 = vsel %vm817_vm8, %v3377_v6, 0.0  ;;  %v5141_v6 = vld [vmem:[%s6415_s6 + $0x90] ss:$24 sps:$4 sm:$0xff]   ;;  %3959 = vmatprep.subr.bf16.mxu0 %v5146_v11 }
 0x959   : > { %v3419_v57 = vsel %vm817_vm8, %v3380_v10, 0.0  ;;  %3917 = vmatpush1.bf16.msra.mxu1 %v5141_v6 }
 0x95a   : > { %v3420_v43 = vadd.f32 %v3419_v57, %v3418_v21  ;;  %v3410_v16 = vsel %vm817_vm8, %v3378_v24, 0.0  ;;  %v5149_v24 = vld [vmem:[%s6415_s6 + $0xc4] ss:$24 sps:$4 sm:$0xff]   ;;  %v5144_v57 = vld [vmem:[%s6415_s6 + $0x98] ss:$24 sps:$4 sm:$0xff]  }
 0x95b   : > { %v3411_v27 = vadd.f32 %v3410_v16, %v3409_v15  ;;  %3918 = vmatprep.subr.bf16.mxu1 %v5149_v24  ;;  %3960 = vmatpush1.bf16.msra.mxu0 %v5144_v57 }
 0x95c   : > { %v3421_v30 = vrot.slane %v3420_v43, 4 }
 0x95d   : > { %v3412_v17 = vrot.slane %v3411_v27, 4 }
 0x95e   : > { %v3422_v34 = vadd.f32 %v3421_v30, %v3420_v43  ;;  %v5152_v43 = vld [vmem:[%s6415_s6 + $0xcc] ss:$24 sps:$4 sm:$0xff]   ;;  %v5147_v30 = vld [vmem:[%s6415_s6 + $0xc0] ss:$24 sps:$4 sm:$0xff]  }
 0x95f   : > { %v3413_v36 = vadd.f32 %v3412_v17, %v3411_v27  ;;  %3961 = vmatprep.subr.bf16.mxu0 %v5152_v43  ;;  %3919 = vmatpush1.bf16.msra.mxu1 %v5147_v30 }
 0x960   : > { %v3423_v41 = vrot.slane %v3422_v34, 2  ;;  %v5019_v32 = vpop.f32.mrb[164].mxu0 }
 0x961   : > { %v3414_v55 = vrot.slane %v3413_v36, 2  ;;  %v3243_v0 = vadd.f32 %v5019_v32, %v6123_v9  ;;  %v3234_v50 = vpop.f32.mrb[165].mxu0 }
 0x962   : > { %v3424_v4 = vadd.f32 %v3423_v41, %v3422_v34  ;;  %v3235_v7 = vadd.f32 %v6123_v9, %v3234_v50  ;;  %v5020_v26 = vpop.f32.mrb[166].mxu0  ;;  %v5155_v41 = vld [vmem:[%s6415_s6 + $0xf4] ss:$24 sps:$4 sm:$0xff]   ;;  %v5150_v50 = vld [vmem:[%s6415_s6 + $0xc8] ss:$24 sps:$4 sm:$0xff]  }
 0x963   : > { %v3415_v58 = vadd.f32 %v3414_v55, %v3413_v36  ;;  %v3351_v5 = vmax.f32 %v3243_v0, 0.0  ;;  %v3246_v63 = vadd.f32 %v5020_v26, %v6123_v9  ;;  %v3237_v44 = vpop.f32.mrb[167].mxu0  ;;  %v5158_v26 = vld [vmem:[%s6415_s6 + $0xfc] ss:$24 sps:$4 sm:$0xff]   ;;  %3920 = vmatprep.subr.bf16.mxu1 %v5155_v41  ;;  %3962 = vmatpush1.bf16.msra.mxu0 %v5150_v50 }
 0x964   : > { %v3425_v47 = vrot.slane %v3424_v4, 1  ;;  %v3349_v33 = vmax.f32 %v3235_v7, 0.0  ;;  %v3238_v49 = vadd.f32 %v6123_v9, %v3237_v44  ;;  %3963 = vmatprep.subr.bf16.mxu0 %v5158_v26 }
 0x965   : > { %v3416_v31 = vrot.slane %v3415_v58, 1  ;;  %v3383_v38 = vmul.f32 0.999995, %v3351_v5  ;;  %v3352_v28 = vmax.f32 %v3246_v63, 0.0  ;;  %v5153_v63 = vld [vmem:[%s6415_s6 + $0xf0] ss:$24 sps:$4 sm:$0xff]  }
 0x966   : > { %v3426_v53 = vadd.f32 %v3425_v47, %v3424_v4  ;;  %v3381_v8 = vmul.f32 0.999995, %v3349_v33  ;;  %v3350_v3 = vmax.f32 %v3238_v49, 0.0  ;;  %v5161_v47 = vld [vmem:[%s6415_s6 + $0x124] ss:$24 sps:$4 sm:$0xff]   ;;  %3921 = vmatpush1.bf16.msra.mxu1 %v5153_v63 }
 0x967   : > { %v3417_v56 = vadd.f32 %v3416_v31, %v3415_v58  ;;  %v3384_v59 = vmul.f32 0.999995, %v3352_v28  ;;  %v3436_v13 = vsel %vm817_vm8, %v3383_v38, 0.0  ;;  %3922 = vmatprep.subr.bf16.mxu1 %v5161_v47  ;;  %3964 = vmatpush1.bf16.msra.mxu0 %v5156_v51 }
 0x968   : > { %v3554_v61 = vpack.c.bf16 %v3426_v53, %v3426_v53  ;;  %v3382_v40 = vmul.f32 0.999995, %v3350_v3  ;;  %v3427_v1 = vsel %vm817_vm8, %v3381_v8, 0.0  ;;  %v5159_v53 = vld [vmem:[%s6415_s6 + $0x120] ss:$24 sps:$4 sm:$0xff]  }
 0x969   : > { %v3553_v52 = vpack.c.bf16 %v3417_v56, %v3417_v56  ;;  %v3437_v22 = vsel %vm817_vm8, %v3384_v59, 0.0 }
 0x96a   : > { %v3586_v23 = vunpack.c.l.b16 %v3554_v61  ;;  %v3438_v20 = vadd.f32 %v3437_v22, %v3436_v13  ;;  %v3428_v19 = vsel %vm817_vm8, %v3382_v40, 0.0  ;;  %3923 = vmatpush1.bf16.msra.mxu1 %v5159_v53 }
 0x96b   : > { %v3585_v48 = vunpack.c.l.b16 %v3553_v52  ;;  %v3429_v29 = vadd.f32 %v3428_v19, %v3427_v1 }
 0x96c   : > { %v3439_v62 = vrot.slane %v3438_v20, 4 }
 0x96d   : > { %v6187_v18 = vsel %vm1579_vm9, %v3586_v23, %v3585_v48  ;;  %v3430_v10 = vrot.slane %v3429_v29, 4 }
 0x96e   : > { %v3440_v21 = vadd.f32 %v3439_v62, %v3438_v20 }
 0x96f   : > { %v3431_v15 = vadd.f32 %v3430_v10, %v3429_v29 }
 0x970   : > { %v3441_v16 = vrot.slane %v3440_v21, 2  ;;  %v5023_v27 = vpop.f32.mrb[168].mxu0 }
 0x971   : > { %v3432_v17 = vrot.slane %v3431_v15, 2  ;;  %v3259_v34 = vadd.f32 %v5023_v27, %v6123_v9  ;;  %v3250_v36 = vpop.f32.mrb[169].mxu0 }
 0x972   : > { %v3442_v32 = vadd.f32 %v3441_v16, %v3440_v21  ;;  %v3251_v55 = vadd.f32 %v6123_v9, %v3250_v36  ;;  %v5024_v0 = vpop.f32.mrb[170].mxu0 }
 0x973   : > { %v3433_v12 = vadd.f32 %v3432_v17, %v3431_v15  ;;  %v3355_v54 = vmax.f32 %v3259_v34, 0.0  ;;  %v3262_v4 = vadd.f32 %v5024_v0, %v6123_v9  ;;  %v3253_v7 = vpop.f32.mrb[171].mxu0 }
 0x974   : > { %v3443_v25 = vrot.slane %v3442_v32, 1  ;;  %v3353_v58 = vmax.f32 %v3251_v55, 0.0  ;;  %v3254_v5 = vadd.f32 %v6123_v9, %v3253_v7 }
 0x975   : > { %v3434_v44 = vrot.slane %v3433_v12, 1  ;;  %v3387_v46 = vmul.f32 0.999995, %v3355_v54  ;;  %v3356_v39 = vmax.f32 %v3262_v4, 0.0 }
 0x976   : > { %v3444_v33 = vadd.f32 %v3443_v25, %v3442_v32  ;;  %v3385_v49 = vmul.f32 0.999995, %v3353_v58  ;;  %v3354_v2 = vmax.f32 %v3254_v5, 0.0 }
 0x977   : > { %v3435_v31 = vadd.f32 %v3434_v44, %v3433_v12  ;;  %v3388_v38 = vmul.f32 0.999995, %v3356_v39  ;;  %v3454_v3 = vsel %vm817_vm8, %v3387_v46, 0.0 }
 0x978   : > { %v3556_v28 = vpack.c.bf16 %v3444_v33, %v3444_v33  ;;  %v3386_v42 = vmul.f32 0.999995, %v3354_v2  ;;  %v3445_v56 = vsel %vm817_vm8, %v3385_v49, 0.0 }
 0x979   : > { %v3555_v8 = vpack.c.bf16 %v3435_v31, %v3435_v31  ;;  %v3455_v35 = vsel %vm817_vm8, %v3388_v38, 0.0 }
 0x97a   : > { %v3456_v59 = vadd.f32 %v3455_v35, %v3454_v3  ;;  %v3446_v61 = vsel %vm817_vm8, %v3386_v42, 0.0  ;;  %v3588_v45 = vunpack.c.l.b16 %v3556_v28 }
 0x97b   : > { %v3587_v40 = vunpack.c.l.b16 %v3555_v8  ;;  %v3447_v60 = vadd.f32 %v3446_v61, %v3445_v56 }
 0x97c   : > { %v3457_v52 = vrot.slane %v3456_v59, 4 }
 0x97d   : > { %v3602_v13 = vsel %vm1581_vm10, %v3587_v40, %v6187_v18  ;;  %v3448_v22 = vrot.slane %v3447_v60, 4 }
 0x97e   : > { %v3458_v14 = vadd.f32 %v3457_v52, %v3456_v59  ;;  %v3603_v23 = vsel %vm1583_vm11, %v3588_v45, %v3602_v13 }
 0x97f   : > { %v3449_v1 = vadd.f32 %v3448_v22, %v3447_v60 }
 0x980   : > { %v3459_v20 = vrot.slane %v3458_v14, 2  ;;  %v5027_v19 = vpop.f32.mrb[172].mxu0 }
 0x981   : > { %v3450_v37 = vrot.slane %v3449_v1, 2  ;;  %v3275_v48 = vadd.f32 %v5027_v19, %v6123_v9  ;;  %v3266_v29 = vpop.f32.mrb[173].mxu0 }
 0x982   : > { %v3460_v11 = vadd.f32 %v3459_v20, %v3458_v14  ;;  %v3267_v62 = vadd.f32 %v6123_v9, %v3266_v29  ;;  %v5028_v6 = vpop.f32.mrb[174].mxu0 }
 0x983   : > { %v3451_v10 = vadd.f32 %v3450_v37, %v3449_v1  ;;  %v3359_v24 = vmax.f32 %v3275_v48, 0.0  ;;  %v3278_v21 = vadd.f32 %v5028_v6, %v6123_v9  ;;  %v3269_v18 = vpop.f32.mrb[175].mxu0 }
 0x984   : > { %v3461_v57 = vrot.slane %v3460_v11, 1  ;;  %v3357_v15 = vmax.f32 %v3267_v62, 0.0  ;;  %v3270_v43 = vadd.f32 %v6123_v9, %v3269_v18 }
 0x985   : > { %v3452_v16 = vrot.slane %v3451_v10, 1  ;;  %v3391_v27 = vmul.f32 0.999995, %v3359_v24  ;;  %v3360_v30 = vmax.f32 %v3278_v21, 0.0 }
 0x986   : > { %v3462_v17 = vadd.f32 %v3461_v57, %v3460_v11  ;;  %v3389_v34 = vmul.f32 0.999995, %v3357_v15  ;;  %v3358_v36 = vmax.f32 %v3270_v43, 0.0 }
 0x987   : > { %v3453_v41 = vadd.f32 %v3452_v16, %v3451_v10  ;;  %v3392_v32 = vmul.f32 0.999995, %v3360_v30  ;;  %v3472_v12 = vsel %vm817_vm8, %v3391_v27, 0.0 }
 0x988   : > { %v3558_v55 = vpack.c.bf16 %v3462_v17, %v3462_v17  ;;  %v3390_v0 = vmul.f32 0.999995, %v3358_v36  ;;  %v3463_v4 = vsel %vm817_vm8, %v3389_v34, 0.0 }
 0x989   : > { %v3557_v50 = vpack.c.bf16 %v3453_v41, %v3453_v41  ;;  %v3473_v54 = vsel %vm817_vm8, %v3392_v32, 0.0 }
 0x98a   : > { %v3474_v7 = vadd.f32 %v3473_v54, %v3472_v12  ;;  %v3464_v26 = vsel %vm817_vm8, %v3390_v0, 0.0  ;;  %v3590_v5 = vunpack.c.l.b16 %v3558_v55 }
 0x98b   : > { %v3589_v25 = vunpack.c.l.b16 %v3557_v50  ;;  %v3465_v58 = vadd.f32 %v3464_v26, %v3463_v4 }
 0x98c   : > { %v3475_v63 = vrot.slane %v3474_v7, 4 }
 0x98d   : > { %v3466_v44 = vrot.slane %v3465_v58, 4  ;;  %v3604_v46 = vsel %vm1585_vm12, %v3589_v25, %v3603_v23 }
 0x98e   : > { %v3476_v39 = vadd.f32 %v3475_v63, %v3474_v7  ;;  %v3605_v47 = vsel %vm1587_vm13, %v3590_v5, %v3604_v46 }
 0x98f   : > { %v3467_v33 = vadd.f32 %v3466_v44, %v3465_v58 }
 0x990   : > { %v3477_v49 = vrot.slane %v3476_v39, 2  ;;  %v5031_v2 = vpop.f32.mrb[176].mxu0 }
 0x991   : > { %v3468_v51 = vrot.slane %v3467_v33, 2  ;;  %v3291_v31 = vadd.f32 %v5031_v2, %v6123_v9  ;;  %v3282_v38 = vpop.f32.mrb[177].mxu0 }
 0x992   : > { %v3478_v28 = vadd.f32 %v3477_v49, %v3476_v39  ;;  %v3283_v42 = vadd.f32 %v6123_v9, %v3282_v38  ;;  %v5032_v53 = vpop.f32.mrb[178].mxu0 }
 0x993   : > { %v3469_v8 = vadd.f32 %v3468_v51, %v3467_v33  ;;  %v3363_v3 = vmax.f32 %v3291_v31, 0.0  ;;  %v3294_v35 = vadd.f32 %v5032_v53, %v6123_v9  ;;  %v3285_v56 = vpop.f32.mrb[179].mxu0 }
 0x994   : > { %v3479_v59 = vrot.slane %v3478_v28, 1  ;;  %v3361_v61 = vmax.f32 %v3283_v42, 0.0  ;;  %v3286_v40 = vadd.f32 %v6123_v9, %v3285_v56 }
 0x995   : > { %v3470_v60 = vrot.slane %v3469_v8, 1  ;;  %v3395_v45 = vmul.f32 0.999995, %v3363_v3  ;;  %v3364_v52 = vmax.f32 %v3294_v35, 0.0 }
 0x996   : > { %v3393_v13 = vmul.f32 0.999995, %v3361_v61  ;;  %v3362_v22 = vmax.f32 %v3286_v40, 0.0  ;;  %v3480_v14 = vadd.f32 %v3479_v59, %v3478_v28 }
 0x997   : > { %v3471_v23 = vadd.f32 %v3470_v60, %v3469_v8  ;;  %v3396_v1 = vmul.f32 0.999995, %v3364_v52  ;;  %v3490_v48 = vsel %vm817_vm8, %v3395_v45, 0.0 }
 0x998   : > { %v3394_v20 = vmul.f32 0.999995, %v3362_v22  ;;  %v3560_v19 = vpack.c.bf16 %v3480_v14, %v3480_v14  ;;  %v3481_v11 = vsel %vm817_vm8, %v3393_v13, 0.0 }
 0x999   : > { %v3559_v37 = vpack.c.bf16 %v3471_v23, %v3471_v23  ;;  %v3491_v29 = vsel %vm817_vm8, %v3396_v1, 0.0 }
 0x99a   : > { %v3492_v62 = vadd.f32 %v3491_v29, %v3490_v48  ;;  %v3482_v6 = vsel %vm817_vm8, %v3394_v20, 0.0  ;;  %v3592_v18 = vunpack.c.l.b16 %v3560_v19 }
 0x99b   : > { %v3591_v10 = vunpack.c.l.b16 %v3559_v37  ;;  %v3483_v24 = vadd.f32 %v3482_v6, %v3481_v11 }
 0x99c   : > { %v3493_v21 = vrot.slane %v3492_v62, 4 }
 0x99d   : > { %v3484_v57 = vrot.slane %v3483_v24, 4  ;;  %v3606_v15 = vsel %vm1589_vm14, %v3591_v10, %v3605_v47 }
 0x99e   : > { %v3494_v43 = vadd.f32 %v3493_v21, %v3492_v62  ;;  %v6253_v16 = vsel %vm1591_vm15, %v3592_v18, %v3606_v15 }
 0x99f   : > { %v3485_v27 = vadd.f32 %v3484_v57, %v3483_v24 }
 0x9a0   : > { %v3495_v30 = vrot.slane %v3494_v43, 2  ;;  %v5035_v17 = vpop.f32.mrb[180].mxu0 }
 0x9a1   : > { %v3486_v34 = vrot.slane %v3485_v27, 2  ;;  %v3307_v36 = vadd.f32 %v5035_v17, %v6123_v9  ;;  %v3298_v41 = vpop.f32.mrb[181].mxu0 }
 0x9a2   : > { %v3496_v32 = vadd.f32 %v3495_v30, %v3494_v43  ;;  %v3299_v55 = vadd.f32 %v6123_v9, %v3298_v41  ;;  %v5036_v0 = vpop.f32.mrb[182].mxu0 }
 0x9a3   : > { %v3487_v50 = vadd.f32 %v3486_v34, %v3485_v27  ;;  %v3367_v12 = vmax.f32 %v3307_v36, 0.0  ;;  %v3310_v54 = vadd.f32 %v5036_v0, %v6123_v9  ;;  %v3301_v4 = vpop.f32.mrb[183].mxu0 }
 0x9a4   : > { %v3497_v7 = vrot.slane %v3496_v32, 1  ;;  %v3365_v26 = vmax.f32 %v3299_v55, 0.0  ;;  %v3302_v25 = vadd.f32 %v6123_v9, %v3301_v4 }
 0x9a5   : > { %v3488_v58 = vrot.slane %v3487_v50, 1  ;;  %v3399_v5 = vmul.f32 0.999995, %v3367_v12  ;;  %v3368_v63 = vmax.f32 %v3310_v54, 0.0 }
 0x9a6   : > { %v3498_v44 = vadd.f32 %v3497_v7, %v3496_v32  ;;  %v3397_v46 = vmul.f32 0.999995, %v3365_v26  ;;  %v3366_v39 = vmax.f32 %v3302_v25, 0.0 }
 0x9a7   : > { %v3489_v47 = vadd.f32 %v3488_v58, %v3487_v50  ;;  %v3400_v33 = vmul.f32 0.999995, %v3368_v63  ;;  %v3508_v31 = vsel %vm817_vm8, %v3399_v5, 0.0 }
 0x9a8   : > { %v3562_v49 = vpack.c.bf16 %v3498_v44, %v3498_v44  ;;  %v3398_v2 = vmul.f32 0.999995, %v3366_v39  ;;  %v3499_v42 = vsel %vm817_vm8, %v3397_v46, 0.0 }
 0x9a9   : > { %v3561_v51 = vpack.c.bf16 %v3489_v47, %v3489_v47  ;;  %v3509_v38 = vsel %vm817_vm8, %v3400_v33, 0.0 }
 0x9aa   : > { %v3594_v28 = vunpack.c.l.b16 %v3562_v49  ;;  %v3510_v53 = vadd.f32 %v3509_v38, %v3508_v31  ;;  %v3500_v8 = vsel %vm817_vm8, %v3398_v2, 0.0 }
 0x9ab   : > { %v3593_v3 = vunpack.c.l.b16 %v3561_v51  ;;  %v3501_v35 = vadd.f32 %v3500_v8, %v3499_v42 }
 0x9ac   : > { %v3511_v56 = vrot.slane %v3510_v53, 4 }
 0x9ad   : > { %v3608_v59 = vsel %vm1579_vm9, %v3594_v28, %v3593_v3  ;;  %v3502_v61 = vrot.slane %v3501_v35, 4 }
 0x9ae   : > { %v3512_v40 = vadd.f32 %v3511_v56, %v3510_v53 }
 0x9af   : > { %v3503_v60 = vadd.f32 %v3502_v61, %v3501_v35 }
 0x9b0   : > { %v3513_v45 = vrot.slane %v3512_v40, 2  ;;  %v5039_v52 = vpop.f32.mrb[184].mxu0 }
 0x9b1   : > { %v3504_v13 = vrot.slane %v3503_v60, 2  ;;  %v3323_v22 = vadd.f32 %v5039_v52, %v6123_v9  ;;  %v3314_v14 = vpop.f32.mrb[185].mxu0 }
 0x9b2   : > { %v3514_v23 = vadd.f32 %v3513_v45, %v3512_v40  ;;  %v3315_v1 = vadd.f32 %v6123_v9, %v3314_v14  ;;  %v5040_v20 = vpop.f32.mrb[186].mxu0 }
 0x9b3   : > { %v3505_v19 = vadd.f32 %v3504_v13, %v3503_v60  ;;  %v3371_v37 = vmax.f32 %v3323_v22, 0.0  ;;  %v3326_v48 = vadd.f32 %v5040_v20, %v6123_v9  ;;  %v3317_v29 = vpop.f32.mrb[187].mxu0 }
 0x9b4   : > { %v3515_v11 = vrot.slane %v3514_v23, 1  ;;  %v3369_v62 = vmax.f32 %v3315_v1, 0.0  ;;  %v3318_v6 = vadd.f32 %v6123_v9, %v3317_v29 }
 0x9b5   : > { %v3506_v10 = vrot.slane %v3505_v19, 1  ;;  %v3403_v24 = vmul.f32 0.999995, %v3371_v37  ;;  %v3372_v21 = vmax.f32 %v3326_v48, 0.0 }
 0x9b6   : > { %v3516_v18 = vadd.f32 %v3515_v11, %v3514_v23  ;;  %v3401_v57 = vmul.f32 0.999995, %v3369_v62  ;;  %v3370_v15 = vmax.f32 %v3318_v6, 0.0 }
 0x9b7   : > { %v3507_v43 = vadd.f32 %v3506_v10, %v3505_v19  ;;  %v3404_v27 = vmul.f32 0.999995, %v3372_v21  ;;  %v3526_v36 = vsel %vm817_vm8, %v3403_v24, 0.0 }
 0x9b8   : > { %v3564_v30 = vpack.c.bf16 %v3516_v18, %v3516_v18  ;;  %v3402_v17 = vmul.f32 0.999995, %v3370_v15  ;;  %v3517_v32 = vsel %vm817_vm8, %v3401_v57, 0.0  ;;  %v5164_v15 = vld [vmem:[%s6415_s6 + $0x12c] ss:$24 sps:$4 sm:$0xff]  }
 0x9b9   : > { %v3563_v34 = vpack.c.bf16 %v3507_v43, %v3507_v43  ;;  %v3527_v41 = vsel %vm817_vm8, %v3404_v27, 0.0  ;;  %v5162_v27 = vld [vmem:[%s6415_s6 + $0x128] ss:$24 sps:$4 sm:$0xff]   ;;  %3965 = vmatprep.subr.bf16.mxu0 %v5164_v15 }
 0x9ba   : > { %v3528_v55 = vadd.f32 %v3527_v41, %v3526_v36  ;;  %v3518_v0 = vsel %vm817_vm8, %v3402_v17, 0.0  ;;  %v3596_v54 = vunpack.c.l.b16 %v3564_v30  ;;  %v5165_v17 = vld [vmem:[%s6415_s6 + $0x150] ss:$24 sps:$4 sm:$0xff]   ;;  %3966 = vmatpush1.bf16.msra.mxu0 %v5162_v27 }
 0x9bb   : > { %v3595_v50 = vunpack.c.l.b16 %v3563_v34  ;;  %v3519_v12 = vadd.f32 %v3518_v0, %v3517_v32  ;;  %v5167_v34 = vld [vmem:[%s6415_s6 + $0x154] ss:$24 sps:$4 sm:$0xff]   ;;  %v5168_v41 = vld [vmem:[%s6415_s6 + $0x158] ss:$24 sps:$4 sm:$0xff]  }
 0x9bc   : > { %v3529_v4 = vrot.slane %v3528_v55, 4  ;;  %v5170_v32 = vld [vmem:[%s6415_s6 + $0x15c] ss:$24 sps:$4 sm:$0xff]   ;;  %3924 = vmatprep.subr.bf16.mxu1 %v5167_v34 }
 0x9bd   : > { %v3609_v7 = vsel %vm1581_vm10, %v3595_v50, %v3608_v59  ;;  %v3520_v26 = vrot.slane %v3519_v12, 4  ;;  %v5173_v0 = vld [vmem:[%s6415_s6 + $0x14] ss:$24 sps:$4 sm:$0xff]   ;;  %3925 = vmatpush1.bf16.msra.mxu1 %v5165_v17  ;;  %3967 = vmatprep.subr.bf16.mxu0 %v5170_v32 }
 0x9be   : > { %v3530_v25 = vadd.f32 %v3529_v4, %v3528_v55  ;;  %v3610_v58 = vsel %vm1583_vm11, %v3596_v54, %v3609_v7  ;;  %3996 = vmatprep.subr.bf16.mxu1 %v5173_v0  ;;  %3968 = vmatpush1.bf16.msra.mxu0 %v5168_v41 }
 0x9bf   : > { %v3521_v5 = vadd.f32 %v3520_v26, %v3519_v12 }
 0x9c0   : > { %v3531_v63 = vrot.slane %v3530_v25, 2  ;;  %v5043_v44 = vpop.f32.mrb[188].mxu0 }
 0x9c1   : > { %v3522_v46 = vrot.slane %v3521_v5, 2  ;;  %v3339_v39 = vadd.f32 %v5043_v44, %v6123_v9  ;;  %v3330_v47 = vpop.f32.mrb[189].mxu0  ;;  %v5176_v44 = vld [vmem:[%s6415_s6 + $0x44] ss:$24 sps:$4 sm:$0xff]  }
 0x9c2   : > { %v3532_v33 = vadd.f32 %v3531_v63, %v3530_v25  ;;  %v3331_v49 = vadd.f32 %v6123_v9, %v3330_v47  ;;  %v5044_v2 = vpop.f32.mrb[190].mxu0  ;;  %v5171_v63 = vld [vmem:[%s6415_s6 + $0x10] ss:$24 sps:$4 sm:$0xff]   ;;  %v5179_v47 = vld [vmem:[%s6415_s6 + $0x74] ss:$24 sps:$4 sm:$0xff]  }
 0x9c3   : > { %v3523_v51 = vadd.f32 %v3522_v46, %v3521_v5  ;;  %v3375_v31 = vmax.f32 %v3339_v39, 0.0  ;;  %v3342_v38 = vadd.f32 %v5044_v2, %v6123_v9  ;;  %v3333_v28 = vpop.f32.mrb[191].mxu0  ;;  %v5197_v39 = vld [vmem:[#allocation2 + $0x8] sm:$0xff]  ;;  %v5180_v2 = vld [vmem:[%s6415_s6 + $0xa0] ss:$24 sps:$4 sm:$0xff]  }
 0x9c4   : > { %v3533_v42 = vrot.slane %v3532_v33, 1  ;;  %v3373_v53 = vmax.f32 %v3331_v49, 0.0  ;;  %v3334_v8 = vadd.f32 %v6123_v9, %v3333_v28  ;;  %v5182_v49 = vld [vmem:[%s6415_s6 + $0xa4] ss:$24 sps:$4 sm:$0xff]   ;;  %v5186_v28 = vld [vmem:[%s6415_s6 + $0x100] ss:$24 sps:$4 sm:$0xff]  }
 0x9c5   : > { %v3524_v3 = vrot.slane %v3523_v51, 1  ;;  %v3407_v35 = vmul.f32 0.999995, %v3375_v31  ;;  %v3376_v56 = vmax.f32 %v3342_v38, 0.0  ;;  %v5183_v31 = vld [vmem:[%s6415_s6 + $0xd0] ss:$24 sps:$4 sm:$0xff]  }
 0x9c6   : > { %v3534_v59 = vadd.f32 %v3533_v42, %v3532_v33  ;;  %v3405_v61 = vmul.f32 0.999995, %v3373_v53  ;;  %v3374_v40 = vmax.f32 %v3334_v8, 0.0  ;;  %v5177_v33 = vld [vmem:[%s6415_s6 + $0x70] ss:$24 sps:$4 sm:$0xff]  }
 0x9c7   : > { %v3525_v60 = vadd.f32 %v3524_v3, %v3523_v51  ;;  %v3408_v45 = vmul.f32 0.999995, %v3376_v56  ;;  %v3544_v14 = vsel %vm817_vm8, %v3407_v35, 0.0  ;;  %v5185_v51 = vld [vmem:[%s6415_s6 + $0xd4] ss:$24 sps:$4 sm:$0xff]  }
 0x9c8   : > { %v3566_v52 = vpack.c.bf16 %v3534_v59, %v3534_v59  ;;  %v3406_v13 = vmul.f32 0.999995, %v3374_v40  ;;  %v3535_v1 = vsel %vm817_vm8, %v3405_v61, 0.0  ;;  %v5188_v38 = vld [vmem:[%s6415_s6 + $0x104] ss:$24 sps:$4 sm:$0xff]  }
 0x9c9   : > { %v3565_v22 = vpack.c.bf16 %v3525_v60, %v3525_v60  ;;  %v3545_v23 = vsel %vm817_vm8, %v3408_v45, 0.0  ;;  %v5191_v42 = vld [vmem:[%s6415_s6 + $0x134] ss:$24 sps:$4 sm:$0xff]   ;;  %v5189_v53 = vld [vmem:[%s6415_s6 + $0x130] ss:$24 sps:$4 sm:$0xff]  }
 0x9ca   : > { %v3546_v20 = vadd.f32 %v3545_v23, %v3544_v14  ;;  %v3536_v9 = vsel %vm817_vm8, %v3406_v13, 0.0  ;;  %v3598_v48 = vunpack.c.l.b16 %v3566_v52  ;;  %v5194_v8 = vld [vmem:[%s6415_s6 + $0x164] ss:$24 sps:$4 sm:$0xff]   ;;  %v5192_v3 = vld [vmem:[%s6415_s6 + $0x160] ss:$24 sps:$4 sm:$0xff]  }
 0x9cb   : > { %v3597_v19 = vunpack.c.l.b16 %v3565_v22  ;;  %v3537_v37 = vadd.f32 %v3536_v9, %v3535_v1 }
 0x9cc   : > { %v3547_v29 = vrot.slane %v3546_v20, 4 }
 0x9cd   : > { %v3538_v11 = vrot.slane %v3537_v37, 4  ;;  %v3611_v62 = vsel %vm1585_vm12, %v3597_v19, %v3610_v58 }
 0x9ce   : > { %v3548_v6 = vadd.f32 %v3547_v29, %v3546_v20  ;;  %v3612_v10 = vsel %vm1587_vm13, %v3598_v48, %v3611_v62 }
 0x9cf   : > { %v3539_v24 = vadd.f32 %v3538_v11, %v3537_v37 }
 0x9d0   : > { %v3549_v21 = vrot.slane %v3548_v6, 2 }
 0x9d1   : > { %v3540_v18 = vrot.slane %v3539_v24, 2 }
 0x9d2   : > { %v3550_v57 = vadd.f32 %v3549_v21, %v3548_v6 }
 0x9d3   : > { %v3541_v43 = vadd.f32 %v3540_v18, %v3539_v24 }
 0x9d4   : > { %v3551_v30 = vrot.slane %v3550_v57, 1 }
 0x9d5   : > { %v3542_v36 = vrot.slane %v3541_v43, 1 }
 0x9d6   : > { %v3552_v55 = vadd.f32 %v3551_v30, %v3550_v57 }
 0x9d7   : > { %v3543_v50 = vadd.f32 %v3542_v36, %v3541_v43 }
 0x9d8   : > { %v3568_v12 = vpack.c.bf16 %v3552_v55, %v3552_v55 }
 0x9d9   : > { %v3567_v54 = vpack.c.bf16 %v3543_v50, %v3543_v50 }
 0x9da   : > { %v3600_v7 = vunpack.c.l.b16 %v3568_v12 }
 0x9db   : > { %v3599_v4 = vunpack.c.l.b16 %v3567_v54 }
 0x9dd   : > { %v3613_v26 = vsel %vm1589_vm14, %v3599_v4, %v3612_v10 }
 0x9de   : > { %v3614_v25 = vsel %vm1591_vm15, %v3600_v7, %v3613_v26 }
 0x9df   : > { %v3615_v58 = vpack.c.b16 %v3614_v25, %v6253_v16  ;;  %v5174_v16 = vld [vmem:[%s6415_s6 + $0x40] ss:$24 sps:$4 sm:$0xff]  }
 0x9e1   : > { %3616 = vrot.lane.b32.xlu1 %v3615_v58, %s5266_s9  ;;  %s292_s9 = scalar_lea.vmem [#allocation4], %s5045_s17 }
 0x9e2   : > { %s4066_s18 = sshll.u32 %s292_s9, 4  ;;  %s6363_s18 = int_to_ptr.vmem [resolvable:$true] %s4066_s18 }
 0x9e3   : > { %s5198_s29 = scalar_lea.vmem %s6363_s18, 1536  ;;  %p5205_p0 = scmp.lt.s32.totalorder %s6363_s18, %s5203_s13 }
 0x9e4   : > { %p5199_p11 = scmp.ne.s32.totalorder %s6363_s18, %s5198_s29  ;;  %p5206_p1 = scmp.lt.s32.totalorder %s5204_s14, %s5198_s29 }
 0x9e6   : > { %p5200_p12 = pnand %p5199_p11, %p5350_p5  ;;  %p5207_p2 = por %p5206_p1, %p5205_p0 }
 0x9e8   : > { %p5201_p13 = pneg %p5200_p12 }
 0x9ea   : > { %p5208_p3 = pnand %p5207_p2, %p5201_p13 }
 0xa53   : > { %v3617_v5 = vpop.permute.xlu1 %3616 }
 0xa54   : > { %3620 = vst.msk [vmem:[#allocation3] sm:$0xff] %vm3619_vm1, %v3617_v5 }
 0xa5b   : > { %v3621_v46 = vld [vmem:[#allocation3] sm:$0xff] }
 0xa5c   : > { %3943 = vmatmul.mubr.bf16.vlgmr.msra.gmra.mrb[192].mxu1 %v3621_v46  ;;  %3986 = vmatmul.mubr.bf16.vlgmr.msra.gmra.mrb[192].mxu0 %v3621_v46 }
 0xa5d   : > { %3997 = vmatpush1.bf16.msra.mxu1 %v5171_v63  ;;  %4028 = vmatprep.mubr.bf16.mxu1 %v5197_v39 }
 0xa5e   : > { %3998 = vmatprep.subr.bf16.mxu1 %v5176_v44 }
 0xa61   : > { %3999 = vmatpush1.bf16.msra.mxu1 %v5174_v16 }
 0xa62   : > { %4000 = vmatprep.subr.bf16.mxu1 %v5179_v47 }
 0xa65   : > { %4001 = vmatpush1.bf16.msra.mxu1 %v5177_v33 }
 0xa66   : > { %4002 = vmatprep.subr.bf16.mxu1 %v5182_v49 }
 0xa69   : > { %4003 = vmatpush1.bf16.msra.mxu1 %v5180_v2 }
 0xa6a   : > { %4004 = vmatprep.subr.bf16.mxu1 %v5185_v51 }
 0xa6d   : > { %4005 = vmatpush1.bf16.msra.mxu1 %v5183_v31 }
 0xa6e   : > { %4006 = vmatprep.subr.bf16.mxu1 %v5188_v38 }
 0xa71   : > { %4007 = vmatpush1.bf16.msra.mxu1 %v5186_v28 }
 0xa72   : > { %4008 = vmatprep.subr.bf16.mxu1 %v5191_v42 }
 0xa75   : > { %4009 = vmatpush1.bf16.msra.mxu1 %v5189_v53 }
 0xa76   : > { %4010 = vmatprep.subr.bf16.mxu1 %v5194_v8 }
 0xa79   : > { %4011 = vmatpush1.bf16.msra.mxu1 %v5192_v3 }
 0xa7c   : > { %4029 = vmatmul.mubr.bf16.vlgmr.msra.gmra.mrb[196].mxu1 %v3621_v46 }
 0xb2f   : > { %v3944_v35 = vpop.f32.mrb[192].mxu1  ;;  %v3987_v56 = vpop.f32.mrb[192].mxu0 }
 0xb30   : > { %4039 = vst [vmem:[%s292_s9] sm:$0xff] %v3944_v35  ;;  %4041 = vst [vmem:[%s292_s9 + $0x10] sm:$0xff] %v3987_v56  ;;  %v3946_v59 = vpop.f32.mrb[193].mxu1  ;;  %v3989_v61 = vpop.f32.mrb[193].mxu0 }
 0xb31   : > { %4040 = vst [vmem:[%s292_s9 + $0x8] sm:$0xff] %v3946_v59  ;;  %4042 = vst [vmem:[%s292_s9 + $0x18] sm:$0xff] %v3989_v61  ;;  %v3948_v40 = vpop.f32.mrb[194].mxu1  ;;  %v3991_v60 = vpop.f32.mrb[194].mxu0 }
 0xb32   : > { %4045 = vst [vmem:[%s292_s9 + $0x30] sm:$0xff] %v3948_v40  ;;  %4047 = vst [vmem:[%s292_s9 + $0x40] sm:$0xff] %v3991_v60  ;;  %v3950_v45 = vpop.f32.mrb[195].mxu1  ;;  %v3993_v52 = vpop.f32.mrb[195].mxu0 }
 0xb33   : > { %4046 = vst [vmem:[%s292_s9 + $0x38] sm:$0xff] %v3950_v45  ;;  %4048 = vst [vmem:[%s292_s9 + $0x48] sm:$0xff] %v3993_v52 }
 0xb4f   : > { %v4030_v13 = vpop.f32.mrb[196].mxu1 }
 0xb50   : > { %4043 = vst [vmem:[%s292_s9 + $0x20] sm:$0xff] %v4030_v13  ;;  %v4032_v22 = vpop.f32.mrb[197].mxu1 }
 0xb51   : > { %4044 = vst [vmem:[%s292_s9 + $0x28] sm:$0xff] %v4032_v22  ;;  %v4034_v14 = vpop.f32.mrb[198].mxu1 }
 0xb52   : > { %4049 = vst [vmem:[%s292_s9 + $0x50] sm:$0xff] %v4034_v14  ;;  %v4036_v23 = vpop.f32.mrb[199].mxu1 }
 0xb53   : > { %4050 = vst [vmem:[%s292_s9 + $0x58] sm:$0xff] %v4036_v23 }
 0xb54   : > { %5211 = shalt.err (!%p5208_p3)
}
 0xb55   : > { %s5212_s15 = scalar_lea.hbm %s6361_s23, 1536  ;;  %s5216_s9 = scalar_lea.hbm %s6416_s7, 6144 }
 0xb56   : > { %p5213_p4 = scmp.ne.s32.totalorder %s6361_s23, %s5212_s15  ;;  %p5217_p9 = scmp.lt.u32.totalorder %s6361_s23, %s6416_s7 }
 0xb57   : > { %p5218_p10 = scmp.lt.u32.totalorder %s5216_s9, %s5212_s15  ;;  %p5220_p12 = scmp.lt.u32.totalorder %s5212_s15, %s6361_s23 }
 0xb58   : > { %p5214_p7 = pnand %p5213_p4, %p5350_p5 }
 0xb59   : > { %p5219_p11 = por %p5218_p10, %p5217_p9 }
 0xb5a   : > { %p5215_p8 = pneg %p5214_p7 }
 0xb5b   : > { %p5221_p13 = por %p5220_p12, %p5219_p11 }
 0xb5d   : > { %p5222_p0 = pnand %p5221_p13, %p5215_p8 }
 0xb5f   : > { %5225 = shalt.err (!%p5222_p0)
}
 0xb60   : > { %s5271_s21 = smov 768  }
 0xb61   : > { %5047 = dma.vmem_to_hbm [thread:$0]  (%p5350_p5), %s6363_s18, 1536, %s6361_s23, %s6367_s28, %s5271_s21, %s5271_s21, %s5264_s20  }
 0xb62 PF: > { %p5053_p1 = scmp.ge.s32.totalorder %s5260_s27, 2  ;;  %s4081_s29 = sand.u32 1, %s5248_s24  }
 0xb63   : > { %s4082_s8 = scalar_lea.sflag [#allocation5], %s4081_s29 }
 0xb64   : > { %p5050_p2 = pnand %p5053_p1, %p5354_p6 }
 0xb66   : > { %5243 = dma.done.wait (!%p5050_p2), %s4082_s8, 1536  }
 0xb67   : > { %5245 = vsyncadd (!%p5050_p2), %s4082_s8, 4294965760  ;;  %p17_p3 = scmp.ge.s32.totalorder %s5337_s30, 6   ;;  %s6420_s24 = smov %s5252_s25 }
 0xb68   : > { %s6421_s25 = smov %s5256_s26  ;;  %s6422_s26 = smov %s5348_s10 }
 0xb69   : > { %s6423_s27 = smov %s5337_s30  ;;  %19 = sbr.rel (!%p17_p3) target bundleno = 3 (0x3), region = 109 }
 0xb70   :  { %4087 = vsyncpa [#allocation5], 1 }
 0xb71   :  { %4089 = vsyncpa [#allocation5 + $0x1], 1 }

</bundles_post_ra>
